<compile_context>
chip_gen: v7x
topology: tpu7x:2x2x1
jax: 0.10.0
libtpu: 0.0.40
codegen_flags: <defaults>
</compile_context>

<pallas_src>
import functools

import numpy as np
import jax
import jax.numpy as jnp
from jax.experimental import pallas as pl
from jax.experimental.pallas import tpu as pltpu

LEAKY_SLOPE = 0.01  # nn.LeakyReLU() default


def _leaky_relu(x):
    return jnp.where(x >= 0, x, LEAKY_SLOPE * x)


# ---------- kernel 1: conv3x3 -> LReLU -> conv3x3 -> LReLU -> conv1x1 --------

def _conv_block_kernel(x_ref, w1_ref, b1_ref, w2_ref, b2_ref, wm_ref, bm_ref,
                       o_ref, pad_scr, *, H, W, C):
    """One batch image per grid step; intermediate activations stay in VMEM.

    x_ref  : (1, H, W, K1)   im2col'd input for conv1 (K1 = 9*Cin padded to 32)
    w1_ref : (K1, C)         conv1 weights, im2col (ky, kx, cin) layout
    b1_ref : (1, C)
    w2_ref : (9*C, C)        conv2 weights, im2col layout
    b2_ref : (1, C)
    wm_ref : (Cout, C)       conv_mid 1x1 weights, transposed
    bm_ref : (Cout, 1)
    o_ref  : (1, Cout, H*W)  lane-dense output (pre-upsample, pre-sigmoid)
    pad_scr: (H+2, W+2, C)   VMEM scratch holding the zero-padded conv1 output
    """
    HW = H * W
    K1 = x_ref.shape[-1]

    # conv1 (3x3, 3->C): one MXU dot over the pre-built im2col LHS.
    h1 = jnp.dot(x_ref[0].reshape(HW, K1), w1_ref[...],
                 preferred_element_type=jnp.float32)
    h1 = _leaky_relu(h1 + b1_ref[...])

    # Zero-padded conv1 output kept VMEM-resident (this is conv2's padding=1).
    pad_scr[...] = jnp.zeros(pad_scr.shape, pad_scr.dtype)
    pad_scr[pl.ds(1, H), pl.ds(1, W), :] = h1.reshape(H, W, C)

    # conv2 (3x3, C->C): im2col assembled in VMEM -> single K = 9*C MXU dot.
    taps = [pad_scr[pl.ds(ky, H), pl.ds(kx, W), :].reshape(HW, C)
            for ky in range(3) for kx in range(3)]
    lhs = jnp.concatenate(taps, axis=-1)                        # (HW, 9*C)
    h2 = jnp.dot(lhs, w2_ref[...], preferred_element_type=jnp.float32)
    h2 = _leaky_relu(h2 + b2_ref[...])

    # conv_mid (1x1, C->Cout), hoisted before the (linear) bilinear upsample.
    # Result laid out (Cout, HW): spatial pixels on the 128-lane axis.
    z = jax.lax.dot_general(wm_ref[...], h2,
                            dimension_numbers=(((1,), (1,)), ((), ())),
                            preferred_element_type=jnp.float32)
    o_ref[0] = (z + bm_ref[...]).astype(o_ref.dtype)


def conv_block_mid(x_nhwc, w1, b1, w2, b2, w_mid, b_mid):
    """Fused conv3x3+LReLU+conv3x3+LReLU+conv1x1; returns (N, Cout, H*W)."""
    N, H, W, Cin = x_nhwc.shape
    C = w1.shape[-1]
    Cout = w_mid.shape[-1]

    # im2col of the tiny 3-channel input at trace time in XLA
    # (9*3 = 27 taps, zero-padded to 32 for a lane-friendly contraction).
    xp = jnp.pad(x_nhwc, ((0, 0), (1, 1), (1, 1), (0, 0)))
    patches = [xp[:, ky:ky + H, kx:kx + W, :]
               for ky in range(3) for kx in range(3)]
    x_i2c = jnp.concatenate(patches, axis=-1)                   # (N, H, W, 27)
    K1 = 32
    x_i2c = jnp.pad(x_i2c, ((0, 0), (0, 0), (0, 0), (0, K1 - 9 * Cin)))
    w1_i2c = jnp.pad(w1.reshape(9 * Cin, C), ((0, K1 - 9 * Cin), (0, 0)))
    w2_i2c = w2.reshape(9 * C, C)                               # (ky,kx,cin) order

    HW = H * W
    cost = pl.CostEstimate(
        flops=2 * N * HW * (K1 * C + 9 * C * C + C * Cout),
        transcendentals=0,
        bytes_accessed=4 * (N * HW * K1 + K1 * C + 9 * C * C + Cout * C
                            + 2 * C + Cout + N * Cout * HW))

    kernel = functools.partial(_conv_block_kernel, H=H, W=W, C=C)
    # TODO(synk): for real super-resolution sizes, tile H into halo'd row blocks
    # (also "parallel") so each block's activations fit v7x's 64 MiB VMEM.
    return pl.pallas_call(
        kernel,
        out_shape=jax.ShapeDtypeStruct((N, Cout, HW), x_nhwc.dtype),
        grid_spec=pltpu.PrefetchScalarGridSpec(
            num_scalar_prefetch=0,
            grid=(N,),
            in_specs=[
                pl.BlockSpec((1, H, W, K1), lambda n: (n, 0, 0, 0)),
                pl.BlockSpec((K1, C), lambda n: (0, 0)),
                pl.BlockSpec((1, C), lambda n: (0, 0)),
                pl.BlockSpec((9 * C, C), lambda n: (0, 0)),
                pl.BlockSpec((1, C), lambda n: (0, 0)),
                pl.BlockSpec((Cout, C), lambda n: (0, 0)),
                pl.BlockSpec((Cout, 1), lambda n: (0, 0)),
            ],
            out_specs=pl.BlockSpec((1, Cout, HW), lambda n: (n, 0, 0)),
            scratch_shapes=[pltpu.VMEM((H + 2, W + 2, C), jnp.float32)],
        ),
        compiler_params=pltpu.CompilerParams(
            dimension_semantics=("parallel",)),
        cost_estimate=cost,
    )(x_i2c, w1_i2c, b1.reshape(1, C), w2_i2c, b2.reshape(1, C),
      jnp.transpose(w_mid), b_mid.reshape(Cout, 1))


# ---------------- kernel 2: bilinear 2x upsample + sigmoid (NCHW) ------------

def _bilinear2x_matrix(n):
    """(2n, n) interpolation matrix: 2x bilinear, align_corners=False (PyTorch)."""
    u = np.zeros((2 * n, n), np.float32)
    for i in range(2 * n):
        src = (i + 0.5) / 2.0 - 0.5
        i0 = int(np.floor(src))
        f = src - i0
        u[i, min(max(i0, 0), n - 1)] += 1.0 - f
        u[i, min(max(i0 + 1, 0), n - 1)] += f
    return u


def _upsample_sigmoid_kernel(z_ref, uh_ref, uwt_ref, o_ref, *, Cout):
    """Per-image separable bilinear 2x upsample (two MXU matmuls/channel) + sigmoid.

    z_ref  : (1, Cout, H, W)
    uh_ref : (2H, H)   row interpolation matrix
    uwt_ref: (W, 2W)   column interpolation matrix (transposed)
    o_ref  : (1, Cout, 2H, 2W)  NCHW output
    """
    for c in range(Cout):
        zc = z_ref[0, c]                                             # (H, W)
        t = jnp.dot(uh_ref[...], zc, preferred_element_type=jnp.float32)
        u = jnp.dot(t, uwt_ref[...], preferred_element_type=jnp.float32)
        o_ref[0, c] = jax.nn.sigmoid(u).astype(o_ref.dtype)


def upsample2x_sigmoid_nchw(z_nchw):
    """Bilinear 2x upsample + sigmoid on an NCHW tensor (Pallas kernel)."""
    N, Cout, H, W = z_nchw.shape
    uh = jnp.asarray(_bilinear2x_matrix(H))                     # (2H, H)
    uwt = jnp.asarray(_bilinear2x_matrix(W).T)                  # (W, 2W)

    cost = pl.CostEstimate(
        flops=2 * N * Cout * (2 * H * H * W + 2 * H * W * 2 * W),
        transcendentals=N * Cout * 4 * H * W,
        bytes_accessed=4 * (N * Cout * H * W + 2 * H * H + 2 * W * W
                            + N * Cout * 4 * H * W))

    kernel = functools.partial(_upsample_sigmoid_kernel, Cout=Cout)
    return pl.pallas_call(
        kernel,
        out_shape=jax.ShapeDtypeStruct((N, Cout, 2 * H, 2 * W), z_nchw.dtype),
        grid_spec=pltpu.PrefetchScalarGridSpec(
            num_scalar_prefetch=0,
            grid=(N,),
            in_specs=[
                pl.BlockSpec((1, Cout, H, W), lambda n: (n, 0, 0, 0)),
                pl.BlockSpec((2 * H, H), lambda n: (0, 0)),
                pl.BlockSpec((W, 2 * W), lambda n: (0, 0)),
            ],
            out_specs=pl.BlockSpec((1, Cout, 2 * H, 2 * W),
                                   lambda n: (n, 0, 0, 0)),
        ),
        compiler_params=pltpu.CompilerParams(
            dimension_semantics=("parallel",)),
        cost_estimate=cost,
    )(z_nchw, uh, uwt)


# ------------------------------ model pieces ---------------------------------

def base_net(x_nchw, params):
    x = jnp.transpose(x_nchw, (0, 2, 3, 1))                     # NCHW -> NHWC
    N, H, W, _ = x.shape
    # conv block + conv_mid (1x1).  conv_mid commutes with the bilinear
    # upsample (both linear, interpolation weights sum to 1), so it runs first
    # and only 3 channels are ever upsampled / round-tripped through HBM.
    z = conv_block_mid(x, params["w1"], params["b1"], params["w2"],
                       params["b2"], params["w_mid"], params["b_mid"])
    z = z.reshape(N, -1, H, W)                                  # free reshape
    # bilinear 2x upsample + sigmoid; NCHW output written directly.
    return upsample2x_sigmoid_nchw(z)


def base_net_reference(x_nchw, params):
    """Plain-JAX/XLA reference (original op order) for numeric validation."""
    dn = ("NHWC", "HWIO", "NHWC")
    x = jnp.transpose(x_nchw, (0, 2, 3, 1))
    x = jax.lax.conv_general_dilated(x, params["w1"], (1, 1), "SAME",
                                     dimension_numbers=dn) + params["b1"]
    x = _leaky_relu(x)
    x = jax.lax.conv_general_dilated(x, params["w2"], (1, 1), "SAME",
                                     dimension_numbers=dn) + params["b2"]
    x = _leaky_relu(x)
    N, H, W, C = x.shape
    x = jax.image.resize(x, (N, 2 * H, 2 * W, C), method="bilinear")
    x = jnp.einsum("nhwc,co->nhwo", x, params["w_mid"]) + params["b_mid"]
    return jnp.transpose(jax.nn.sigmoid(x), (0, 3, 1, 2))


def init_params(key):
    def conv_init(k, kh, kw, cin, cout):
        kw_key, kb_key = jax.random.split(k)
        bound = float((cin * kh * kw) ** -0.5)      # PyTorch-style fan_in bound
        w = jax.random.uniform(kw_key, (kh, kw, cin, cout), jnp.float32,
                               -bound, bound)
        b = jax.random.uniform(kb_key, (cout,), jnp.float32, -bound, bound)
        return w, b

    k1, k2, k3 = jax.random.split(key, 3)
    w1, b1 = conv_init(k1, 3, 3, 3, 64)
    w2, b2 = conv_init(k2, 3, 3, 64, 64)
    wm, bm = conv_init(k3, 1, 1, 64, 3)
    return {"w1": w1, "b1": b1, "w2": w2, "b2": b2,
            "w_mid": wm.reshape(64, 3), "b_mid": bm}


if __name__ == "__main__":
    key = jax.random.PRNGKey(0)
    pkey, xkey = jax.random.split(key)
    params = init_params(pkey)
    x = jax.random.normal(xkey, (2, 3, 16, 16), jnp.float32)    # NCHW like PyTorch

    out = jax.jit(base_net)(x, params)
    jax.block_until_ready(out)

    assert out.shape == (2, 3, 32, 32), out.shape
    assert bool(jnp.all((out >= 0) & (out <= 1)))

    ref = jax.jit(base_net_reference)(x, params)
    err = float(jnp.max(jnp.abs(out - ref)))
    assert err < 1e-2, f"max |pallas - reference| = {err}"
    print("KERNEL_OK")
</pallas_src>

<mosaic_0001>
module attributes {stable_mosaic.version = 11 : i64} {
  func.func @_conv_block_kernel(%arg0: i32, %arg1: memref<1x16x16x32xf32, #tpu.memory_space<vmem>>, %arg2: memref<32x64xf32, #tpu.memory_space<vmem>>, %arg3: memref<1x64xf32, #tpu.memory_space<vmem>>, %arg4: memref<576x64xf32, #tpu.memory_space<vmem>>, %arg5: memref<1x64xf32, #tpu.memory_space<vmem>>, %arg6: memref<3x64xf32, #tpu.memory_space<vmem>>, %arg7: memref<3x1xf32, #tpu.memory_space<vmem>>, %arg8: memref<1x3x256xf32, #tpu.memory_space<vmem>>, %arg9: memref<18x18x64xf32, #tpu.memory_space<vmem>>) attributes {dimension_semantics = [#tpu.dimension_semantics<parallel>], iteration_bounds = array<i64: 2>, scalar_prefetch = 0 : i64, scratch_operands = 1 : i64, tpu.core_type = #tpu.core_type<tc>, window_params = [{transform_indices = @transform_0, window_bounds = array<i64: 1, 16, 16, 32>}, {pipeline_mode = #tpu.pipeline_mode<synchronous>, transform_indices = @transform_1, window_bounds = array<i64: 32, 64>}, {pipeline_mode = #tpu.pipeline_mode<synchronous>, transform_indices = @transform_2, window_bounds = array<i64: 1, 64>}, {pipeline_mode = #tpu.pipeline_mode<synchronous>, transform_indices = @transform_3, window_bounds = array<i64: 576, 64>}, {pipeline_mode = #tpu.pipeline_mode<synchronous>, transform_indices = @transform_4, window_bounds = array<i64: 1, 64>}, {pipeline_mode = #tpu.pipeline_mode<synchronous>, transform_indices = @transform_5, window_bounds = array<i64: 3, 64>}, {pipeline_mode = #tpu.pipeline_mode<synchronous>, transform_indices = @transform_6, window_bounds = array<i64: 3, 1>}, {transform_indices = @transform_7, window_bounds = array<i64: 1, 3, 256>}]} {
    %c0 = arith.constant 0 : index
    %c0_0 = arith.constant 0 : index
    %c0_1 = arith.constant 0 : index
    %c0_2 = arith.constant 0 : index
    %0 = vector.load %arg1[%c0, %c0_0, %c0_1, %c0_2] : memref<1x16x16x32xf32, #tpu.memory_space<vmem>>, vector<1x16x16x32xf32>
    %1 = vector.shape_cast %0 : vector<1x16x16x32xf32> to vector<16x16x32xf32>
    %2 = vector.shape_cast %1 : vector<16x16x32xf32> to vector<256x32xf32>
    %c0_3 = arith.constant 0 : index
    %c0_4 = arith.constant 0 : index
    %3 = vector.load %arg2[%c0_3, %c0_4] : memref<32x64xf32, #tpu.memory_space<vmem>>, vector<32x64xf32>
    %cst = arith.constant dense<0.000000e+00> : vector<256x64xf32>
    %4 = tpu.matmul %2, %3, %cst {dimension_numbers = #tpu.dot_dimension_numbers<[1], [0], [0], [1], [0, 0, 1, 1], [], []>} : vector<256x32xf32>, vector<32x64xf32>, vector<256x64xf32> -> vector<256x64xf32>
    %c0_5 = arith.constant 0 : index
    %c0_6 = arith.constant 0 : index
    %5 = vector.load %arg3[%c0_5, %c0_6] : memref<1x64xf32, #tpu.memory_space<vmem>>, vector<1x64xf32>
    %6 = vector.broadcast %5 : vector<1x64xf32> to vector<256x64xf32>
    %7 = arith.addf %4, %6 : vector<256x64xf32>
    %cst_7 = arith.constant 0.000000e+00 : f32
    %8 = vector.broadcast %cst_7 : f32 to vector<256x64xf32>
    %9 = arith.cmpf oge, %7, %8 : vector<256x64xf32>
    %cst_8 = arith.constant 0.00999999977 : f32
    %10 = vector.broadcast %cst_8 : f32 to vector<256x64xf32>
    %11 = arith.mulf %10, %7 : vector<256x64xf32>
    %12 = arith.select %9, %7, %11 : vector<256x64xi1>, vector<256x64xf32>
    %cst_9 = arith.constant 0.000000e+00 : f32
    %13 = vector.broadcast %cst_9 : f32 to vector<18x18x64xf32>
    %c0_10 = arith.constant 0 : index
    %c0_11 = arith.constant 0 : index
    %c0_12 = arith.constant 0 : index
    %14 = vector.load %arg9[%c0_10, %c0_11, %c0_12] : memref<18x18x64xf32, #tpu.memory_space<vmem>>, vector<18x18x64xf32>
    tpu.vector_store %arg9[%c0_10, %c0_11, %c0_12], %13 {strides = array<i32>} : memref<18x18x64xf32, #tpu.memory_space<vmem>>, vector<18x18x64xf32>,
    %15 = vector.shape_cast %12 : vector<256x64xf32> to vector<16x16x64xf32>
    %c1 = arith.constant 1 : index
    %c1_13 = arith.constant 1 : index
    %c0_14 = arith.constant 0 : index
    %16 = vector.load %arg9[%c1, %c1_13, %c0_14] : memref<18x18x64xf32, #tpu.memory_space<vmem>>, vector<16x16x64xf32>
    tpu.vector_store %arg9[%c1, %c1_13, %c0_14], %15 {strides = array<i32>} : memref<18x18x64xf32, #tpu.memory_space<vmem>>, vector<16x16x64xf32>,
    %c0_15 = arith.constant 0 : index
    %c0_16 = arith.constant 0 : index
    %c0_17 = arith.constant 0 : index
    %17 = vector.load %arg9[%c0_15, %c0_16, %c0_17] : memref<18x18x64xf32, #tpu.memory_space<vmem>>, vector<16x16x64xf32>
    %18 = vector.shape_cast %17 : vector<16x16x64xf32> to vector<256x64xf32>
    %c0_18 = arith.constant 0 : index
    %c1_19 = arith.constant 1 : index
    %c0_20 = arith.constant 0 : index
    %19 = vector.load %arg9[%c0_18, %c1_19, %c0_20] : memref<18x18x64xf32, #tpu.memory_space<vmem>>, vector<16x16x64xf32>
    %20 = vector.shape_cast %19 : vector<16x16x64xf32> to vector<256x64xf32>
    %c0_21 = arith.constant 0 : index
    %c2 = arith.constant 2 : index
    %c0_22 = arith.constant 0 : index
    %21 = vector.load %arg9[%c0_21, %c2, %c0_22] : memref<18x18x64xf32, #tpu.memory_space<vmem>>, vector<16x16x64xf32>
    %22 = vector.shape_cast %21 : vector<16x16x64xf32> to vector<256x64xf32>
    %c1_23 = arith.constant 1 : index
    %c0_24 = arith.constant 0 : index
    %c0_25 = arith.constant 0 : index
    %23 = vector.load %arg9[%c1_23, %c0_24, %c0_25] : memref<18x18x64xf32, #tpu.memory_space<vmem>>, vector<16x16x64xf32>
    %24 = vector.shape_cast %23 : vector<16x16x64xf32> to vector<256x64xf32>
    %c1_26 = arith.constant 1 : index
    %c1_27 = arith.constant 1 : index
    %c0_28 = arith.constant 0 : index
    %25 = vector.load %arg9[%c1_26, %c1_27, %c0_28] : memref<18x18x64xf32, #tpu.memory_space<vmem>>, vector<16x16x64xf32>
    %26 = vector.shape_cast %25 : vector<16x16x64xf32> to vector<256x64xf32>
    %c1_29 = arith.constant 1 : index
    %c2_30 = arith.constant 2 : index
    %c0_31 = arith.constant 0 : index
    %27 = vector.load %arg9[%c1_29, %c2_30, %c0_31] : memref<18x18x64xf32, #tpu.memory_space<vmem>>, vector<16x16x64xf32>
    %28 = vector.shape_cast %27 : vector<16x16x64xf32> to vector<256x64xf32>
    %c2_32 = arith.constant 2 : index
    %c0_33 = arith.constant 0 : index
    %c0_34 = arith.constant 0 : index
    %29 = vector.load %arg9[%c2_32, %c0_33, %c0_34] : memref<18x18x64xf32, #tpu.memory_space<vmem>>, vector<16x16x64xf32>
    %30 = vector.shape_cast %29 : vector<16x16x64xf32> to vector<256x64xf32>
    %c2_35 = arith.constant 2 : index
    %c1_36 = arith.constant 1 : index
    %c0_37 = arith.constant 0 : index
    %31 = vector.load %arg9[%c2_35, %c1_36, %c0_37] : memref<18x18x64xf32, #tpu.memory_space<vmem>>, vector<16x16x64xf32>
    %32 = vector.shape_cast %31 : vector<16x16x64xf32> to vector<256x64xf32>
    %c2_38 = arith.constant 2 : index
    %c2_39 = arith.constant 2 : index
    %c0_40 = arith.constant 0 : index
    %33 = vector.load %arg9[%c2_38, %c2_39, %c0_40] : memref<18x18x64xf32, #tpu.memory_space<vmem>>, vector<16x16x64xf32>
    %34 = vector.shape_cast %33 : vector<16x16x64xf32> to vector<256x64xf32>
    %35 = tpu.concatenate %18, %20, %22, %24, %26, %28, %30, %32, %34 in 1 : vector<256x64xf32>, vector<256x64xf32>, vector<256x64xf32>, vector<256x64xf32>, vector<256x64xf32>, vector<256x64xf32>, vector<256x64xf32>, vector<256x64xf32>, vector<256x64xf32> -> vector<256x576xf32>
    %c0_41 = arith.constant 0 : index
    %c0_42 = arith.constant 0 : index
    %36 = vector.load %arg4[%c0_41, %c0_42] : memref<576x64xf32, #tpu.memory_space<vmem>>, vector<576x64xf32>
    %cst_43 = arith.constant dense<0.000000e+00> : vector<256x64xf32>
    %37 = tpu.matmul %35, %36, %cst_43 {dimension_numbers = #tpu.dot_dimension_numbers<[1], [0], [0], [1], [0, 0, 1, 1], [], []>} : vector<256x576xf32>, vector<576x64xf32>, vector<256x64xf32> -> vector<256x64xf32>
    %c0_44 = arith.constant 0 : index
    %c0_45 = arith.constant 0 : index
    %38 = vector.load %arg5[%c0_44, %c0_45] : memref<1x64xf32, #tpu.memory_space<vmem>>, vector<1x64xf32>
    %39 = vector.broadcast %38 : vector<1x64xf32> to vector<256x64xf32>
    %40 = arith.addf %37, %39 : vector<256x64xf32>
    %cst_46 = arith.constant 0.000000e+00 : f32
    %41 = vector.broadcast %cst_46 : f32 to vector<256x64xf32>
    %42 = arith.cmpf oge, %40, %41 : vector<256x64xf32>
    %cst_47 = arith.constant 0.00999999977 : f32
    %43 = vector.broadcast %cst_47 : f32 to vector<256x64xf32>
    %44 = arith.mulf %43, %40 : vector<256x64xf32>
    %45 = arith.select %42, %40, %44 : vector<256x64xi1>, vector<256x64xf32>
    %c0_48 = arith.constant 0 : index
    %c0_49 = arith.constant 0 : index
    %46 = vector.load %arg6[%c0_48, %c0_49] : memref<3x64xf32, #tpu.memory_space<vmem>>, vector<3x64xf32>
    %cst_50 = arith.constant dense<0.000000e+00> : vector<3x256xf32>
    %47 = tpu.matmul %46, %45, %cst_50 {dimension_numbers = #tpu.dot_dimension_numbers<[1], [1], [0], [0], [0, 0, 1, 0], [], []>} : vector<3x64xf32>, vector<256x64xf32>, vector<3x256xf32> -> vector<3x256xf32>
    %c0_51 = arith.constant 0 : index
    %c0_52 = arith.constant 0 : index
    %48 = vector.load %arg7[%c0_51, %c0_52] : memref<3x1xf32, #tpu.memory_space<vmem>>, vector<3x1xf32>
    %49 = vector.broadcast %48 : vector<3x1xf32> to vector<3x256xf32>
    %50 = arith.addf %47, %49 : vector<3x256xf32>
    %c0_53 = arith.constant 0 : index
    %c0_54 = arith.constant 0 : index
    %c0_55 = arith.constant 0 : index
    %51 = vector.load %arg8[%c0_53, %c0_54, %c0_55] : memref<1x3x256xf32, #tpu.memory_space<vmem>>, vector<1x3x256xf32>
    %52 = vector.shape_cast %51 : vector<1x3x256xf32> to vector<3x256xf32>
    %53 = vector.shape_cast %50 : vector<3x256xf32> to vector<1x3x256xf32>
    tpu.vector_store %arg8[%c0_53, %c0_54, %c0_55], %53 {strides = array<i32>} : memref<1x3x256xf32, #tpu.memory_space<vmem>>, vector<1x3x256xf32>,
    return
  }
  func.func @transform_0(%arg0: i32) -> (i32, i32, i32, i32) {
    %c0_i32 = arith.constant 0 : i32
    %c0_i32_0 = arith.constant 0 : i32
    %c0_i32_1 = arith.constant 0 : i32
    %c0_i32_2 = arith.constant 0 : i32
    return %arg0, %c0_i32, %c0_i32_0, %c0_i32_1 : i32, i32, i32, i32
  }
  func.func @transform_1(%arg0: i32) -> (i32, i32) {
    %c0_i32 = arith.constant 0 : i32
    %c0_i32_0 = arith.constant 0 : i32
    %c0_i32_1 = arith.constant 0 : i32
    return %c0_i32, %c0_i32_0 : i32, i32
  }
  func.func @transform_2(%arg0: i32) -> (i32, i32) {
    %c0_i32 = arith.constant 0 : i32
    %c0_i32_0 = arith.constant 0 : i32
    %c0_i32_1 = arith.constant 0 : i32
    return %c0_i32, %c0_i32_0 : i32, i32
  }
  func.func @transform_3(%arg0: i32) -> (i32, i32) {
    %c0_i32 = arith.constant 0 : i32
    %c0_i32_0 = arith.constant 0 : i32
    %c0_i32_1 = arith.constant 0 : i32
    return %c0_i32, %c0_i32_0 : i32, i32
  }
  func.func @transform_4(%arg0: i32) -> (i32, i32) {
    %c0_i32 = arith.constant 0 : i32
    %c0_i32_0 = arith.constant 0 : i32
    %c0_i32_1 = arith.constant 0 : i32
    return %c0_i32, %c0_i32_0 : i32, i32
  }
  func.func @transform_5(%arg0: i32) -> (i32, i32) {
    %c0_i32 = arith.constant 0 : i32
    %c0_i32_0 = arith.constant 0 : i32
    %c0_i32_1 = arith.constant 0 : i32
    return %c0_i32, %c0_i32_0 : i32, i32
  }
  func.func @transform_6(%arg0: i32) -> (i32, i32) {
    %c0_i32 = arith.constant 0 : i32
    %c0_i32_0 = arith.constant 0 : i32
    %c0_i32_1 = arith.constant 0 : i32
    return %c0_i32, %c0_i32_0 : i32, i32
  }
  func.func @transform_7(%arg0: i32) -> (i32, i32, i32) {
    %c0_i32 = arith.constant 0 : i32
    %c0_i32_0 = arith.constant 0 : i32
    %c0_i32_1 = arith.constant 0 : i32
    return %arg0, %c0_i32, %c0_i32_0 : i32, i32, i32
  }
}

module attributes {stable_mosaic.version = 11 : i64} {
  func.func @_upsample_sigmoid_kernel(%arg0: i32, %arg1: memref<1x3x16x16xf32, #tpu.memory_space<vmem>>, %arg2: memref<32x16xf32, #tpu.memory_space<vmem>>, %arg3: memref<16x32xf32, #tpu.memory_space<vmem>>, %arg4: memref<1x3x32x32xf32, #tpu.memory_space<vmem>>) attributes {dimension_semantics = [#tpu.dimension_semantics<parallel>], iteration_bounds = array<i64: 2>, scalar_prefetch = 0 : i64, scratch_operands = 0 : i64, tpu.core_type = #tpu.core_type<tc>, window_params = [{transform_indices = @transform_0, window_bounds = array<i64: 1, 3, 16, 16>}, {pipeline_mode = #tpu.pipeline_mode<synchronous>, transform_indices = @transform_1, window_bounds = array<i64: 32, 16>}, {pipeline_mode = #tpu.pipeline_mode<synchronous>, transform_indices = @transform_2, window_bounds = array<i64: 16, 32>}, {transform_indices = @transform_3, window_bounds = array<i64: 1, 3, 32, 32>}]} {
    %c0 = arith.constant 0 : index
    %c0_0 = arith.constant 0 : index
    %c0_1 = arith.constant 0 : index
    %c0_2 = arith.constant 0 : index
    %0 = vector.load %arg1[%c0, %c0_0, %c0_1, %c0_2] : memref<1x3x16x16xf32, #tpu.memory_space<vmem>>, vector<1x1x16x16xf32>
    %1 = vector.shape_cast %0 : vector<1x1x16x16xf32> to vector<16x16xf32>
    %c0_3 = arith.constant 0 : index
    %c0_4 = arith.constant 0 : index
    %2 = vector.load %arg2[%c0_3, %c0_4] : memref<32x16xf32, #tpu.memory_space<vmem>>, vector<32x16xf32>
    %cst = arith.constant dense<0.000000e+00> : vector<32x16xf32>
    %3 = tpu.matmul %2, %1, %cst {dimension_numbers = #tpu.dot_dimension_numbers<[1], [0], [0], [1], [0, 0, 1, 1], [], []>} : vector<32x16xf32>, vector<16x16xf32>, vector<32x16xf32> -> vector<32x16xf32>
    %c0_5 = arith.constant 0 : index
    %c0_6 = arith.constant 0 : index
    %4 = vector.load %arg3[%c0_5, %c0_6] : memref<16x32xf32, #tpu.memory_space<vmem>>, vector<16x32xf32>
    %cst_7 = arith.constant dense<0.000000e+00> : vector<32x32xf32>
    %5 = tpu.matmul %3, %4, %cst_7 {dimension_numbers = #tpu.dot_dimension_numbers<[1], [0], [0], [1], [0, 0, 1, 1], [], []>} : vector<32x16xf32>, vector<16x32xf32>, vector<32x32xf32> -> vector<32x32xf32>
    %6 = arith.negf %5 : vector<32x32xf32>
    %7 = math.exp %6 : vector<32x32xf32>
    %cst_8 = arith.constant 1.000000e+00 : f32
    %8 = vector.broadcast %cst_8 : f32 to vector<32x32xf32>
    %9 = arith.addf %8, %7 : vector<32x32xf32>
    %10 = arith.divf %8, %9 : vector<32x32xf32>
    %c0_9 = arith.constant 0 : index
    %c0_10 = arith.constant 0 : index
    %c0_11 = arith.constant 0 : index
    %c0_12 = arith.constant 0 : index
    %11 = vector.load %arg4[%c0_9, %c0_10, %c0_11, %c0_12] : memref<1x3x32x32xf32, #tpu.memory_space<vmem>>, vector<1x1x32x32xf32>
    %12 = vector.shape_cast %11 : vector<1x1x32x32xf32> to vector<32x32xf32>
    %13 = vector.shape_cast %10 : vector<32x32xf32> to vector<1x1x32x32xf32>
    tpu.vector_store %arg4[%c0_9, %c0_10, %c0_11, %c0_12], %13 {strides = array<i32>} : memref<1x3x32x32xf32, #tpu.memory_space<vmem>>, vector<1x1x32x32xf32>,
    %c0_13 = arith.constant 0 : index
    %c1 = arith.constant 1 : index
    %c0_14 = arith.constant 0 : index
    %c0_15 = arith.constant 0 : index
    %14 = vector.load %arg1[%c0_13, %c1, %c0_14, %c0_15] : memref<1x3x16x16xf32, #tpu.memory_space<vmem>>, vector<1x1x16x16xf32>
    %15 = vector.shape_cast %14 : vector<1x1x16x16xf32> to vector<16x16xf32>
    %c0_16 = arith.constant 0 : index
    %c0_17 = arith.constant 0 : index
    %16 = vector.load %arg2[%c0_16, %c0_17] : memref<32x16xf32, #tpu.memory_space<vmem>>, vector<32x16xf32>
    %cst_18 = arith.constant dense<0.000000e+00> : vector<32x16xf32>
    %17 = tpu.matmul %16, %15, %cst_18 {dimension_numbers = #tpu.dot_dimension_numbers<[1], [0], [0], [1], [0, 0, 1, 1], [], []>} : vector<32x16xf32>, vector<16x16xf32>, vector<32x16xf32> -> vector<32x16xf32>
    %c0_19 = arith.constant 0 : index
    %c0_20 = arith.constant 0 : index
    %18 = vector.load %arg3[%c0_19, %c0_20] : memref<16x32xf32, #tpu.memory_space<vmem>>, vector<16x32xf32>
    %cst_21 = arith.constant dense<0.000000e+00> : vector<32x32xf32>
    %19 = tpu.matmul %17, %18, %cst_21 {dimension_numbers = #tpu.dot_dimension_numbers<[1], [0], [0], [1], [0, 0, 1, 1], [], []>} : vector<32x16xf32>, vector<16x32xf32>, vector<32x32xf32> -> vector<32x32xf32>
    %20 = arith.negf %19 : vector<32x32xf32>
    %21 = math.exp %20 : vector<32x32xf32>
    %cst_22 = arith.constant 1.000000e+00 : f32
    %22 = vector.broadcast %cst_22 : f32 to vector<32x32xf32>
    %23 = arith.addf %22, %21 : vector<32x32xf32>
    %24 = arith.divf %22, %23 : vector<32x32xf32>
    %c0_23 = arith.constant 0 : index
    %c1_24 = arith.constant 1 : index
    %c0_25 = arith.constant 0 : index
    %c0_26 = arith.constant 0 : index
    %25 = vector.load %arg4[%c0_23, %c1_24, %c0_25, %c0_26] : memref<1x3x32x32xf32, #tpu.memory_space<vmem>>, vector<1x1x32x32xf32>
    %26 = vector.shape_cast %25 : vector<1x1x32x32xf32> to vector<32x32xf32>
    %27 = vector.shape_cast %24 : vector<32x32xf32> to vector<1x1x32x32xf32>
    tpu.vector_store %arg4[%c0_23, %c1_24, %c0_25, %c0_26], %27 {strides = array<i32>} : memref<1x3x32x32xf32, #tpu.memory_space<vmem>>, vector<1x1x32x32xf32>,
    %c0_27 = arith.constant 0 : index
    %c2 = arith.constant 2 : index
    %c0_28 = arith.constant 0 : index
    %c0_29 = arith.constant 0 : index
    %28 = vector.load %arg1[%c0_27, %c2, %c0_28, %c0_29] : memref<1x3x16x16xf32, #tpu.memory_space<vmem>>, vector<1x1x16x16xf32>
    %29 = vector.shape_cast %28 : vector<1x1x16x16xf32> to vector<16x16xf32>
    %c0_30 = arith.constant 0 : index
    %c0_31 = arith.constant 0 : index
    %30 = vector.load %arg2[%c0_30, %c0_31] : memref<32x16xf32, #tpu.memory_space<vmem>>, vector<32x16xf32>
    %cst_32 = arith.constant dense<0.000000e+00> : vector<32x16xf32>
    %31 = tpu.matmul %30, %29, %cst_32 {dimension_numbers = #tpu.dot_dimension_numbers<[1], [0], [0], [1], [0, 0, 1, 1], [], []>} : vector<32x16xf32>, vector<16x16xf32>, vector<32x16xf32> -> vector<32x16xf32>
    %c0_33 = arith.constant 0 : index
    %c0_34 = arith.constant 0 : index
    %32 = vector.load %arg3[%c0_33, %c0_34] : memref<16x32xf32, #tpu.memory_space<vmem>>, vector<16x32xf32>
    %cst_35 = arith.constant dense<0.000000e+00> : vector<32x32xf32>
    %33 = tpu.matmul %31, %32, %cst_35 {dimension_numbers = #tpu.dot_dimension_numbers<[1], [0], [0], [1], [0, 0, 1, 1], [], []>} : vector<32x16xf32>, vector<16x32xf32>, vector<32x32xf32> -> vector<32x32xf32>
    %34 = arith.negf %33 : vector<32x32xf32>
    %35 = math.exp %34 : vector<32x32xf32>
    %cst_36 = arith.constant 1.000000e+00 : f32
    %36 = vector.broadcast %cst_36 : f32 to vector<32x32xf32>
    %37 = arith.addf %36, %35 : vector<32x32xf32>
    %38 = arith.divf %36, %37 : vector<32x32xf32>
    %c0_37 = arith.constant 0 : index
    %c2_38 = arith.constant 2 : index
    %c0_39 = arith.constant 0 : index
    %c0_40 = arith.constant 0 : index
    %39 = vector.load %arg4[%c0_37, %c2_38, %c0_39, %c0_40] : memref<1x3x32x32xf32, #tpu.memory_space<vmem>>, vector<1x1x32x32xf32>
    %40 = vector.shape_cast %39 : vector<1x1x32x32xf32> to vector<32x32xf32>
    %41 = vector.shape_cast %38 : vector<32x32xf32> to vector<1x1x32x32xf32>
    tpu.vector_store %arg4[%c0_37, %c2_38, %c0_39, %c0_40], %41 {strides = array<i32>} : memref<1x3x32x32xf32, #tpu.memory_space<vmem>>, vector<1x1x32x32xf32>,
    return
  }
  func.func @transform_0(%arg0: i32) -> (i32, i32, i32, i32) {
    %c0_i32 = arith.constant 0 : i32
    %c0_i32_0 = arith.constant 0 : i32
    %c0_i32_1 = arith.constant 0 : i32
    %c0_i32_2 = arith.constant 0 : i32
    return %arg0, %c0_i32, %c0_i32_0, %c0_i32_1 : i32, i32, i32, i32
  }
  func.func @transform_1(%arg0: i32) -> (i32, i32) {
    %c0_i32 = arith.constant 0 : i32
    %c0_i32_0 = arith.constant 0 : i32
    %c0_i32_1 = arith.constant 0 : i32
    return %c0_i32, %c0_i32_0 : i32, i32
  }
  func.func @transform_2(%arg0: i32) -> (i32, i32) {
    %c0_i32 = arith.constant 0 : i32
    %c0_i32_0 = arith.constant 0 : i32
    %c0_i32_1 = arith.constant 0 : i32
    return %c0_i32, %c0_i32_0 : i32, i32
  }
  func.func @transform_3(%arg0: i32) -> (i32, i32, i32, i32) {
    %c0_i32 = arith.constant 0 : i32
    %c0_i32_0 = arith.constant 0 : i32
    %c0_i32_1 = arith.constant 0 : i32
    %c0_i32_2 = arith.constant 0 : i32
    return %arg0, %c0_i32, %c0_i32_0, %c0_i32_1 : i32, i32, i32, i32
  }
}

</mosaic_0001>

<bundles_post_ra>
// kernel: base_net.3
= control target key start
LH: loop header
LB: loop body
LE: loop exit
PB: predicated region body
PF: predicated region fallthrough
CT: control target
= control target key end

     0   :  { %8 = vsyncpa [#allocation3], 0  ;;  %s1472_s0 = inlined_call_operand.vmem [shape: f32[2,3,16,16], index: 0, kind: input, shape index: {}]   ;;  %s1473_s1 = inlined_call_operand.vmem [shape: f32[32,16], index: 1, kind: input, shape index: {}]   ;;  %s1474_s2 = inlined_call_operand.vmem [shape: f32[16,32], index: 2, kind: input, shape index: {}]   ;;  %s1475_s3 = inlined_call_operand.hbm [shape: f32[2,3,32,32], index: 3, kind: output, shape index: {}]  }
   0x1   :  { %10 = vsyncpa [#allocation3 + $0x1], 0  ;;  %s1296_s12 = smov 0   ;;  %s1298_s13 = smov 0  }
   0x2   :  { %s1300_s14 = smov 0   ;;  %s1302_s15 = smov 0  }
   0x3 LB: > { %s1317_s16 = sadd.s32 4294967295, %s1271_s15   ;;  %s941_s17 = sadd.s32 4294967294, %s1271_s15   ;;  %s1271_s15 = sphi %s1302_s15, %s1481_s15   ;;  %s1267_s14 = sphi %s1300_s14, %s1480_s14   ;;  %s1263_s13 = sphi %s1298_s13, %s1479_s13   ;;  %s1259_s12 = sphi %s1296_s12, %s1478_s12  }
   0x4   : > { %s1321_s18 = sadd.s32 1, %s1271_s15   ;;  %s91_s19 = sadd.s32 1, %s1267_s14 }
   0x5   : > { %s88_s20 = ssub.s32 %s1271_s15, %s1321_s18  ;;  %p101_p0 = scmp.ne.s32.totalorder %s1267_s14, %s1263_s13 }
   0x6   : > { %p89_p1 = scmp.eq.s32.totalorder %s88_s20, 0  ;;  %p102_p2 = scmp.eq.s32.totalorder %s1317_s16, 1 }
   0x7   : > { %p107_p3 = scmp.ne.s32.totalorder %s1263_s13, %s1259_s12  ;;  %p108_p4 = scmp.eq.s32.totalorder %s941_s17, 1 }
   0x8   : > { %s1332_s21 = scalar_select %p89_p1, %s1267_s14, %s91_s19  }
   0x9   : > { %p1334_p5 = por %p102_p2, %p101_p0  ;;  %p1338_p6 = por %p108_p4, %p107_p3 }
   0xa   : > { %p944_p7 = scmp.ge.s32.totalorder %s1271_s15, 1  ;;  %p140_p8 = scmp.lt.s32.totalorder %s1271_s15, 3 }
   0xc   : > { %p141_p9 = pnand %p944_p7, %p140_p8 }
   0xd   : > { %p164_p10 = scmp.lt.s32.totalorder (!%p141_p9), %s1317_s16, 1  ;;  %v171_v0 = vld [vmem:[%s1473_s1] sm:$0xff] (!%p141_p9)  ;;  %vm175_vm0 = vcmask (!%p141_p9), 130048   ;;  %v274_v2 = vld [vmem:[%s1474_s2 + $0x8] sm:$0xff] (!%p141_p9)  ;;  %v173_v13 = vld [vmem:[%s1473_s1 + $0x10] sm:$0xff] (!%p141_p9)  ;;  %s161_s20 = sand.u32 (!%p141_p9), 1, %s1263_s13  }
   0xe   : > { %144 = sbr.rel (%p141_p9) target bundleno = 523 (0x20b), region = 32  ;;  %1037 = vmatprep.mubr.msk.f32.mxu0 (!%p141_p9), %vm175_vm0, %v171_v0  ;;  %v273_v1 = vld [vmem:[%s1474_s2] sm:$0xff] (!%p141_p9)  ;;  %v172_v12 = vld [vmem:[%s1473_s1 + $0x8] sm:$0xff] (!%p141_p9)  ;;  %v174_v15 = vld [vmem:[%s1473_s1 + $0x18] sm:$0xff] (!%p141_p9)  ;;  %vm396_vm1 = vcmask (!%p141_p9), 261120   ;;  %s1273_s5 = smov (!%p141_p9), [#allocation2]  }
   0xf   : > { %v1097_v3 = vpack.c.bf16 (!%p141_p9), %v274_v2, %v273_v1  ;;  %s1117_s24 = smul.u32 (!%p141_p9), 96, %s161_s20  ;;  %s1213_s6 = sshll.u32 (!%p141_p9), %s1273_s5, 4  ;;  %s1214_s6 = int_to_ptr.vmem [resolvable:$false] %s1213_s6 }
  0x10   : > { %s1119_s26 = smul.u32 (!%p141_p9), 1536, %s1317_s16 }
  0x11   : > { %1098 = vmatprep.subr.bf16.mxu1 (!%p141_p9), %v1097_v3  ;;  %s1394_s25 = scalar_lea.vmem (!%p141_p9), [#allocation2], %s1117_s24 }
  0x12   : > { %1100 = vmatpush3.bf16.msra.mxu1 (!%p141_p9), %v1097_v3  ;;  %s879_s27 = sshll.u32 (!%p141_p9), %s1394_s25, 4  ;;  %s1425_s27 = int_to_ptr.vmem [resolvable:$true] %s879_s27 }
  0x13   : > { %1106 = vmatprep.subr.bf16.mxu1 (!%p141_p9), %v1097_v3  ;;  %p1216_p0 = scmp.lt.s32.totalorder (!%p141_p9), %s1425_s27, %s1214_s6 }
  0x15   : > { %s165_s30 = scalar_select %p164_p10, %s1317_s16, 1 }
  0x16   : > { %s1431_s16 = scalar_lea.sflag [#allocation3], %s161_s20 }
  0x17   : > { %s1118_s4 = smul.u32 48, %s165_s30  ;;  %s1423_s30 = scalar_lea.hbm %s1475_s3, %s1119_s26 }
  0x19   : > { %s168_s7 = scalar_lea.vmem %s1472_s0, %s1118_s4  ;;  %s1209_s4 = scalar_lea.vmem %s1425_s27, 1536 }
  0x1a   : > { %v169_v4 = vld [vmem:[%s168_s7] sm:$0xff]  ;;  %v170_v5 = vld [vmem:[%s168_s7 + $0x8] sm:$0xff]  ;;  %v958_v6 = vld [vmem:[%s168_s7 + $0x10] sm:$0xff]  ;;  %p1210_p11 = scmp.ne.s32.totalorder %s1425_s27, %s1209_s4 }
  0x1b   : > { %v1093_v7 = vpack.c.bf16 %v170_v5, %v169_v4  ;;  %v959_v8 = vld [vmem:[%s168_s7 + $0x18] sm:$0xff]  ;;  %v976_v10 = vld [vmem:[%s168_s7 + $0x20] sm:$0xff]  ;;  %v977_v11 = vld [vmem:[%s168_s7 + $0x28] sm:$0xff]  ;;  %s1215_s7 = scalar_lea.vmem %s1214_s6, 3072 }
  0x1c   : > { %v1101_v9 = vpack.c.bf16 %v959_v8, %v958_v6  ;;  %v1109_v14 = vpack.c.bf16 %v977_v11, %v976_v10  ;;  %p1211_p12 = pnand %p1210_p11, %p1334_p5  ;;  %p1217_p1 = scmp.lt.s32.totalorder %s1215_s7, %s1209_s4 }
  0x1d   : > { %1094 = vmatprep.subr.bf16.mxu0 %v1093_v7 }
  0x1e   : > { %1096 = vmatpush3.bf16.msra.mxu0 %v1093_v7  ;;  %p1212_p13 = pneg %p1211_p12  ;;  %p1218_p2 = por %p1217_p1, %p1216_p0 }
  0x1f   : > { %1102 = vmatprep.subr.bf16.mxu0 %v1101_v9 }
  0x20   : > { %p1219_p3 = pnand %p1218_p2, %p1212_p13 }
  0x21   : > { %1038 = vmatmul.mubr.msk.f32.vlgmr.msra.gmra.mrb[0].mxu0 %vm175_vm0, %v172_v12 }
  0x22   : > { %1104 = vmatpush3.bf16.msra.mxu0 %v1101_v9  ;;  %1040 = vmatprep.mubr.msk.f32.mxu0 %vm175_vm0, %v173_v13 }
  0x23   : > { %1110 = vmatprep.subr.bf16.mxu0 %v1109_v14 }
  0x25   : > { %1041 = vmatmul.mubr.msk.f32.gmra.mrb[2].mxu0 %vm175_vm0, %v174_v15 }
  0x26   : > { %1057 = vmatprep.mubr.msk.f32.mxu0 %vm175_vm0, %v171_v0 }
  0x29   : > { %1058 = vmatmul.mubr.msk.f32.vlgmr.msra.gmra.mrb[4].mxu0 %vm175_vm0, %v172_v12 }
  0x2a   : > { %1112 = vmatpush3.bf16.msra.mxu0 %v1109_v14  ;;  %1060 = vmatprep.mubr.msk.f32.mxu0 %vm175_vm0, %v173_v13 }
  0x2d   : > { %1061 = vmatmul.mubr.msk.f32.gmra.mrb[6].mxu0 %vm175_vm0, %v174_v15 }
  0x2e   : > { %1077 = vmatprep.mubr.msk.f32.mxu0 %vm175_vm0, %v171_v0 }
  0x31   : > { %1078 = vmatmul.mubr.msk.f32.vlgmr.msra.gmra.mrb[8].mxu0 %vm175_vm0, %v172_v12 }
  0x32   : > { %1080 = vmatprep.mubr.msk.f32.mxu0 %vm175_vm0, %v173_v13 }
  0x35   : > { %1081 = vmatmul.mubr.msk.f32.gmra.mrb[10].mxu0 %vm175_vm0, %v174_v15 }
  0xf4   : > { %v1039_v16 = vpop.f32.mrb[0].mxu0 }
  0xf5   : > { %v254_v17 = vpop.f32.mrb[1].mxu0 }
  0xf6   : > { %1047 = vmatprep.mubr.msk.f32.mxu1 %vm175_vm0, %v254_v17 }
  0xf7   : > { %1048 = vmatmul.mubr.msk.f32.vlgmr.msra.gmra.mrb[0].mxu1 %vm175_vm0, %v1039_v16 }
  0xf8   : > { %v1042_v18 = vpop.f32.mrb[2].mxu0  ;;  %1108 = vmatpush3.bf16.msra.mxu1 %v1097_v3 }
  0xf9   : > { %v264_v19 = vpop.f32.mrb[3].mxu0  ;;  %1114 = vmatprep.subr.bf16.mxu1 %v1097_v3 }
  0xfa   : > { %1050 = vmatprep.mubr.msk.f32.mxu1 %vm175_vm0, %v264_v19 }
  0xfb   : > { %1051 = vmatmul.mubr.msk.f32.gmra.mrb[2].mxu1 %vm175_vm0, %v1042_v18 }
  0xfc   : > { %v1059_v20 = vpop.f32.mrb[4].mxu0 }
  0xfd   : > { %v486_v21 = vpop.f32.mrb[5].mxu0 }
  0xfe   : > { %1067 = vmatprep.mubr.msk.f32.mxu1 %vm175_vm0, %v486_v21 }
  0xff   : > { %1068 = vmatmul.mubr.msk.f32.vlgmr.msra.gmra.mrb[4].mxu1 %vm175_vm0, %v1059_v20 }
 0x100   : > { %v1062_v22 = vpop.f32.mrb[6].mxu0  ;;  %1116 = vmatpush3.bf16.msra.mxu1 %v1097_v3 }
 0x101   : > { %v496_v23 = vpop.f32.mrb[7].mxu0 }
 0x102   : > { %1070 = vmatprep.mubr.msk.f32.mxu1 %vm175_vm0, %v496_v23 }
 0x103   : > { %1071 = vmatmul.mubr.msk.f32.gmra.mrb[6].mxu1 %vm175_vm0, %v1062_v22 }
 0x104   : > { %v1079_v24 = vpop.f32.mrb[8].mxu0 }
 0x105   : > { %v718_v25 = vpop.f32.mrb[9].mxu0 }
 0x106   : > { %1087 = vmatprep.mubr.msk.f32.mxu1 %vm175_vm0, %v718_v25 }
 0x107   : > { %1088 = vmatmul.mubr.msk.f32.vlgmr.msra.gmra.mrb[8].mxu1 %vm175_vm0, %v1079_v24 }
 0x108   : > { %v1082_v26 = vpop.f32.mrb[10].mxu0 }
 0x109   : > { %v728_v27 = vpop.f32.mrb[11].mxu0 }
 0x10a   : > { %1090 = vmatprep.mubr.msk.f32.mxu1 %vm175_vm0, %v728_v27 }
 0x10b   : > { %1091 = vmatmul.mubr.msk.f32.gmra.mrb[10].mxu1 %vm175_vm0, %v1082_v26 }
 0x1ca   : > { %v1049_v28 = vpop.f32.mrb[0].mxu1 }
 0x1cb   : > { %v955_v29 = vmul.f32 -1.442695, %v1049_v28  ;;  %v353_v30 = vpop.f32.mrb[1].mxu1 }
 0x1cc   : > { %v954_v31 = vmul.f32 -1.442695, %v353_v30 }
 0x1cd   : > { %1161 = vpow2.f32 %v955_v29 }
 0x1ce   : > { %1163 = vpow2.f32 %v954_v31  ;;  %v1052_v32 = vpop.f32.mrb[2].mxu1 }
 0x1cf   : > { %v957_v33 = vmul.f32 -1.442695, %v1052_v32  ;;  %v363_v34 = vpop.f32.mrb[3].mxu1 }
 0x1d0   : > { %v956_v35 = vmul.f32 -1.442695, %v363_v34 }
 0x1d1   : > { %1165 = vpow2.f32 %v957_v33 }
 0x1d2   : > { %1167 = vpow2.f32 %v956_v35  ;;  %v1069_v36 = vpop.f32.mrb[4].mxu1 }
 0x1d3   : > { %v969_v37 = vmul.f32 -1.442695, %v1069_v36  ;;  %v585_v38 = vpop.f32.mrb[5].mxu1 }
 0x1d4   : > { %v968_v39 = vmul.f32 -1.442695, %v585_v38 }
 0x1d5   : > { %1169 = vpow2.f32 %v969_v37 }
 0x1d6   : > { %1171 = vpow2.f32 %v968_v39  ;;  %v1072_v40 = vpop.f32.mrb[6].mxu1 }
 0x1d7   : > { %v1162_v41 = vpop.eup %1161  ;;  %v971_v42 = vmul.f32 -1.442695, %v1072_v40  ;;  %v595_v43 = vpop.f32.mrb[7].mxu1 }
 0x1d8   : > { %v1164_v44 = vpop.eup %1163  ;;  %v385_v45 = vadd.f32 1.0, %v1162_v41  ;;  %v970_v46 = vmul.f32 -1.442695, %v595_v43 }
 0x1d9   : > { %v384_v47 = vadd.f32 1.0, %v1164_v44  ;;  %1173 = vpow2.f32 %v971_v42 }
 0x1da   : > { %1175 = vrcp.f32 %v385_v45  ;;  %v1089_v48 = vpop.f32.mrb[8].mxu1 }
 0x1db   : > { %v1166_v49 = vpop.eup %1165  ;;  %1177 = vrcp.f32 %v384_v47  ;;  %v987_v50 = vmul.f32 -1.442695, %v1089_v48  ;;  %v817_v51 = vpop.f32.mrb[9].mxu1 }
 0x1dc   : > { %v1168_v52 = vpop.eup %1167  ;;  %v387_v53 = vadd.f32 1.0, %v1166_v49  ;;  %1179 = vpow2.f32 %v970_v46  ;;  %v986_v54 = vmul.f32 -1.442695, %v817_v51 }
 0x1dd   : > { %v386_v55 = vadd.f32 1.0, %v1168_v52  ;;  %1181 = vpow2.f32 %v987_v50 }
 0x1de   : > { %1183 = vrcp.f32 %v387_v53  ;;  %v1092_v56 = vpop.f32.mrb[10].mxu1 }
 0x1df   : > { %v1170_v57 = vpop.eup %1169  ;;  %1185 = vrcp.f32 %v386_v55  ;;  %v989_v58 = vmul.f32 -1.442695, %v1092_v56  ;;  %v827_v59 = vpop.f32.mrb[11].mxu1 }
 0x1e0   : > { %v1172_v60 = vpop.eup %1171  ;;  %v617_v61 = vadd.f32 1.0, %v1170_v57  ;;  %1187 = vpow2.f32 %v986_v54  ;;  %v988_v62 = vmul.f32 -1.442695, %v827_v59 }
 0x1e1   : > { %v616_v63 = vadd.f32 1.0, %v1172_v60  ;;  %1189 = vpow2.f32 %v989_v58 }
 0x1e2   : > { %1191 = vrcp.f32 %v617_v61 }
 0x1e3   : > { %v1174_v0 = vpop.eup %1173  ;;  %1193 = vrcp.f32 %v616_v63 }
 0x1e4   : > { %v1176_v1 = vpop.eup %1175  ;;  %v619_v2 = vadd.f32 1.0, %v1174_v0  ;;  %1195 = vpow2.f32 %v988_v62 }
 0x1e5   : > { %v1178_v3 = vpop.eup %1177  ;;  %398 = vst.msk [vmem:[%s1394_s25 + $0x8] sm:$0xff] %vm396_vm1, %v1176_v1 }
 0x1e6   : > { %v1180_v4 = vpop.eup %1179  ;;  %397 = vst.msk [vmem:[%s1394_s25] sm:$0xff] %vm396_vm1, %v1178_v3  ;;  %1197 = vrcp.f32 %v619_v2 }
 0x1e7   : > { %v1182_v5 = vpop.eup %1181  ;;  %v618_v6 = vadd.f32 1.0, %v1180_v4 }
 0x1e8   : > { %v1184_v7 = vpop.eup %1183  ;;  %v849_v8 = vadd.f32 1.0, %v1182_v5 }
 0x1e9   : > { %v1186_v9 = vpop.eup %1185  ;;  %400 = vst.msk [vmem:[%s1394_s25 + $0x18] sm:$0xff] %vm396_vm1, %v1184_v7  ;;  %1199 = vrcp.f32 %v618_v6 }
 0x1ea   : > { %v1188_v10 = vpop.eup %1187  ;;  %399 = vst.msk [vmem:[%s1394_s25 + $0x10] sm:$0xff] %vm396_vm1, %v1186_v9  ;;  %1201 = vrcp.f32 %v849_v8 }
 0x1eb   : > { %v1190_v11 = vpop.eup %1189  ;;  %v848_v12 = vadd.f32 1.0, %v1188_v10 }
 0x1ec   : > { %v1192_v13 = vpop.eup %1191  ;;  %v851_v14 = vadd.f32 1.0, %v1190_v11 }
 0x1ed   : > { %v1194_v15 = vpop.eup %1193  ;;  %973 = vst.msk [vmem:[%s1394_s25 + $0x28] sm:$0xff] %vm396_vm1, %v1192_v13  ;;  %1203 = vrcp.f32 %v848_v12 }
 0x1ee   : > { %v1196_v16 = vpop.eup %1195  ;;  %972 = vst.msk [vmem:[%s1394_s25 + $0x20] sm:$0xff] %vm396_vm1, %v1194_v15  ;;  %1205 = vrcp.f32 %v851_v14 }
 0x1ef   : > { %v850_v17 = vadd.f32 1.0, %v1196_v16 }
 0x1f0   : > { %v1198_v18 = vpop.eup %1197 }
 0x1f1   : > { %975 = vst.msk [vmem:[%s1394_s25 + $0x38] sm:$0xff] %vm396_vm1, %v1198_v18  ;;  %1207 = vrcp.f32 %v850_v17 }
 0x1f3   : > { %v1200_v19 = vpop.eup %1199 }
 0x1f4   : > { %v1202_v20 = vpop.eup %1201  ;;  %974 = vst.msk [vmem:[%s1394_s25 + $0x30] sm:$0xff] %vm396_vm1, %v1200_v19 }
 0x1f5   : > { %991 = vst.msk [vmem:[%s1394_s25 + $0x48] sm:$0xff] %vm396_vm1, %v1202_v20 }
 0x1f7   : > { %v1204_v21 = vpop.eup %1203 }
 0x1f8   : > { %v1206_v22 = vpop.eup %1205  ;;  %990 = vst.msk [vmem:[%s1394_s25 + $0x40] sm:$0xff] %vm396_vm1, %v1204_v21 }
 0x1f9   : > { %993 = vst.msk [vmem:[%s1394_s25 + $0x58] sm:$0xff] %vm396_vm1, %v1206_v22 }
 0x1fb   : > { %v1208_v23 = vpop.eup %1207 }
 0x1fc   : > { %992 = vst.msk [vmem:[%s1394_s25 + $0x50] sm:$0xff] %vm396_vm1, %v1208_v23 }
 0x1fd   : > { %1222 = shalt.err (!%p1219_p3)
}
 0x1fe   : > { %s1223_s8 = scalar_lea.hbm %s1423_s30, 1536  ;;  %s1227_s11 = scalar_lea.hbm %s1475_s3, 3072 }
 0x1ff   : > { %p1224_p4 = scmp.ne.s32.totalorder %s1423_s30, %s1223_s8  ;;  %p1228_p9 = scmp.lt.u32.totalorder %s1423_s30, %s1475_s3 }
 0x200   : > { %p1229_p10 = scmp.lt.u32.totalorder %s1227_s11, %s1223_s8  ;;  %p1231_p12 = scmp.lt.u32.totalorder %s1223_s8, %s1423_s30 }
 0x201   : > { %p1225_p7 = pnand %p1224_p4, %p1334_p5 }
 0x202   : > { %p1230_p11 = por %p1229_p10, %p1228_p9 }
 0x203   : > { %p1226_p8 = pneg %p1225_p7 }
 0x204   : > { %p1232_p13 = por %p1231_p12, %p1230_p11 }
 0x206   : > { %p1233_p0 = pnand %p1232_p13, %p1226_p8 }
 0x208   : > { %1236 = shalt.err (!%p1233_p0)
}
 0x209   : > { %s1274_s20 = smov 128   ;;  %s1275_s24 = smov 8  }
 0x20a   : > { %1120 = dma.vmem_to_hbm [thread:$0]  (%p1334_p5), %s1425_s27, 1536, %s1423_s30, %s1431_s16, %s1274_s20, %s1274_s20, %s1275_s24  }
 0x20b PF: > { %p1126_p1 = scmp.ge.s32.totalorder %s1271_s15, 2  ;;  %s894_s25 = sand.u32 1, %s1259_s12  }
 0x20c   : > { %s895_s26 = scalar_lea.sflag [#allocation3], %s894_s25 }
 0x20d   : > { %p1123_p2 = pnand %p1126_p1, %p1338_p6 }
 0x20f   : > { %1254 = dma.done.wait (!%p1123_p2), %s895_s26, 1536  }
 0x210   : > { %1256 = vsyncadd (!%p1123_p2), %s895_s26, 4294965760  ;;  %p13_p3 = scmp.ge.s32.totalorder %s1321_s18, 4   ;;  %s1478_s12 = smov %s1263_s13 }
 0x211   : > { %s1479_s13 = smov %s1267_s14  ;;  %s1480_s14 = smov %s1332_s21 }
 0x212   : > { %s1481_s15 = smov %s1321_s18  ;;  %15 = sbr.rel (!%p13_p3) target bundleno = 3 (0x3), region = 71 }
 0x219   :  { %900 = vsyncpa [#allocation3], 1 }
 0x21a   :  { %902 = vsyncpa [#allocation3 + $0x1], 1 }

// kernel: base_net.2
= control target key start
LH: loop header
LB: loop body
LE: loop exit
PB: predicated region body
PF: predicated region fallthrough
CT: control target
= control target key end

     0   :  { %s3942_s24 = smov 0   ;;  %s5185_s0 = inlined_call_operand.vmem [shape: f32[2,16,16,32], index: 0, kind: input, shape index: {}]   ;;  %s5186_s1 = inlined_call_operand.vmem [shape: f32[32,64], index: 1, kind: input, shape index: {}]   ;;  %s5187_s2 = inlined_call_operand.vmem [shape: f32[1,64], index: 2, kind: input, shape index: {}]   ;;  %s5188_s3 = inlined_call_operand.vmem [shape: f32[576,64], index: 3, kind: input, shape index: {}]   ;;  %s5189_s4 = inlined_call_operand.vmem [shape: f32[1,64], index: 4, kind: input, shape index: {}]   ;;  %s5190_s5 = inlined_call_operand.vmem [shape: f32[3,64], index: 5, kind: input, shape index: {}]   ;;  %s5191_s6 = inlined_call_operand.vmem [shape: f32[3,1], index: 6, kind: input, shape index: {}]   ;;  %s5192_s7 = inlined_call_operand.vmem [shape: f32[2,3,256], index: 7, kind: output, shape index: {}]  }
   0x1 LB: > { %s2941_s25 = sadd.s32 4294967295, %s3896_s24   ;;  %p2945_p0 = scmp.ge.s32.totalorder %s3896_s24, 1  ;;  %s3896_s24 = sphi %s3942_s24, %s17_s24  }
   0x2   : > { %p237_p1 = scmp.lt.s32.totalorder %s3896_s24, 3 }
   0x4   : > { %p238_p2 = pnand %p2945_p0, %p237_p1 }
   0x5   : > { %v311_v0 = vld [vmem:[%s5186_s1] sm:$0xff] (!%p238_p2)  ;;  %v312_v1 = vld [vmem:[%s5186_s1 + $0x8] sm:$0xff] (!%p238_p2)  ;;  %v313_v2 = vld [vmem:[%s5186_s1 + $0x10] sm:$0xff] (!%p238_p2)  ;;  %p269_p3 = scmp.lt.s32.totalorder (!%p238_p2), %s2941_s25, 1  ;;  %vm322_vm0 = vcmask (!%p238_p2), 261120   ;;  %vm740_vm1 = vcmask (!%p238_p2), 523264  }
   0x6   : > { %241 = sbr.rel (%p238_p2) target bundleno = 991 (0x3df), region = 48  ;;  %v3283_v3 = vpack.c.bf16 (!%p238_p2), %v312_v1, %v311_v0  ;;  %v314_v4 = vld [vmem:[%s5186_s1 + $0x18] sm:$0xff] (!%p238_p2)  ;;  %vm743_vm2 = vcmask (!%p238_p2), 517120   ;;  %v3898_v38 = vmov (!%p238_p2), 0.0   ;;  %v1790_v39 = vld [vmem:[%s5188_s3 + $0x100] sm:$0xff] (!%p238_p2)  ;;  %v1791_v40 = vld [vmem:[%s5188_s3 + $0x108] sm:$0xff] (!%p238_p2) }
   0x7   : > { %v3287_v5 = vpack.c.bf16 (!%p238_p2), %v314_v4, %v313_v2  ;;  %746 = vst.msk [vmem:[#allocation2 + $0x20] sm:$0xff] (!%p238_p2), %vm740_vm1, %v3898_v38  ;;  %741 = vst.msk [vmem:[#allocation2] sm:$0xff] (!%p238_p2), %vm740_vm1, %v3898_v38  ;;  %v3899_v41 = vmov (!%p238_p2), 0.0|0.0   ;;  %v4095_v42 = vpack.c.bf16 (!%p238_p2), %v1791_v40, %v1790_v39  ;;  %v1792_v43 = vld [vmem:[%s5188_s3 + $0x110] sm:$0xff] (!%p238_p2)  ;;  %v1793_v44 = vld [vmem:[%s5188_s3 + $0x118] sm:$0xff] (!%p238_p2)  ;;  %s3900_s23 = smov (!%p238_p2), 64  }
   0x8   : > { %3284 = vmatprep.subr.bf16.mxu0 (!%p238_p2), %v3283_v3  ;;  %747 = vst.msk [vmem:[#allocation2 + $0x28] sm:$0x3] (!%p238_p2), %vm743_vm2, %v3898_v38  ;;  %744 = vst.msk [vmem:[#allocation2 + $0x10] sm:$0x3] (!%p238_p2), %vm743_vm2, %v3898_v38  ;;  %3291 = vmatprep.subr.bf16.mxu1 (!%p238_p2), %v3899_v41  ;;  %v4106_v45 = vpack.c.bf16 (!%p238_p2), %v1793_v44, %v1792_v43  ;;  %v1758_v46 = vld [vmem:[%s5188_s3] sm:$0xff] (!%p238_p2)  ;;  %v1759_v47 = vld [vmem:[%s5188_s3 + $0x8] sm:$0xff] (!%p238_p2) }
   0x9   : > { %3286 = vmatpush3.bf16.msra.mxu0 (!%p238_p2), %v3283_v3  ;;  %742 = vst.msk [vmem:[#allocation2 + $0x8] sm:$0xff] (!%p238_p2), %vm740_vm1, %v3898_v38  ;;  %745 = vst.msk [vmem:[#allocation2 + $0x18] sm:$0xff] (!%p238_p2), %vm740_vm1, %v3898_v38  ;;  %v1794_v48 = vld [vmem:[%s5188_s3 + $0x120] sm:$0xff] (!%p238_p2)  ;;  %v3292_v49 = vpack.c.bf16 (!%p238_p2), %v1759_v47, %v1758_v46  ;;  %v1795_v50 = vld [vmem:[%s5188_s3 + $0x128] sm:$0xff] (!%p238_p2) }
   0xa   : > { %3288 = vmatprep.subr.bf16.mxu0 (!%p238_p2), %v3287_v5  ;;  %748 = vst.msk [vmem:[#allocation2 + $0x30] sm:$0xff] (!%p238_p2), %vm740_vm1, %v3898_v38  ;;  %749 = vst.msk [vmem:[#allocation2 + $0x38] sm:$0xff] (!%p238_p2), %vm740_vm1, %v3898_v38  ;;  %v4122_v51 = vpack.c.bf16 (!%p238_p2), %v1795_v50, %v1794_v48  ;;  %v1760_v52 = vld [vmem:[%s5188_s3 + $0x10] sm:$0xff] (!%p238_p2)  ;;  %v1761_v53 = vld [vmem:[%s5188_s3 + $0x18] sm:$0xff] (!%p238_p2) }
   0xb   : > { %750 = vst.msk [vmem:[#allocation2 + $0x40] sm:$0x3] (!%p238_p2), %vm743_vm2, %v3898_v38  ;;  %753 = vst.msk [vmem:[#allocation2 + $0x58] sm:$0x3] (!%p238_p2), %vm743_vm2, %v3898_v38  ;;  %3293 = vmatpush1.bf16.msra.mxu1 (!%p238_p2), %v3292_v49  ;;  %v1796_v54 = vld [vmem:[%s5188_s3 + $0x130] sm:$0xff] (!%p238_p2)  ;;  %v3295_v55 = vpack.c.bf16 (!%p238_p2), %v1761_v53, %v1760_v52  ;;  %v1797_v56 = vld [vmem:[%s5188_s3 + $0x138] sm:$0xff] (!%p238_p2) }
   0xc   : > { %751 = vst.msk [vmem:[#allocation2 + $0x48] sm:$0xff] (!%p238_p2), %vm740_vm1, %v3898_v38  ;;  %752 = vst.msk [vmem:[#allocation2 + $0x50] sm:$0xff] (!%p238_p2), %vm740_vm1, %v3898_v38  ;;  %3294 = vmatprep.subr.bf16.mxu1 (!%p238_p2), %v3899_v41  ;;  %v4139_v57 = vpack.c.bf16 (!%p238_p2), %v1797_v56, %v1796_v54  ;;  %v1762_v58 = vld [vmem:[%s5188_s3 + $0x20] sm:$0xff] (!%p238_p2)  ;;  %v1763_v59 = vld [vmem:[%s5188_s3 + $0x28] sm:$0xff] (!%p238_p2) }
   0xd   : > { %s5196_s25 = smov (!%p269_p3, %s2941_s25), 1  ;;  %3290 = vmatpush3.bf16.msra.mxu0 %v3287_v5  ;;  %754 = vst.msk [vmem:[#allocation2 + $0x60] sm:$0xff] %vm740_vm1, %v3898_v38  ;;  %755 = vst.msk [vmem:[#allocation2 + $0x68] sm:$0xff] %vm740_vm1, %v3898_v38  ;;  %v1798_v60 = vld [vmem:[%s5188_s3 + $0x140] sm:$0xff]  ;;  %v3298_v61 = vpack.c.bf16 %v1763_v59, %v1762_v58  ;;  %v1799_v62 = vld [vmem:[%s5188_s3 + $0x148] sm:$0xff] }
   0xe   : > { %s3051_s11 = sshll.u32 %s5196_s25, 8  ;;  %756 = vst.msk [vmem:[#allocation2 + $0x70] sm:$0x3] %vm743_vm2, %v3898_v38  ;;  %759 = vst.msk [vmem:[#allocation2 + $0x88] sm:$0x3] %vm743_vm2, %v3898_v38  ;;  %3339 = vmatprep.subr.bf16.mxu0 %v3899_v41  ;;  %v4156_v63 = vpack.c.bf16 %v1799_v62, %v1798_v60  ;;  %v1764_v0 = vld [vmem:[%s5188_s3 + $0x30] sm:$0xff] }
   0xf   : > { %s3968_s14 = scalar_lea.vmem %s5185_s0, %s3051_s11  ;;  %757 = vst.msk [vmem:[#allocation2 + $0x78] sm:$0xff] %vm740_vm1, %v3898_v38  ;;  %758 = vst.msk [vmem:[#allocation2 + $0x80] sm:$0xff] %vm740_vm1, %v3898_v38  ;;  %3296 = vmatpush1.bf16.msra.mxu1 %v3295_v55  ;;  %v1765_v1 = vld [vmem:[%s5188_s3 + $0x38] sm:$0xff]  ;;  %v1800_v2 = vld [vmem:[%s5188_s3 + $0x150] sm:$0xff]  ;;  %s3052_s21 = sshll.u32 %s5196_s25, 3 }
  0x10   : > { %v279_v6 = vld [vmem:[%s3968_s14] sm:$0xff]  ;;  %v280_v7 = vld [vmem:[%s3968_s14 + $0x8] sm:$0xff]  ;;  %v281_v8 = vld [vmem:[%s3968_s14 + $0x10] sm:$0xff]  ;;  %760 = vst.msk [vmem:[#allocation2 + $0x90] sm:$0xff] %vm740_vm1, %v3898_v38  ;;  %3297 = vmatprep.subr.bf16.mxu1 %v3899_v41  ;;  %v3301_v3 = vpack.c.bf16 %v1765_v1, %v1764_v0  ;;  %s278_s26 = scalar_lea.vmem %s5192_s7, %s3052_s21 }
  0x11   : > { %3171 = vmatprep.mubr.msk.f32.mxu0 %vm322_vm0, %v279_v6  ;;  %v282_v9 = vld [vmem:[%s3968_s14 + $0x18] sm:$0xff]  ;;  %v283_v10 = vld [vmem:[%s3968_s14 + $0x20] sm:$0xff]  ;;  %v284_v11 = vld [vmem:[%s3968_s14 + $0x28] sm:$0xff]  ;;  %761 = vst.msk [vmem:[#allocation2 + $0x98] sm:$0xff] %vm740_vm1, %v3898_v38 }
  0x12   : > { %3172 = vmatmul.mubr.msk.f32.vlgmr.msra.gmra.mrb[0].mxu0 %vm322_vm0, %v280_v7  ;;  %v285_v12 = vld [vmem:[%s3968_s14 + $0x30] sm:$0xff]  ;;  %v286_v13 = vld [vmem:[%s3968_s14 + $0x38] sm:$0xff]  ;;  %v287_v14 = vld [vmem:[%s3968_s14 + $0x40] sm:$0xff]  ;;  %762 = vst.msk [vmem:[#allocation2 + $0xa0] sm:$0x3] %vm743_vm2, %v3898_v38 }
  0x13   : > { %3174 = vmatprep.mubr.msk.f32.mxu0 %vm322_vm0, %v281_v8  ;;  %v288_v15 = vld [vmem:[%s3968_s14 + $0x48] sm:$0xff]  ;;  %v289_v16 = vld [vmem:[%s3968_s14 + $0x50] sm:$0xff]  ;;  %v290_v17 = vld [vmem:[%s3968_s14 + $0x58] sm:$0xff]  ;;  %763 = vst.msk [vmem:[#allocation2 + $0xa8] sm:$0xff] %vm740_vm1, %v3898_v38  ;;  %3341 = vmatpush1.bf16.msra.mxu0 %v4095_v42 }
  0x14   : > { %v291_v18 = vld [vmem:[%s3968_s14 + $0x60] sm:$0xff]  ;;  %v292_v19 = vld [vmem:[%s3968_s14 + $0x68] sm:$0xff]  ;;  %v293_v20 = vld [vmem:[%s3968_s14 + $0x70] sm:$0xff]  ;;  %764 = vst.msk [vmem:[#allocation2 + $0xb0] sm:$0xff] %vm740_vm1, %v3898_v38  ;;  %3342 = vmatprep.subr.bf16.mxu0 %v3899_v41  ;;  %3299 = vmatpush1.bf16.msra.mxu1 %v3298_v61 }
  0x15   : > { %v294_v21 = vld [vmem:[%s3968_s14 + $0x78] sm:$0xff]  ;;  %v295_v22 = vld [vmem:[%s3968_s14 + $0x80] sm:$0xff]  ;;  %v296_v23 = vld [vmem:[%s3968_s14 + $0x88] sm:$0xff]  ;;  %765 = vst.msk [vmem:[#allocation2 + $0xb8] sm:$0x3] %vm743_vm2, %v3898_v38  ;;  %3300 = vmatprep.subr.bf16.mxu1 %v3899_v41 }
  0x16   : > { %3175 = vmatmul.mubr.msk.f32.gmra.mrb[2].mxu0 %vm322_vm0, %v282_v9  ;;  %v297_v24 = vld [vmem:[%s3968_s14 + $0x90] sm:$0xff]  ;;  %v298_v25 = vld [vmem:[%s3968_s14 + $0x98] sm:$0xff]  ;;  %v299_v26 = vld [vmem:[%s3968_s14 + $0xa0] sm:$0xff]  ;;  %766 = vst.msk [vmem:[#allocation2 + $0xc0] sm:$0xff] %vm740_vm1, %v3898_v38 }
  0x17   : > { %3177 = vmatprep.mubr.msk.f32.mxu0 %vm322_vm0, %v283_v10  ;;  %v300_v27 = vld [vmem:[%s3968_s14 + $0xa8] sm:$0xff]  ;;  %v301_v28 = vld [vmem:[%s3968_s14 + $0xb0] sm:$0xff]  ;;  %v302_v29 = vld [vmem:[%s3968_s14 + $0xb8] sm:$0xff]  ;;  %767 = vst.msk [vmem:[#allocation2 + $0xc8] sm:$0xff] %vm740_vm1, %v3898_v38  ;;  %3344 = vmatpush1.bf16.msra.mxu0 %v4106_v45 }
  0x18   : > { %v303_v30 = vld [vmem:[%s3968_s14 + $0xc0] sm:$0xff]  ;;  %v304_v31 = vld [vmem:[%s3968_s14 + $0xc8] sm:$0xff]  ;;  %v305_v32 = vld [vmem:[%s3968_s14 + $0xd0] sm:$0xff]  ;;  %768 = vst.msk [vmem:[#allocation2 + $0xd0] sm:$0x3] %vm743_vm2, %v3898_v38  ;;  %3345 = vmatprep.subr.bf16.mxu0 %v3899_v41  ;;  %3302 = vmatpush1.bf16.msra.mxu1 %v3301_v3 }
  0x19   : > { %v306_v33 = vld [vmem:[%s3968_s14 + $0xd8] sm:$0xff]  ;;  %v307_v34 = vld [vmem:[%s3968_s14 + $0xe0] sm:$0xff]  ;;  %v308_v35 = vld [vmem:[%s3968_s14 + $0xe8] sm:$0xff]  ;;  %769 = vst.msk [vmem:[#allocation2 + $0xd8] sm:$0xff] %vm740_vm1, %v3898_v38  ;;  %3303 = vmatprep.subr.bf16.mxu1 %v3899_v41 }
  0x1a   : > { %3178 = vmatmul.mubr.msk.f32.gmra.mrb[4].mxu0 %vm322_vm0, %v284_v11  ;;  %v309_v36 = vld [vmem:[%s3968_s14 + $0xf0] sm:$0xff]  ;;  %v310_v37 = vld [vmem:[%s3968_s14 + $0xf8] sm:$0xff]  ;;  %770 = vst.msk [vmem:[#allocation2 + $0xe0] sm:$0xff] %vm740_vm1, %v3898_v38  ;;  %772 = vst.msk [vmem:[#allocation2 + $0xf0] sm:$0xff] %vm740_vm1, %v3898_v38 }
  0x1b   : > { %3180 = vmatprep.mubr.msk.f32.mxu0 %vm322_vm0, %v285_v12  ;;  %771 = vst.msk [vmem:[#allocation2 + $0xe8] sm:$0x3] %vm743_vm2, %v3898_v38  ;;  %774 = vst.msk [vmem:[#allocation2 + $0x100] sm:$0x3] %vm743_vm2, %v3898_v38  ;;  %3347 = vmatpush1.bf16.msra.mxu0 %v4122_v51  ;;  %v1801_v4 = vld [vmem:[%s5188_s3 + $0x158] sm:$0xff]  ;;  %v1766_v6 = vld [vmem:[%s5188_s3 + $0x40] sm:$0xff] }
  0x1c   : > { %773 = vst.msk [vmem:[#allocation2 + $0xf8] sm:$0xff] %vm740_vm1, %v3898_v38  ;;  %775 = vst.msk [vmem:[#allocation2 + $0x108] sm:$0xff] %vm740_vm1, %v3898_v38  ;;  %3348 = vmatprep.subr.bf16.mxu0 %v3899_v41  ;;  %v4173_v5 = vpack.c.bf16 %v1801_v4, %v1800_v2  ;;  %v1767_v7 = vld [vmem:[%s5188_s3 + $0x48] sm:$0xff]  ;;  %v1802_v8 = vld [vmem:[%s5188_s3 + $0x160] sm:$0xff] }
  0x1d   : > { %776 = vst.msk [vmem:[#allocation2 + $0x110] sm:$0xff] %vm740_vm1, %v3898_v38  ;;  %778 = vst.msk [vmem:[#allocation2 + $0x120] sm:$0xff] %vm740_vm1, %v3898_v38  ;;  %v3304_v9 = vpack.c.bf16 %v1767_v7, %v1766_v6  ;;  %v1803_v10 = vld [vmem:[%s5188_s3 + $0x168] sm:$0xff]  ;;  %v1768_v12 = vld [vmem:[%s5188_s3 + $0x50] sm:$0xff] }
  0x1e   : > { %3181 = vmatmul.mubr.msk.f32.gmra.mrb[6].mxu0 %vm322_vm0, %v286_v13  ;;  %777 = vst.msk [vmem:[#allocation2 + $0x118] sm:$0x3] %vm743_vm2, %v3898_v38  ;;  %780 = vst.msk [vmem:[#allocation2 + $0x130] sm:$0x3] %vm743_vm2, %v3898_v38  ;;  %v4190_v11 = vpack.c.bf16 %v1803_v10, %v1802_v8  ;;  %v1769_v13 = vld [vmem:[%s5188_s3 + $0x58] sm:$0xff]  ;;  %v1778_v44 = vld [vmem:[%s5188_s3 + $0xa0] sm:$0xff] }
  0x1f   : > { %3183 = vmatprep.mubr.msk.f32.mxu0 %vm322_vm0, %v287_v14  ;;  %779 = vst.msk [vmem:[#allocation2 + $0x128] sm:$0xff] %vm740_vm1, %v3898_v38  ;;  %781 = vst.msk [vmem:[#allocation2 + $0x138] sm:$0xff] %vm740_vm1, %v3898_v38  ;;  %3350 = vmatpush1.bf16.msra.mxu0 %v4139_v57  ;;  %v1804_v14 = vld [vmem:[%s5188_s3 + $0x170] sm:$0xff]  ;;  %v1813_v40 = vld [vmem:[%s5188_s3 + $0x1b8] sm:$0xff] }
  0x20   : > { %782 = vst.msk [vmem:[#allocation2 + $0x140] sm:$0xff] %vm740_vm1, %v3898_v38  ;;  %784 = vst.msk [vmem:[#allocation2 + $0x150] sm:$0xff] %vm740_vm1, %v3898_v38  ;;  %3351 = vmatprep.subr.bf16.mxu0 %v3899_v41  ;;  %3305 = vmatpush1.bf16.msra.mxu1 %v3304_v9  ;;  %v1779_v46 = vld [vmem:[%s5188_s3 + $0xa8] sm:$0xff]  ;;  %v1814_v47 = vld [vmem:[%s5188_s3 + $0x1c0] sm:$0xff] }
  0x21   : > { %783 = vst.msk [vmem:[#allocation2 + $0x148] sm:$0x3] %vm743_vm2, %v3898_v38  ;;  %786 = vst.msk [vmem:[#allocation2 + $0x160] sm:$0x3] %vm743_vm2, %v3898_v38  ;;  %3306 = vmatprep.subr.bf16.mxu1 %v3899_v41  ;;  %v3322_v48 = vpack.c.bf16 %v1779_v46, %v1778_v44  ;;  %v1815_v49 = vld [vmem:[%s5188_s3 + $0x1c8] sm:$0xff]  ;;  %v1780_v52 = vld [vmem:[%s5188_s3 + $0xb0] sm:$0xff] }
  0x22   : > { %3184 = vmatmul.mubr.msk.f32.gmra.mrb[8].mxu0 %vm322_vm0, %v288_v15  ;;  %785 = vst.msk [vmem:[#allocation2 + $0x158] sm:$0xff] %vm740_vm1, %v3898_v38  ;;  %787 = vst.msk [vmem:[#allocation2 + $0x168] sm:$0xff] %vm740_vm1, %v3898_v38  ;;  %v3307_v15 = vpack.c.bf16 %v1769_v13, %v1768_v12  ;;  %v4292_v50 = vpack.c.bf16 %v1815_v49, %v1814_v47  ;;  %v1781_v53 = vld [vmem:[%s5188_s3 + $0xb8] sm:$0xff]  ;;  %v1816_v54 = vld [vmem:[%s5188_s3 + $0x1d0] sm:$0xff] }
  0x23   : > { %3186 = vmatprep.mubr.msk.f32.mxu0 %vm322_vm0, %v289_v16  ;;  %788 = vst.msk [vmem:[#allocation2 + $0x170] sm:$0xff] %vm740_vm1, %v3898_v38  ;;  %790 = vst.msk [vmem:[#allocation2 + $0x180] sm:$0xff] %vm740_vm1, %v3898_v38  ;;  %3353 = vmatpush1.bf16.msra.mxu0 %v4156_v63  ;;  %v1805_v16 = vld [vmem:[%s5188_s3 + $0x178] sm:$0xff]  ;;  %v4308_v55 = vld [vmem:[%s5187_s2] ss:$0 sm:$0xff]  ;;  %v3325_v56 = vpack.c.bf16 %v1781_v53, %v1780_v52 }
  0x24   : > { %789 = vst.msk [vmem:[#allocation2 + $0x178] sm:$0x3] %vm743_vm2, %v3898_v38  ;;  %792 = vst.msk [vmem:[#allocation2 + $0x190] sm:$0x3] %vm743_vm2, %v3898_v38  ;;  %3354 = vmatprep.subr.bf16.mxu0 %v3899_v41  ;;  %3308 = vmatpush1.bf16.msra.mxu1 %v3307_v15  ;;  %v1817_v58 = vld [vmem:[%s5188_s3 + $0x1d8] sm:$0xff]  ;;  %v1782_v0 = vld [vmem:[%s5188_s3 + $0xc0] sm:$0xff] }
  0x25   : > { %791 = vst.msk [vmem:[#allocation2 + $0x188] sm:$0xff] %vm740_vm1, %v3898_v38  ;;  %793 = vst.msk [vmem:[#allocation2 + $0x198] sm:$0xff] %vm740_vm1, %v3898_v38  ;;  %3309 = vmatprep.subr.bf16.mxu1 %v3899_v41  ;;  %v4314_v59 = vpack.c.bf16 %v1817_v58, %v1816_v54  ;;  %v1783_v1 = vld [vmem:[%s5188_s3 + $0xc8] sm:$0xff]  ;;  %v1818_v2 = vld [vmem:[%s5188_s3 + $0x1e0] sm:$0xff] }
  0x26   : > { %3187 = vmatmul.mubr.msk.f32.gmra.mrb[10].mxu0 %vm322_vm0, %v290_v17  ;;  %794 = vst.msk [vmem:[#allocation2 + $0x1a0] sm:$0xff] %vm740_vm1, %v3898_v38  ;;  %v4207_v17 = vpack.c.bf16 %v1805_v16, %v1804_v14  ;;  %v3328_v4 = vpack.c.bf16 %v1783_v1, %v1782_v0  ;;  %v1819_v6 = vld [vmem:[%s5188_s3 + $0x1e8] sm:$0xff]  ;;  %v1788_v58 = vld [vmem:[%s5188_s3 + $0xf0] sm:$0xff] }
  0x27   : > { %3189 = vmatprep.mubr.msk.f32.mxu0 %vm322_vm0, %v291_v18  ;;  %795 = vst.msk [vmem:[#allocation2 + $0x1a8] sm:$0x3] %vm743_vm2, %v3898_v38  ;;  %3356 = vmatpush1.bf16.msra.mxu0 %v4173_v5  ;;  %v1770_v18 = vld [vmem:[%s5188_s3 + $0x60] sm:$0xff]  ;;  %v1812_v38 = vld [vmem:[%s5188_s3 + $0x1b0] sm:$0xff]  ;;  %v4333_v8 = vpack.c.bf16 %v1819_v6, %v1818_v2  ;;  %v1823_v44 = vld [vmem:[%s5188_s3 + $0x208] sm:$0xff] }
  0x28   : > { %3357 = vmatprep.subr.bf16.mxu0 %v3899_v41  ;;  %v4275_v43 = vpack.c.bf16 %v1813_v40, %v1812_v38  ;;  %v1822_v40 = vld [vmem:[%s5188_s3 + $0x200] sm:$0xff] }
  0x29   : > { %v4375_v52 = vpack.c.bf16 %v1823_v44, %v1822_v40 }
  0x2a   : > { %3190 = vmatmul.mubr.msk.f32.gmra.mrb[12].mxu0 %vm322_vm0, %v292_v19  ;;  %v1771_v19 = vld [vmem:[%s5188_s3 + $0x68] sm:$0xff] }
  0x2b   : > { %3192 = vmatprep.mubr.msk.f32.mxu0 %vm322_vm0, %v293_v20  ;;  %3359 = vmatpush1.bf16.msra.mxu0 %v4190_v11  ;;  %v1806_v20 = vld [vmem:[%s5188_s3 + $0x180] sm:$0xff] }
  0x2c   : > { %3360 = vmatprep.subr.bf16.mxu0 %v3899_v41 }
  0x2e   : > { %3193 = vmatmul.mubr.msk.f32.gmra.mrb[14].mxu0 %vm322_vm0, %v294_v21  ;;  %v3310_v21 = vpack.c.bf16 %v1771_v19, %v1770_v18  ;;  %v1784_v19 = vld [vmem:[%s5188_s3 + $0xd0] sm:$0xff] }
  0x2f   : > { %3195 = vmatprep.mubr.msk.f32.mxu0 %vm322_vm0, %v295_v22  ;;  %3362 = vmatpush1.bf16.msra.mxu0 %v4207_v17  ;;  %v1807_v22 = vld [vmem:[%s5188_s3 + $0x188] sm:$0xff] }
  0x30   : > { %3363 = vmatprep.subr.bf16.mxu0 %v3899_v41  ;;  %3311 = vmatpush1.bf16.msra.mxu1 %v3310_v21  ;;  %v1820_v21 = vld [vmem:[%s5188_s3 + $0x1f0] sm:$0xff] }
  0x31   : > { %3312 = vmatprep.subr.bf16.mxu1 %v3899_v41 }
  0x32   : > { %3196 = vmatmul.mubr.msk.f32.gmra.mrb[16].mxu0 %vm322_vm0, %v296_v23  ;;  %v4224_v23 = vpack.c.bf16 %v1807_v22, %v1806_v20  ;;  %v1785_v20 = vld [vmem:[%s5188_s3 + $0xd8] sm:$0xff] }
  0x33   : > { %3198 = vmatprep.mubr.msk.f32.mxu0 %vm322_vm0, %v297_v24  ;;  %v1772_v24 = vld [vmem:[%s5188_s3 + $0x70] sm:$0xff] }
  0x34   : > { %3365 = vmatpush1.bf16.msra.mxu0 %v4224_v23 }
  0x35   : > { %3366 = vmatprep.subr.bf16.mxu0 %v3899_v41 }
  0x36   : > { %3199 = vmatmul.mubr.msk.f32.gmra.mrb[18].mxu0 %vm322_vm0, %v298_v25  ;;  %v1773_v25 = vld [vmem:[%s5188_s3 + $0x78] sm:$0xff] }
  0x37   : > { %3201 = vmatprep.mubr.msk.f32.mxu0 %vm322_vm0, %v299_v26  ;;  %v1808_v26 = vld [vmem:[%s5188_s3 + $0x190] sm:$0xff] }
  0x3a   : > { %3202 = vmatmul.mubr.msk.f32.gmra.mrb[20].mxu0 %vm322_vm0, %v300_v27  ;;  %v3313_v27 = vpack.c.bf16 %v1773_v25, %v1772_v24  ;;  %v3331_v25 = vpack.c.bf16 %v1785_v20, %v1784_v19 }
  0x3b   : > { %3204 = vmatprep.mubr.msk.f32.mxu0 %vm322_vm0, %v301_v28  ;;  %v1809_v28 = vld [vmem:[%s5188_s3 + $0x198] sm:$0xff] }
  0x3c   : > { %3314 = vmatpush1.bf16.msra.mxu1 %v3313_v27 }
  0x3d   : > { %3315 = vmatprep.subr.bf16.mxu1 %v3899_v41 }
  0x3e   : > { %3205 = vmatmul.mubr.msk.f32.gmra.mrb[22].mxu0 %vm322_vm0, %v302_v29  ;;  %v4241_v29 = vpack.c.bf16 %v1809_v28, %v1808_v26  ;;  %v1821_v26 = vld [vmem:[%s5188_s3 + $0x1f8] sm:$0xff] }
  0x3f   : > { %3207 = vmatprep.mubr.msk.f32.mxu0 %vm322_vm0, %v303_v30  ;;  %v1774_v30 = vld [vmem:[%s5188_s3 + $0x80] sm:$0xff] }
  0x40   : > { %3368 = vmatpush1.bf16.msra.mxu0 %v4241_v29 }
  0x41   : > { %3369 = vmatprep.subr.bf16.mxu0 %v3899_v41 }
  0x42   : > { %3208 = vmatmul.mubr.msk.f32.gmra.mrb[24].mxu0 %vm322_vm0, %v304_v31  ;;  %v1775_v31 = vld [vmem:[%s5188_s3 + $0x88] sm:$0xff] }
  0x43   : > { %3210 = vmatprep.mubr.msk.f32.mxu0 %vm322_vm0, %v305_v32  ;;  %v1810_v32 = vld [vmem:[%s5188_s3 + $0x1a0] sm:$0xff] }
  0x46   : > { %3211 = vmatmul.mubr.msk.f32.gmra.mrb[26].mxu0 %vm322_vm0, %v306_v33  ;;  %v3316_v33 = vpack.c.bf16 %v1775_v31, %v1774_v30  ;;  %v4355_v31 = vpack.c.bf16 %v1821_v26, %v1820_v21 }
  0x47   : > { %3213 = vmatprep.mubr.msk.f32.mxu0 %vm322_vm0, %v307_v34  ;;  %v1811_v34 = vld [vmem:[%s5188_s3 + $0x1a8] sm:$0xff] }
  0x48   : > { %3317 = vmatpush1.bf16.msra.mxu1 %v3316_v33 }
  0x49   : > { %3318 = vmatprep.subr.bf16.mxu1 %v3899_v41 }
  0x4a   : > { %3214 = vmatmul.mubr.msk.f32.gmra.mrb[28].mxu0 %vm322_vm0, %v308_v35  ;;  %v4258_v35 = vpack.c.bf16 %v1811_v34, %v1810_v32 }
  0x4b   : > { %3216 = vmatprep.mubr.msk.f32.mxu0 %vm322_vm0, %v309_v36  ;;  %v1776_v36 = vld [vmem:[%s5188_s3 + $0x90] sm:$0xff] }
  0x4c   : > { %3371 = vmatpush1.bf16.msra.mxu0 %v4258_v35 }
  0x4d   : > { %3372 = vmatprep.subr.bf16.mxu0 %v3899_v41 }
  0x4e   : > { %3217 = vmatmul.mubr.msk.f32.gmra.mrb[30].mxu0 %vm322_vm0, %v310_v37  ;;  %v1777_v37 = vld [vmem:[%s5188_s3 + $0x98] sm:$0xff] }
  0x4f   : > { %v3319_v39 = vpack.c.bf16 %v1777_v37, %v1776_v36  ;;  %v1786_v36 = vld [vmem:[%s5188_s3 + $0xe0] sm:$0xff]  ;;  %v1787_v37 = vld [vmem:[%s5188_s3 + $0xe8] sm:$0xff] }
  0x50   : > { %3374 = vmatpush1.bf16.msra.mxu0 %v4275_v43  ;;  %v3334_v46 = vpack.c.bf16 %v1787_v37, %v1786_v36 }
  0x51   : > { %3320 = vmatpush1.bf16.msra.mxu1 %v3319_v39  ;;  %3375 = vmatprep.subr.bf16.mxu0 %v3899_v41 }
  0x52   : > { %3321 = vmatprep.subr.bf16.mxu1 %v3899_v41 }
  0x54   : > { %3377 = vmatpush1.bf16.msra.mxu0 %v4292_v50 }
  0x55   : > { %3323 = vmatpush1.bf16.msra.mxu1 %v3322_v48  ;;  %3378 = vmatprep.subr.bf16.mxu0 %v3899_v41 }
  0x56   : > { %3324 = vmatprep.subr.bf16.mxu1 %v3899_v41 }
  0x58   : > { %3380 = vmatpush1.bf16.msra.mxu0 %v4314_v59 }
  0x59   : > { %3326 = vmatpush1.bf16.msra.mxu1 %v3325_v56  ;;  %3381 = vmatprep.subr.bf16.mxu0 %v3899_v41 }
  0x5a   : > { %3327 = vmatprep.subr.bf16.mxu1 %v3899_v41 }
  0x5c   : > { %3383 = vmatpush1.bf16.msra.mxu0 %v4333_v8 }
  0x5d   : > { %3329 = vmatpush1.bf16.msra.mxu1 %v3328_v4  ;;  %3384 = vmatprep.subr.bf16.mxu0 %v3899_v41 }
  0x5e   : > { %3330 = vmatprep.subr.bf16.mxu1 %v3899_v41 }
  0x60   : > { %3386 = vmatpush1.bf16.msra.mxu0 %v4355_v31 }
  0x61   : > { %3332 = vmatpush1.bf16.msra.mxu1 %v3331_v25  ;;  %3388 = vmatprep.subr.bf16.mxu0 %v4375_v52 }
  0x62   : > { %3333 = vmatprep.subr.bf16.mxu1 %v3899_v41 }
  0x65   : > { %3335 = vmatpush1.bf16.msra.mxu1 %v3334_v46 }
  0x66   : > { %3336 = vmatprep.subr.bf16.mxu1 %v3899_v41 }
  0xe5   : > { %v3173_v60 = vpop.f32.mrb[0].mxu0 }
  0xe6   : > { %v491_v61 = vadd.f32 %v3173_v60, %v4308_v55  ;;  %v485_v62 = vpop.f32.mrb[1].mxu0  ;;  %v1789_v60 = vld [vmem:[%s5188_s3 + $0xf8] sm:$0xff] }
  0xe7   : > { %v486_v3 = vadd.f32 %v4308_v55, %v485_v62  ;;  %v3337_v0 = vpack.c.bf16 %v1789_v60, %v1788_v58 }
  0xe8   : > { %vm645_vm3 = vcmp.ge.f32.partialorder %v491_v61, 0.0  ;;  %v677_v7 = vmul.f32 0.01, %v491_v61 }
  0xe9   : > { %vm644_vm4 = vcmp.ge.f32.partialorder %v486_v3, 0.0  ;;  %v676_v9 = vmul.f32 0.01, %v486_v3  ;;  %v3176_v10 = vpop.f32.mrb[2].mxu0  ;;  %3338 = vmatpush1.bf16.msra.mxu1 %v3337_v0 }
  0xea   : > { %v709_v12 = vsel %vm645_vm3, %v491_v61, %v677_v7  ;;  %v501_v13 = vadd.f32 %v3176_v10, %v4308_v55  ;;  %v495_v14 = vpop.f32.mrb[3].mxu0  ;;  %3451 = vmatprep.subr.bf16.mxu1 %v3899_v41 }
  0xeb   : > { %798 = vst.msk [vmem:[#allocation2 + $0x21] sm:$0xff] %vm740_vm1, %v709_v12  ;;  %v708_v15 = vsel %vm644_vm4, %v486_v3, %v676_v9  ;;  %v496_v16 = vadd.f32 %v4308_v55, %v495_v14 }
  0xec   : > { %797 = vst.msk [vmem:[#allocation2 + $0x19] sm:$0xff] %vm740_vm1, %v708_v15  ;;  %vm647_vm5 = vcmp.ge.f32.partialorder %v501_v13, 0.0  ;;  %v679_v18 = vmul.f32 0.01, %v501_v13 }
  0xed   : > { %vm646_vm6 = vcmp.ge.f32.partialorder %v496_v16, 0.0  ;;  %v678_v22 = vmul.f32 0.01, %v496_v16  ;;  %v3179_v24 = vpop.f32.mrb[4].mxu0 }
  0xee   : > { %v711_v27 = vsel %vm647_vm5, %v501_v13, %v679_v18  ;;  %v511_v28 = vadd.f32 %v3179_v24, %v4308_v55  ;;  %v505_v30 = vpop.f32.mrb[5].mxu0 }
  0xef   : > { %800 = vst.msk [vmem:[#allocation2 + $0x39] sm:$0xff] %vm740_vm1, %v711_v27  ;;  %v710_v32 = vsel %vm646_vm6, %v496_v16, %v678_v22  ;;  %v506_v33 = vadd.f32 %v4308_v55, %v505_v30  ;;  %v861_v30 = vld [vmem:[#allocation2 + $0x1] sm:$0xff] }
  0xf0   : > { %799 = vst.msk [vmem:[#allocation2 + $0x31] sm:$0xff] %vm740_vm1, %v710_v32  ;;  %vm649_vm7 = vcmp.ge.f32.partialorder %v511_v28, 0.0  ;;  %v681_v34 = vmul.f32 0.01, %v511_v28 }
  0xf1   : > { %vm648_vm8 = vcmp.ge.f32.partialorder %v506_v33, 0.0  ;;  %v680_v38 = vmul.f32 0.01, %v506_v33  ;;  %v3182_v39 = vpop.f32.mrb[6].mxu0 }
  0xf2   : > { %v713_v47 = vsel %vm649_vm7, %v511_v28, %v681_v34  ;;  %v521_v48 = vadd.f32 %v3182_v39, %v4308_v55  ;;  %v515_v49 = vpop.f32.mrb[7].mxu0  ;;  %v990_v24 = vld [vmem:[#allocation2 + $0x22] sm:$0xff] }
  0xf3   : > { %802 = vst.msk [vmem:[#allocation2 + $0x51] sm:$0xff] %vm740_vm1, %v713_v47  ;;  %v712_v53 = vsel %vm648_vm8, %v506_v33, %v680_v38  ;;  %v516_v54 = vadd.f32 %v4308_v55, %v515_v49  ;;  %v989_v7 = vld [vmem:[#allocation2 + $0x1a] sm:$0xff] }
  0xf4   : > { %801 = vst.msk [vmem:[#allocation2 + $0x49] sm:$0xff] %vm740_vm1, %v712_v53  ;;  %vm651_vm9 = vcmp.ge.f32.partialorder %v521_v48, 0.0  ;;  %v683_v56 = vmul.f32 0.01, %v521_v48  ;;  %v925_v34 = vld [vmem:[#allocation2 + $0x18] sm:$0xff]  ;;  %v862_v53 = vld [vmem:[#allocation2 + $0x9] sm:$0xff] }
  0xf5   : > { %vm650_vm10 = vcmp.ge.f32.partialorder %v516_v54, 0.0  ;;  %v682_v61 = vmul.f32 0.01, %v516_v54  ;;  %v3185_v62 = vpop.f32.mrb[8].mxu0 }
  0xf6   : > { %v715_v1 = vsel %vm651_vm9, %v521_v48, %v683_v56  ;;  %v531_v2 = vadd.f32 %v3185_v62, %v4308_v55  ;;  %v525_v3 = vpop.f32.mrb[9].mxu0  ;;  %v4396_v15 = vld [vmem:[#allocation2 + $0x39] sm:$0xff]  ;;  %v3584_v48 = vpack.i.bf16 %v861_v30, %v925_v34 }
  0xf7   : > { %804 = vst.msk [vmem:[#allocation2 + $0x69] sm:$0xff] %vm740_vm1, %v715_v1  ;;  %v714_v4 = vsel %vm650_vm10, %v516_v54, %v682_v61  ;;  %v526_v6 = vadd.f32 %v4308_v55, %v525_v3  ;;  %v4391_v9 = vld [vmem:[#allocation2 + $0x31] sm:$0xff]  ;;  %v3574_v28 = vpack.i.bf16 %v990_v24, %v4396_v15  ;;  %v992_v44 = vld [vmem:[#allocation2 + $0x3a] sm:$0xff] }
  0xf8   : > { %803 = vst.msk [vmem:[#allocation2 + $0x61] sm:$0xff] %vm740_vm1, %v714_v4  ;;  %vm653_vm11 = vcmp.ge.f32.partialorder %v531_v2, 0.0  ;;  %v685_v10 = vmul.f32 0.01, %v531_v2  ;;  %v3569_v12 = vpack.i.bf16 %v989_v7, %v4391_v9  ;;  %v991_v21 = vld [vmem:[#allocation2 + $0x32] sm:$0xff]  ;;  %v926_v56 = vld [vmem:[#allocation2 + $0x20] sm:$0xff] }
  0xf9   : > { %vm652_vm12 = vcmp.ge.f32.partialorder %v526_v6, 0.0  ;;  %v684_v13 = vmul.f32 0.01, %v526_v6  ;;  %v3188_v14 = vpop.f32.mrb[10].mxu0 }
  0xfa   : > { %v717_v16 = vsel %vm653_vm11, %v531_v2, %v685_v10  ;;  %3570 = vrot.lane.b32.xlu0 %v3569_v12, %s3900_s23  ;;  %v541_v18 = vadd.f32 %v3188_v14, %v4308_v55  ;;  %v535_v19 = vpop.f32.mrb[11].mxu0  ;;  %v4407_v33 = vld [vmem:[#allocation2 + $0x51] sm:$0xff] }
  0xfb   : > { %806 = vst.msk [vmem:[#allocation2 + $0x81] sm:$0xff] %vm740_vm1, %v717_v16  ;;  %v716_v20 = vsel %vm652_vm12, %v526_v6, %v684_v13  ;;  %v4401_v22 = vld [vmem:[#allocation2 + $0x49] sm:$0xff]  ;;  %v536_v25 = vadd.f32 %v4308_v55, %v535_v19  ;;  %v3589_v47 = vpack.i.bf16 %v992_v44, %v4407_v33  ;;  %v3594_v6 = vpack.i.bf16 %v862_v53, %v926_v56  ;;  %v4447_v44 = vld [vmem:[#allocation2 + $0x21] sm:$0xff] }
  0xfc   : > { %805 = vst.msk [vmem:[#allocation2 + $0x79] sm:$0xff] %vm740_vm1, %v716_v20  ;;  %vm655_vm13 = vcmp.ge.f32.partialorder %v541_v18, 0.0  ;;  %v687_v26 = vmul.f32 0.01, %v541_v18  ;;  %v3579_v27 = vpack.i.bf16 %v991_v21, %v4401_v22  ;;  %v993_v1 = vld [vmem:[#allocation2 + $0x4a] sm:$0xff]  ;;  %v994_v20 = vld [vmem:[#allocation2 + $0x52] sm:$0xff] }
  0xfd   : > { %vm654_vm14 = vcmp.ge.f32.partialorder %v536_v25, 0.0  ;;  %v686_v32 = vmul.f32 0.01, %v536_v25  ;;  %v3191_v36 = vpop.f32.mrb[12].mxu0  ;;  %v4427_v12 = vld [vmem:[#allocation2 + $0x30] sm:$0xff]  ;;  %v4432_v21 = vld [vmem:[#allocation2 + $0x19] sm:$0xff] }
  0xfe   : > { %v719_v37 = vsel %vm655_vm13, %v541_v18, %v687_v26  ;;  %3580 = vrot.lane.b32.xlu1 %v3579_v27, %s3900_s23  ;;  %3575 = vrot.lane.b32.xlu0 %v3574_v28, %s3900_s23  ;;  %v551_v38 = vadd.f32 %v3191_v36, %v4308_v55  ;;  %v545_v39 = vpop.f32.mrb[13].mxu0  ;;  %v4425_v10 = vld [vmem:[#allocation2 + $0x69] sm:$0xff]  ;;  %v3599_v27 = vpack.i.bf16 %v4432_v21, %v4427_v12  ;;  %v4439_v28 = vld [vmem:[#allocation2 + $0x38] sm:$0xff] }
  0xff   : > { %808 = vst.msk [vmem:[#allocation2 + $0x99] sm:$0xff] %vm740_vm1, %v719_v37  ;;  %v718_v40 = vsel %vm654_vm14, %v536_v25, %v686_v32  ;;  %v546_v46 = vadd.f32 %v4308_v55, %v545_v39  ;;  %v4416_v54 = vld [vmem:[#allocation2 + $0x61] sm:$0xff]  ;;  %v3609_v26 = vpack.i.bf16 %v994_v20, %v4425_v10 }
 0x100   : > { %807 = vst.msk [vmem:[#allocation2 + $0x91] sm:$0xff] %vm740_vm1, %v718_v40  ;;  %vm657_vm15 = vcmp.ge.f32.partialorder %v551_v38, 0.0  ;;  %v689_v49 = vmul.f32 0.01, %v551_v38  ;;  %v3604_v4 = vpack.i.bf16 %v993_v1, %v4416_v54  ;;  %v995_v32 = vld [vmem:[#allocation2 + $0x62] sm:$0xff] }
 0x101   : > { %vm656_vm0 = vcmp.ge.f32.partialorder %v546_v46, 0.0  ;;  %v688_v58 = vmul.f32 0.01, %v546_v46  ;;  %v3194_v60 = vpop.f32.mrb[14].mxu0  ;;  %v4454_v53 = vld [vmem:[#allocation2 + $0x48] sm:$0xff] }
 0x102   : > { %3590 = vrot.lane.b32.xlu0 %v3589_v47, %s3900_s23  ;;  %3585 = vrot.lane.b32.xlu1 %v3584_v48, %s3900_s23  ;;  %v721_v61 = vsel %vm657_vm15, %v551_v38, %v689_v49  ;;  %v561_v62 = vadd.f32 %v3194_v60, %v4308_v55  ;;  %v555_v0 = vpop.f32.mrb[15].mxu0  ;;  %v3614_v49 = vpack.i.bf16 %v4447_v44, %v4439_v28  ;;  %v4457_v60 = vld [vmem:[#allocation2 + $0x81] sm:$0xff] }
 0x103   : > { %810 = vst.msk [vmem:[#allocation2 + $0xb1] sm:$0xff] %vm740_vm1, %v721_v61  ;;  %v720_v2 = vsel %vm656_vm0, %v546_v46, %v688_v58  ;;  %v556_v3 = vadd.f32 %v4308_v55, %v555_v0  ;;  %v4442_v34 = vld [vmem:[#allocation2 + $0x79] sm:$0xff]  ;;  %v996_v58 = vld [vmem:[#allocation2 + $0x6a] sm:$0xff] }
 0x104   : > { %809 = vst.msk [vmem:[#allocation2 + $0xa9] sm:$0xff] %vm740_vm1, %v720_v2  ;;  %vm659_vm2 = vcmp.ge.f32.partialorder %v561_v62, 0.0  ;;  %v691_v7 = vmul.f32 0.01, %v561_v62  ;;  %v3624_v48 = vpack.i.bf16 %v995_v32, %v4442_v34 }
 0x105   : > { %vm658_vm3 = vcmp.ge.f32.partialorder %v556_v3, 0.0  ;;  %v690_v13 = vmul.f32 0.01, %v556_v3  ;;  %v3197_v14 = vpop.f32.mrb[16].mxu0 }
 0x106   : > { %3605 = vrot.lane.b32.xlu0 %v3604_v4, %s3900_s23  ;;  %3595 = vrot.lane.b32.xlu1 %v3594_v6, %s3900_s23  ;;  %v723_v16 = vsel %vm659_vm2, %v561_v62, %v691_v7  ;;  %v571_v18 = vadd.f32 %v3197_v14, %v4308_v55  ;;  %v565_v19 = vpop.f32.mrb[17].mxu0  ;;  %v3629_v6 = vpack.i.bf16 %v996_v58, %v4457_v60 }
 0x107   : > { %812 = vst.msk [vmem:[#allocation2 + $0xc9] sm:$0xff] %vm740_vm1, %v723_v16  ;;  %v722_v24 = vsel %vm658_vm3, %v556_v3, %v690_v13  ;;  %v566_v25 = vadd.f32 %v4308_v55, %v565_v19  ;;  %v3619_v7 = vpack.i.bf16 %v4391_v9, %v4454_v53  ;;  %v4467_v13 = vld [vmem:[#allocation2 + $0x50] sm:$0xff]  ;;  %v997_v16 = vld [vmem:[#allocation2 + $0x7a] sm:$0xff] }
 0x108   : > { %811 = vst.msk [vmem:[#allocation2 + $0xc1] sm:$0xff] %vm740_vm1, %v722_v24  ;;  %vm661_vm4 = vcmp.ge.f32.partialorder %v571_v18, 0.0  ;;  %v693_v30 = vmul.f32 0.01, %v571_v18  ;;  %v3634_v32 = vpack.i.bf16 %v4396_v15, %v4467_v13 }
 0x109   : > { %vm660_vm5 = vcmp.ge.f32.partialorder %v566_v25, 0.0  ;;  %v692_v36 = vmul.f32 0.01, %v566_v25  ;;  %v3200_v37 = vpop.f32.mrb[18].mxu0 }
 0x10a   : > { %3610 = vrot.lane.b32.xlu0 %v3609_v26, %s3900_s23  ;;  %3600 = vrot.lane.b32.xlu1 %v3599_v27, %s3900_s23  ;;  %v725_v38 = vsel %vm661_vm4, %v571_v18, %v693_v30  ;;  %v581_v39 = vadd.f32 %v3200_v37, %v4308_v55  ;;  %v575_v40 = vpop.f32.mrb[19].mxu0  ;;  %v4470_v18 = vld [vmem:[#allocation2 + $0x91] sm:$0xff] }
 0x10b   : > { %814 = vst.msk [vmem:[#allocation2 + $0xe1] sm:$0xff] %vm740_vm1, %v725_v38  ;;  %v724_v46 = vsel %vm660_vm5, %v566_v25, %v692_v36  ;;  %v576_v47 = vadd.f32 %v4308_v55, %v575_v40  ;;  %v3644_v30 = vpack.i.bf16 %v997_v16, %v4470_v18  ;;  %v4480_v36 = vld [vmem:[#allocation2 + $0x60] sm:$0xff] }
 0x10c   : > { %813 = vst.msk [vmem:[#allocation2 + $0xd9] sm:$0xff] %vm740_vm1, %v724_v46  ;;  %vm663_vm6 = vcmp.ge.f32.partialorder %v581_v39, 0.0  ;;  %v695_v56 = vmul.f32 0.01, %v581_v39  ;;  %v998_v38 = vld [vmem:[#allocation2 + $0x82] sm:$0xff] }
 0x10d   : > { %vm662_vm7 = vcmp.ge.f32.partialorder %v576_v47, 0.0  ;;  %v694_v61 = vmul.f32 0.01, %v576_v47  ;;  %v3203_v62 = vpop.f32.mrb[20].mxu0 }
 0x10e   : > { %3625 = vrot.lane.b32.xlu0 %v3624_v48, %s3900_s23  ;;  %3615 = vrot.lane.b32.xlu1 %v3614_v49, %s3900_s23  ;;  %v727_v0 = vsel %vm663_vm6, %v581_v39, %v695_v56  ;;  %v591_v1 = vadd.f32 %v3203_v62, %v4308_v55  ;;  %v585_v2 = vpop.f32.mrb[21].mxu0  ;;  %v4483_v39 = vld [vmem:[#allocation2 + $0x99] sm:$0xff]  ;;  %v4493_v62 = vld [vmem:[#allocation2 + $0x68] sm:$0xff] }
 0x10f   : > { %816 = vst.msk [vmem:[#allocation2 + $0xf9] sm:$0xff] %vm740_vm1, %v727_v0  ;;  %v726_v3 = vsel %vm662_vm7, %v576_v47, %v694_v61  ;;  %v586_v4 = vadd.f32 %v4308_v55, %v585_v2  ;;  %v3649_v58 = vpack.i.bf16 %v998_v38, %v4483_v39  ;;  %v3639_v61 = vpack.i.bf16 %v4401_v22, %v4480_v36  ;;  %v4496_v2 = vld [vmem:[#allocation2 + $0xa9] sm:$0xff] }
 0x110   : > { %815 = vst.msk [vmem:[#allocation2 + $0xf1] sm:$0xff] %vm740_vm1, %v726_v3  ;;  %vm665_vm8 = vcmp.ge.f32.partialorder %v591_v1, 0.0  ;;  %v697_v14 = vmul.f32 0.01, %v591_v1 }
 0x111   : > { %vm664_vm9 = vcmp.ge.f32.partialorder %v586_v4, 0.0  ;;  %v696_v19 = vmul.f32 0.01, %v586_v4  ;;  %v3206_v20 = vpop.f32.mrb[22].mxu0 }
 0x112   : > { %3630 = vrot.lane.b32.xlu0 %v3629_v6, %s3900_s23  ;;  %3620 = vrot.lane.b32.xlu1 %v3619_v7, %s3900_s23  ;;  %v729_v24 = vsel %vm665_vm8, %v591_v1, %v697_v14  ;;  %v601_v25 = vadd.f32 %v3206_v20, %v4308_v55  ;;  %v595_v9 = vpop.f32.mrb[23].mxu0  ;;  %v999_v1 = vld [vmem:[#allocation2 + $0x92] sm:$0xff]  ;;  %v3654_v20 = vpack.i.bf16 %v4407_v33, %v4493_v62 }
 0x113   : > { %818 = vst.msk [vmem:[#allocation2 + $0x111] sm:$0xff] %vm740_vm1, %v729_v24  ;;  %v728_v26 = vsel %vm664_vm9, %v586_v4, %v696_v19  ;;  %v596_v27 = vadd.f32 %v4308_v55, %v595_v9  ;;  %v3664_v19 = vpack.i.bf16 %v999_v1, %v4496_v2  ;;  %v933_v24 = vld [vmem:[#allocation2 + $0x78] sm:$0xff] }
 0x114   : > { %817 = vst.msk [vmem:[#allocation2 + $0x109] sm:$0xff] %vm740_vm1, %v728_v26  ;;  %vm667_vm10 = vcmp.ge.f32.partialorder %v601_v25, 0.0  ;;  %v699_v37 = vmul.f32 0.01, %v601_v25  ;;  %v1000_v9 = vld [vmem:[#allocation2 + $0x9a] sm:$0xff]  ;;  %v4507_v26 = vld [vmem:[#allocation2 + $0xb1] sm:$0xff] }
 0x115   : > { %vm666_vm11 = vcmp.ge.f32.partialorder %v596_v27, 0.0  ;;  %v698_v40 = vmul.f32 0.01, %v596_v27  ;;  %v3209_v46 = vpop.f32.mrb[24].mxu0 }
 0x116   : > { %3645 = vrot.lane.b32.xlu0 %v3644_v30, %s3900_s23  ;;  %3635 = vrot.lane.b32.xlu1 %v3634_v32, %s3900_s23  ;;  %v731_v47 = vsel %vm667_vm10, %v601_v25, %v699_v37  ;;  %v611_v48 = vadd.f32 %v3209_v46, %v4308_v55  ;;  %v605_v15 = vpop.f32.mrb[25].mxu0  ;;  %v3669_v46 = vpack.i.bf16 %v1000_v9, %v4507_v26  ;;  %v1003_v9 = vld [vmem:[#allocation2 + $0xc2] sm:$0xff] }
 0x117   : > { %820 = vst.msk [vmem:[#allocation2 + $0x129] sm:$0xff] %vm740_vm1, %v731_v47  ;;  %v730_v49 = vsel %vm666_vm11, %v596_v27, %v698_v40  ;;  %v606_v56 = vadd.f32 %v4308_v55, %v605_v15  ;;  %v3659_v47 = vpack.i.bf16 %v4416_v54, %v933_v24 }
 0x118   : > { %819 = vst.msk [vmem:[#allocation2 + $0x121] sm:$0xff] %vm740_vm1, %v730_v49  ;;  %vm669_vm12 = vcmp.ge.f32.partialorder %v611_v48, 0.0  ;;  %v701_v0 = vmul.f32 0.01, %v611_v48  ;;  %v1001_v49 = vld [vmem:[#allocation2 + $0xaa] sm:$0xff] }
 0x119   : > { %vm668_vm13 = vcmp.ge.f32.partialorder %v606_v56, 0.0  ;;  %v700_v3 = vmul.f32 0.01, %v606_v56  ;;  %v3212_v4 = vpop.f32.mrb[26].mxu0 }
 0x11a   : > { %3650 = vrot.lane.b32.xlu0 %v3649_v58, %s3900_s23  ;;  %3640 = vrot.lane.b32.xlu1 %v3639_v61, %s3900_s23  ;;  %v733_v6 = vsel %vm669_vm12, %v611_v48, %v701_v0  ;;  %v621_v7 = vadd.f32 %v3212_v4, %v4308_v55  ;;  %v615_v22 = vpop.f32.mrb[27].mxu0  ;;  %v934_v48 = vld [vmem:[#allocation2 + $0x80] sm:$0xff] }
 0x11b   : > { %822 = vst.msk [vmem:[#allocation2 + $0x141] sm:$0xff] %vm740_vm1, %v733_v6  ;;  %v732_v14 = vsel %vm668_vm13, %v606_v56, %v700_v3  ;;  %v616_v16 = vadd.f32 %v4308_v55, %v615_v22  ;;  %v4517_v56 = vld [vmem:[#allocation2 + $0xc1] sm:$0xff] }
 0x11c   : > { %821 = vst.msk [vmem:[#allocation2 + $0x139] sm:$0xff] %vm740_vm1, %v732_v14  ;;  %vm671_vm14 = vcmp.ge.f32.partialorder %v621_v7, 0.0  ;;  %v703_v25 = vmul.f32 0.01, %v621_v7  ;;  %v3684_v6 = vpack.i.bf16 %v1001_v49, %v4517_v56  ;;  %v1002_v14 = vld [vmem:[#allocation2 + $0xb2] sm:$0xff] }
 0x11d   : > { %vm670_vm15 = vcmp.ge.f32.partialorder %v616_v16, 0.0  ;;  %v702_v27 = vmul.f32 0.01, %v616_v16  ;;  %v3215_v30 = vpop.f32.mrb[28].mxu0 }
 0x11e   : > { %3665 = vrot.lane.b32.xlu0 %v3664_v19, %s3900_s23  ;;  %3655 = vrot.lane.b32.xlu1 %v3654_v20, %s3900_s23  ;;  %v735_v32 = vsel %vm671_vm14, %v621_v7, %v703_v25  ;;  %v631_v37 = vadd.f32 %v3215_v30, %v4308_v55  ;;  %v625_v38 = vpop.f32.mrb[29].mxu0  ;;  %v3674_v7 = vpack.i.bf16 %v4425_v10, %v934_v48  ;;  %v935_v19 = vld [vmem:[#allocation2 + $0x90] sm:$0xff]  ;;  %v936_v30 = vld [vmem:[#allocation2 + $0x98] sm:$0xff] }
 0x11f   : > { %824 = vst.msk [vmem:[#allocation2 + $0x159] sm:$0xff] %vm740_vm1, %v735_v32  ;;  %v734_v33 = vsel %vm670_vm15, %v616_v16, %v702_v27  ;;  %v626_v40 = vadd.f32 %v4308_v55, %v625_v38  ;;  %v4527_v16 = vld [vmem:[#allocation2 + $0xc9] sm:$0xff]  ;;  %v3679_v25 = vpack.i.bf16 %v4442_v34, %v935_v19  ;;  %v1068_v27 = vld [vmem:[#allocation2 + $0xd9] sm:$0xff]  ;;  %v1070_v48 = vld [vmem:[#allocation2 + $0xf1] sm:$0xff] }
 0x120   : > { %823 = vst.msk [vmem:[#allocation2 + $0x151] sm:$0xff] %vm740_vm1, %v734_v33  ;;  %vm673_vm0 = vcmp.ge.f32.partialorder %v631_v37, 0.0  ;;  %v705_v15 = vmul.f32 0.01, %v631_v37  ;;  %v3689_v10 = vpack.i.bf16 %v1002_v14, %v4527_v16  ;;  %v3704_v32 = vpack.i.bf16 %v1003_v9, %v1068_v27  ;;  %v1004_v38 = vld [vmem:[#allocation2 + $0xca] sm:$0xff]  ;;  %v1069_v33 = vld [vmem:[#allocation2 + $0xe1] sm:$0xff] }
 0x121   : > { %vm672_vm2 = vcmp.ge.f32.partialorder %v626_v40, 0.0  ;;  %v704_v58 = vmul.f32 0.01, %v626_v40  ;;  %v3218_v61 = vpop.f32.mrb[30].mxu0  ;;  %v3709_v34 = vpack.i.bf16 %v1004_v38, %v1069_v33  ;;  %v941_v14 = vld [vmem:[#allocation2 + $0xd8] sm:$0xff]  ;;  %v1075_v9 = vld [vmem:[#allocation2 + $0x129] sm:$0xff] }
 0x122   : > { %3670 = vrot.lane.b32.xlu0 %v3669_v46, %s3900_s23  ;;  %3660 = vrot.lane.b32.xlu1 %v3659_v47, %s3900_s23  ;;  %v737_v0 = vsel %vm673_vm0, %v631_v37, %v705_v15  ;;  %v641_v1 = vadd.f32 %v3218_v61, %v4308_v55  ;;  %v635_v3 = vpop.f32.mrb[31].mxu0  ;;  %v3694_v37 = vpack.i.bf16 %v4457_v60, %v936_v30  ;;  %v1005_v47 = vld [vmem:[#allocation2 + $0xda] sm:$0xff]  ;;  %v938_v15 = vld [vmem:[#allocation2 + $0xb0] sm:$0xff] }
 0x123   : > { %826 = vst.msk [vmem:[#allocation2 + $0x171] sm:$0xff] %vm740_vm1, %v737_v0  ;;  %v736_v54 = vsel %vm672_vm2, %v626_v40, %v704_v58  ;;  %v636_v4 = vadd.f32 %v4308_v55, %v635_v3  ;;  %v937_v40 = vld [vmem:[#allocation2 + $0xa8] sm:$0xff]  ;;  %v3724_v49 = vpack.i.bf16 %v1005_v47, %v1070_v48  ;;  %v3714_v60 = vpack.i.bf16 %v4483_v39, %v938_v15  ;;  %v1071_v61 = vld [vmem:[#allocation2 + $0xf9] sm:$0xff]  ;;  %v943_v30 = vld [vmem:[#allocation2 + $0xf0] sm:$0xff] }
 0x124   : > { %825 = vst.msk [vmem:[#allocation2 + $0x169] sm:$0xff] %vm740_vm1, %v736_v54  ;;  %vm675_vm3 = vcmp.ge.f32.partialorder %v641_v1, 0.0  ;;  %v707_v22 = vmul.f32 0.01, %v641_v1  ;;  %v3699_v46 = vpack.i.bf16 %v4470_v18, %v937_v40  ;;  %v1006_v58 = vld [vmem:[#allocation2 + $0xe2] sm:$0xff]  ;;  %v1007_v3 = vld [vmem:[#allocation2 + $0xf2] sm:$0xff] }
 0x125   : > { %vm674_vm4 = vcmp.ge.f32.partialorder %v636_v4, 0.0  ;;  %v706_v20 = vmul.f32 0.01, %v636_v4  ;;  %v939_v0 = vld [vmem:[#allocation2 + $0xc0] sm:$0xff]  ;;  %v1072_v54 = vld [vmem:[#allocation2 + $0x109] sm:$0xff]  ;;  %v944_v38 = vld [vmem:[#allocation2 + $0xf8] sm:$0xff] }
 0x126   : > { %3685 = vrot.lane.b32.xlu0 %v3684_v6, %s3900_s23  ;;  %3675 = vrot.lane.b32.xlu1 %v3674_v7, %s3900_s23  ;;  %v739_v24 = vsel %vm675_vm3, %v641_v1, %v707_v22  ;;  %v3729_v1 = vpack.i.bf16 %v1006_v58, %v1071_v61  ;;  %v3719_v18 = vpack.i.bf16 %v4496_v2, %v939_v0  ;;  %v1008_v7 = vld [vmem:[#allocation2 + $0xfa] sm:$0xff]  ;;  %v1073_v22 = vld [vmem:[#allocation2 + $0x111] sm:$0xff] }
 0x127   : > { %828 = vst.msk [vmem:[#allocation2 + $0x189] sm:$0xff] %vm740_vm1, %v739_v24  ;;  %v738_v55 = vsel %vm674_vm4, %v636_v4, %v706_v20  ;;  %v940_v4 = vld [vmem:[#allocation2 + $0xc8] sm:$0xff]  ;;  %v3744_v6 = vpack.i.bf16 %v1007_v3, %v1072_v54  ;;  %v3749_v19 = vpack.i.bf16 %v1008_v7, %v1073_v22  ;;  %v3739_v2 = vpack.i.bf16 %v4517_v56, %v941_v14  ;;  %v946_v47 = vld [vmem:[#allocation2 + $0x110] sm:$0xff]  ;;  %v890_v7 = vld [vmem:[#allocation2 + $0x159] sm:$0xff] }
 0x128   : > { %827 = vst.msk [vmem:[#allocation2 + $0x181] sm:$0xff] %vm740_vm1, %v738_v55  ;;  %v3734_v39 = vpack.i.bf16 %v4507_v26, %v940_v4  ;;  %v1009_v20 = vld [vmem:[#allocation2 + $0x10a] sm:$0xff]  ;;  %v1074_v24 = vld [vmem:[#allocation2 + $0x121] sm:$0xff]  ;;  %v3784_v15 = vpack.i.bf16 %v1071_v61, %v946_v47 }
 0x129   : > { %v942_v55 = vld [vmem:[#allocation2 + $0xe0] sm:$0xff]  ;;  %v945_v56 = vld [vmem:[#allocation2 + $0x108] sm:$0xff] }
 0x12a   : > { %3690 = vrot.lane.b32.xlu0 %v3689_v10, %s3900_s23  ;;  %3680 = vrot.lane.b32.xlu1 %v3679_v25, %s3900_s23  ;;  %v3764_v10 = vpack.i.bf16 %v1009_v20, %v1074_v24  ;;  %v3754_v26 = vpack.i.bf16 %v4527_v16, %v942_v55  ;;  %v1010_v25 = vld [vmem:[#allocation2 + $0x112] sm:$0xff]  ;;  %v3779_v40 = vpack.i.bf16 %v1070_v48, %v945_v56  ;;  %v950_v48 = vld [vmem:[#allocation2 + $0x140] sm:$0xff] }
 0x12b   : > { %v953_v3 = vld [vmem:[#allocation2 + $0x168] sm:$0xff]  ;;  %v3804_v61 = vpack.i.bf16 %v1075_v9, %v950_v48  ;;  %v1015_v56 = vld [vmem:[#allocation2 + $0x152] sm:$0xff] }
 0x12c   : > { %v888_v4 = vld [vmem:[#allocation2 + $0x141] sm:$0xff] }
 0x12e   : > { %3705 = vrot.lane.b32.xlu0 %v3704_v32, %s3900_s23  ;;  %3695 = vrot.lane.b32.xlu1 %v3694_v37, %s3900_s23  ;;  %v3769_v32 = vpack.i.bf16 %v1010_v25, %v1075_v9  ;;  %v3759_v37 = vpack.i.bf16 %v1068_v27, %v943_v30  ;;  %v951_v27 = vld [vmem:[#allocation2 + $0x150] sm:$0xff]  ;;  %v1013_v9 = vld [vmem:[#allocation2 + $0x13a] sm:$0xff] }
 0x12f   : > { %v955_v14 = vld [vmem:[#allocation2 + $0x180] sm:$0xff]  ;;  %v956_v55 = vld [vmem:[#allocation2 + $0x188] sm:$0xff] }
 0x130   : > { %v1012_v30 = vld [vmem:[#allocation2 + $0x12a] sm:$0xff] }
 0x132   : > { %3710 = vrot.lane.b32.xlu0 %v3709_v34, %s3900_s23  ;;  %3700 = vrot.lane.b32.xlu1 %v3699_v46, %s3900_s23  ;;  %v3774_v34 = vpack.i.bf16 %v1069_v33, %v944_v38  ;;  %v947_v46 = vld [vmem:[#allocation2 + $0x120] sm:$0xff] }
 0x133   : > { %v3789_v16 = vpack.i.bf16 %v1072_v54, %v947_v46  ;;  %v952_v54 = vld [vmem:[#allocation2 + $0x158] sm:$0xff]  ;;  %v1014_v38 = vld [vmem:[#allocation2 + $0x142] sm:$0xff] }
 0x136   : > { %3725 = vrot.lane.b32.xlu0 %v3724_v49, %s3900_s23  ;;  %3715 = vrot.lane.b32.xlu1 %v3714_v60, %s3900_s23  ;;  %v949_v49 = vld [vmem:[#allocation2 + $0x138] sm:$0xff]  ;;  %v948_v60 = vld [vmem:[#allocation2 + $0x128] sm:$0xff] }
 0x137   : > { %v3799_v58 = vpack.i.bf16 %v1074_v24, %v949_v49  ;;  %v3794_v0 = vpack.i.bf16 %v1073_v22, %v948_v60  ;;  %v891_v22 = vld [vmem:[#allocation2 + $0x169] sm:$0xff]  ;;  %v892_v24 = vld [vmem:[#allocation2 + $0x171] sm:$0xff] }
 0x138   : > { %v3859_v47 = vpack.i.bf16 %v1015_v56, %v891_v22  ;;  %v1824_v60 = vld [vmem:[%s5188_s3 + $0x210] sm:$0xff] }
 0x139   : > { %v959_v56 = vld [vmem:[#allocation2 + $0x31] sm:$0xff] }
 0x13a   : > { %3730 = vrot.lane.b32.xlu0 %v3729_v1, %s3900_s23  ;;  %3720 = vrot.lane.b32.xlu1 %v3719_v18, %s3900_s23  ;;  %v887_v1 = vld [vmem:[#allocation2 + $0x139] sm:$0xff]  ;;  %v889_v18 = vld [vmem:[#allocation2 + $0x151] sm:$0xff] }
 0x13b   : > { %v3809_v33 = vpack.i.bf16 %v887_v1, %v951_v27  ;;  %v1825_v27 = vld [vmem:[%s5188_s3 + $0x218] sm:$0xff] }
 0x13e   : > { %3745 = vrot.lane.b32.xlu0 %v3744_v6, %s3900_s23  ;;  %3735 = vrot.lane.b32.xlu1 %v3734_v39, %s3900_s23  ;;  %v3819_v6 = vpack.i.bf16 %v889_v18, %v953_v3  ;;  %v3814_v39 = vpack.i.bf16 %v888_v4, %v952_v54 }
 0x142   : > { %3750 = vrot.lane.b32.xlu0 %v3749_v19, %s3900_s23  ;;  %3740 = vrot.lane.b32.xlu1 %v3739_v2, %s3900_s23  ;;  %v954_v19 = vld [vmem:[#allocation2 + $0x170] sm:$0xff]  ;;  %v3829_v2 = vpack.i.bf16 %v891_v22, %v955_v14 }
 0x143   : > { %v3824_v20 = vpack.i.bf16 %v890_v7, %v954_v19  ;;  %v1018_v22 = vld [vmem:[#allocation2 + $0x172] sm:$0xff]  ;;  %v1083_v14 = vld [vmem:[#allocation2 + $0x189] sm:$0xff] }
 0x146   : > { %3765 = vrot.lane.b32.xlu0 %v3764_v10, %s3900_s23  ;;  %3755 = vrot.lane.b32.xlu1 %v3754_v26, %s3900_s23  ;;  %v1011_v10 = vld [vmem:[#allocation2 + $0x122] sm:$0xff]  ;;  %v3834_v26 = vpack.i.bf16 %v892_v24, %v956_v55 }
 0x147   : > { %v3839_v25 = vpack.i.bf16 %v1011_v10, %v887_v1  ;;  %v3874_v10 = vpack.i.bf16 %v1018_v22, %v1083_v14  ;;  %v831_v22 = vld [vmem:[#allocation2 + $0x18] sm:$0xff] }
 0x14a   : > { %3770 = vrot.lane.b32.xlu0 %v3769_v32, %s3900_s23  ;;  %3760 = vrot.lane.b32.xlu1 %v3759_v37, %s3900_s23  ;;  %v3849_v32 = vpack.i.bf16 %v1013_v9, %v889_v18  ;;  %v3844_v37 = vpack.i.bf16 %v1012_v30, %v888_v4  ;;  %v1084_v18 = vld [vmem:[#allocation2 + $0x199] sm:$0xff]  ;;  %v1085_v9 = vld [vmem:[#allocation2 + $0x1a1] sm:$0xff] }
 0x14e   : > { %3780 = vrot.lane.b32.xlu0 %v3779_v40, %s3900_s23  ;;  %3775 = vrot.lane.b32.xlu1 %v3774_v34, %s3900_s23  ;;  %v1017_v40 = vld [vmem:[#allocation2 + $0x16a] sm:$0xff]  ;;  %v1082_v34 = vld [vmem:[#allocation2 + $0x181] sm:$0xff] }
 0x152   : > { %3790 = vrot.lane.b32.xlu0 %v3789_v16, %s3900_s23  ;;  %3785 = vrot.lane.b32.xlu1 %v3784_v15, %s3900_s23  ;;  %v3854_v16 = vpack.i.bf16 %v1014_v38, %v890_v7 }
 0x156   : > { %3800 = vrot.lane.b32.xlu0 %v3799_v58, %s3900_s23  ;;  %3795 = vrot.lane.b32.xlu1 %v3794_v0, %s3900_s23  ;;  %v3869_v58 = vpack.i.bf16 %v1017_v40, %v1082_v34  ;;  %v1016_v0 = vld [vmem:[#allocation2 + $0x15a] sm:$0xff] }
 0x157   : > { %v3864_v7 = vpack.i.bf16 %v1016_v0, %v892_v24  ;;  %v1827_v0 = vld [vmem:[%s5188_s3 + $0x228] sm:$0xff] }
 0x15a   : > { %3810 = vrot.lane.b32.xlu0 %v3809_v33, %s3900_s23  ;;  %3805 = vrot.lane.b32.xlu1 %v3804_v61, %s3900_s23  ;;  %v1019_v33 = vld [vmem:[#allocation2 + $0x182] sm:$0xff]  ;;  %v3391_v61 = vpack.c.bf16 %v1825_v27, %v1824_v60 }
 0x15e   : > { %3820 = vrot.lane.b32.xlu0 %v3819_v6, %s3900_s23  ;;  %3815 = vrot.lane.b32.xlu1 %v3814_v39, %s3900_s23 }
 0x162   : > { %3830 = vrot.lane.b32.xlu0 %v3829_v2, %s3900_s23  ;;  %3825 = vrot.lane.b32.xlu1 %v3824_v20, %s3900_s23  ;;  %v893_v2 = vld [vmem:[#allocation2 + $0x2] sm:$0xff] }
 0x166   : > { %3840 = vrot.lane.b32.xlu0 %v3839_v25, %s3900_s23  ;;  %3835 = vrot.lane.b32.xlu1 %v3834_v26, %s3900_s23  ;;  %v829_v26 = vld [vmem:[#allocation2] sm:$0xff]  ;;  %v1020_v25 = vld [vmem:[#allocation2 + $0x18a] sm:$0xff] }
 0x167   : > { %v3884_v38 = vpack.i.bf16 %v1020_v25, %v1085_v9  ;;  %v1829_v25 = vld [vmem:[%s5188_s3 + $0x238] sm:$0xff]  ;;  %v896_v9 = vld [vmem:[#allocation2 + $0x22] sm:$0xff] }
 0x16a   : > { %3850 = vrot.lane.b32.xlu0 %v3849_v32, %s3900_s23  ;;  %3845 = vrot.lane.b32.xlu1 %v3844_v37, %s3900_s23 }
 0x16c   : > { %v3571_v46 = vpop.permute.xlu0 %3570 }
 0x16d   : > { %v3573_v15 = vunpack.i.h.bf16 %v3571_v46  ;;  %v3572_v49 = vunpack.i.l.bf16 %v3571_v46 }
 0x16e   : > { %3860 = vrot.lane.b32.xlu0 %v3859_v47, %s3900_s23  ;;  %3855 = vrot.lane.b32.xlu1 %v3854_v16, %s3900_s23  ;;  %v894_v16 = vld [vmem:[#allocation2 + $0xa] sm:$0xff] }
 0x16f   : > { %v1726_v1 = vsel %vm740_vm1, %v4427_v12, %v3572_v49  ;;  %v1694_v48 = vsel %vm740_vm1, %v4432_v21, %v3573_v15  ;;  %v3879_v12 = vpack.i.bf16 %v1019_v33, %v1084_v18  ;;  %v830_v15 = vld [vmem:[#allocation2 + $0x8] sm:$0xff]  ;;  %v960_v33 = vld [vmem:[#allocation2 + $0x39] sm:$0xff] }
 0x170   : > { %v3581_v3 = vpop.permute.xlu1 %3580  ;;  %v3576_v54 = vpop.permute.xlu0 %3575  ;;  %2222 = vmatprep.mubr.f32.mxu0 %v1726_v1 }
 0x171   : > { %v3582_v4 = vunpack.i.l.bf16 %v3581_v3  ;;  %v3578_v6 = vunpack.i.h.bf16 %v3576_v54  ;;  %v3577_v39 = vunpack.i.l.bf16 %v3576_v54  ;;  %2223 = vmatmul.mubr.f32.vlgmr.msra.gmra.mrb[32].mxu0 %v1694_v48  ;;  %v3583_v20 = vunpack.i.h.bf16 %v3581_v3 }
 0x172   : > { %3870 = vrot.lane.b32.xlu0 %v3869_v58, %s3900_s23  ;;  %3390 = vmatpush3.bf16.msra.mxu0 %v4375_v52  ;;  %v1826_v58 = vld [vmem:[%s5188_s3 + $0x220] sm:$0xff] }
 0x173   : > { %3865 = vrot.lane.b32.xlu1 %v3864_v7, %s3900_s23  ;;  %v1727_v21 = vsel %vm740_vm1, %v4439_v28, %v3577_v39  ;;  %v1695_v19 = vsel %vm740_vm1, %v4447_v44, %v3578_v6  ;;  %3392 = vmatprep.subr.bf16.mxu0 %v3391_v61  ;;  %v1728_v28 = vsel %vm740_vm1, %v4454_v53, %v3582_v4  ;;  %v895_v7 = vld [vmem:[#allocation2 + $0x1a] sm:$0xff] }
 0x174   : > { %v3591_v55 = vpop.permute.xlu0 %3590  ;;  %2227 = vmatprep.mubr.f32.mxu0 %v1727_v21  ;;  %v3586_v24 = vpop.permute.xlu1 %3585  ;;  %v1696_v47 = vsel %vm740_vm1, %v959_v56, %v3583_v20  ;;  %v961_v21 = vld [vmem:[#allocation2 + $0x49] sm:$0xff] }
 0x175   : > { %v3592_v52 = vunpack.i.l.bf16 %v3591_v55  ;;  %v3588_v30 = vunpack.i.h.bf16 %v3586_v24  ;;  %v3587_v32 = vunpack.i.l.bf16 %v3586_v24  ;;  %2228 = vmatmul.mubr.f32.gmra.mrb[34].mxu0 %v1695_v19  ;;  %v3593_v40 = vunpack.i.h.bf16 %v3591_v55 }
 0x176   : > { %3880 = vrot.lane.b32.xlu0 %v3879_v12, %s3900_s23  ;;  %2232 = vmatprep.mubr.f32.mxu0 %v1728_v28  ;;  %v962_v28 = vld [vmem:[#allocation2 + $0x51] sm:$0xff] }
 0x177   : > { %3875 = vrot.lane.b32.xlu1 %v3874_v10, %s3900_s23  ;;  %v1662_v44 = vsel %vm740_vm1, %v893_v2, %v3587_v32  ;;  %v1630_v37 = vsel %vm740_vm1, %v829_v26, %v3588_v30  ;;  %3394 = vmatpush3.bf16.msra.mxu0 %v3391_v61  ;;  %v1729_v27 = vsel %vm740_vm1, %v4467_v13, %v3592_v52  ;;  %v1828_v26 = vld [vmem:[%s5188_s3 + $0x230] sm:$0xff]  ;;  %v832_v52 = vld [vmem:[#allocation2 + $0x20] sm:$0xff] }
 0x178   : > { %v3606_v34 = vpop.permute.xlu0 %3605  ;;  %v3596_v46 = vpop.permute.xlu1 %3595  ;;  %1997 = vmatprep.mubr.f32.mxu1 %v1662_v44  ;;  %v1697_v54 = vsel %vm740_vm1, %v960_v33, %v3593_v40  ;;  %v3395_v61 = vpack.c.bf16 %v1827_v0, %v1826_v58  ;;  %v3399_v40 = vpack.c.bf16 %v1829_v25, %v1828_v26 }
 0x179   : > { %v3607_v53 = vunpack.i.l.bf16 %v3606_v34  ;;  %v3598_v49 = vunpack.i.h.bf16 %v3596_v46  ;;  %v3597_v60 = vunpack.i.l.bf16 %v3596_v46  ;;  %1998 = vmatmul.mubr.f32.vlgmr.msra.gmra.mrb[0].mxu1 %v1630_v37  ;;  %2233 = vmatmul.mubr.f32.gmra.mrb[36].mxu0 %v1696_v47  ;;  %v3608_v18 = vunpack.i.h.bf16 %v3606_v34 }
 0x17a   : > { %2237 = vmatprep.mubr.f32.mxu0 %v1729_v27  ;;  %3467 = vmatpush1.bf16.msra.mxu1 %v4095_v42 }
 0x17b   : > { %3885 = vrot.lane.b32.xlu1 %v3884_v38, %s3900_s23  ;;  %v1663_v1 = vsel %vm740_vm1, %v894_v16, %v3597_v60  ;;  %v1631_v48 = vsel %vm740_vm1, %v830_v15, %v3598_v49  ;;  %3452 = vmatprep.subr.bf16.mxu1 %v3899_v41  ;;  %v1730_v42 = vsel %vm740_vm1, %v4480_v36, %v3607_v53  ;;  %v4636_v38 = vld [vmem:[#allocation2 + $0x78] sm:$0xff]  ;;  %v833_v15 = vld [vmem:[#allocation2 + $0x30] sm:$0xff]  ;;  %v963_v60 = vld [vmem:[#allocation2 + $0x61] sm:$0xff] }
 0x17c   : > { %v3611_v13 = vpop.permute.xlu0 %3610  ;;  %2002 = vmatprep.mubr.f32.mxu1 %v1663_v1  ;;  %v3601_v3 = vpop.permute.xlu1 %3600  ;;  %v1698_v55 = vsel %vm740_vm1, %v961_v21, %v3608_v18  ;;  %3396 = vmatprep.subr.bf16.mxu0 %v3395_v61  ;;  %v4640_v16 = vld [vmem:[#allocation2 + $0x32] sm:$0xff] }
 0x17d   : > { %v3612_v4 = vunpack.i.l.bf16 %v3611_v13  ;;  %v3603_v6 = vunpack.i.h.bf16 %v3601_v3  ;;  %v3602_v39 = vunpack.i.l.bf16 %v3601_v3  ;;  %2003 = vmatmul.mubr.f32.gmra.mrb[2].mxu1 %v1631_v48  ;;  %2238 = vmatmul.mubr.f32.gmra.mrb[38].mxu0 %v1697_v54  ;;  %v3613_v19 = vunpack.i.h.bf16 %v3611_v13  ;;  %v4648_v48 = vld [vmem:[#allocation2 + $0x80] sm:$0xff]  ;;  %v834_v54 = vld [vmem:[#allocation2 + $0x38] sm:$0xff] }
 0x17e   : > { %2242 = vmatprep.mubr.f32.mxu0 %v1730_v42  ;;  %3468 = vmatpush1.bf16.msra.mxu1 %v4106_v45  ;;  %v4652_v3 = vld [vmem:[#allocation2 + $0x3a] sm:$0xff] }
 0x17f   : > { %v1664_v14 = vsel %vm740_vm1, %v895_v7, %v3602_v39  ;;  %v1632_v12 = vsel %vm740_vm1, %v831_v22, %v3603_v6  ;;  %3453 = vmatprep.subr.bf16.mxu1 %v3899_v41  ;;  %v1731_v45 = vsel %vm740_vm1, %v4493_v62, %v3612_v4  ;;  %v1699_v56 = vsel %vm740_vm1, %v962_v28, %v3613_v19  ;;  %v964_v6 = vld [vmem:[#allocation2 + $0x69] sm:$0xff]  ;;  %v4676_v28 = vld [vmem:[#allocation2 + $0x52] sm:$0xff] }
 0x180   : > { %v3626_v2 = vpop.permute.xlu0 %3625  ;;  %v3616_v20 = vpop.permute.xlu1 %3615  ;;  %2007 = vmatprep.mubr.f32.mxu1 %v1664_v14  ;;  %3398 = vmatpush3.bf16.msra.mxu0 %v3395_v61  ;;  %v4660_v14 = vld [vmem:[#allocation2 + $0x90] sm:$0xff] }
 0x181   : > { %v3627_v36 = vunpack.i.l.bf16 %v3626_v2  ;;  %v3618_v24 = vunpack.i.h.bf16 %v3616_v20  ;;  %v3617_v10 = vunpack.i.l.bf16 %v3616_v20  ;;  %2008 = vmatmul.mubr.f32.gmra.mrb[4].mxu1 %v1632_v12  ;;  %2243 = vmatmul.mubr.f32.gmra.mrb[40].mxu0 %v1698_v55  ;;  %v3628_v62 = vunpack.i.h.bf16 %v3626_v2  ;;  %v4664_v2 = vld [vmem:[#allocation2 + $0x4a] sm:$0xff] }
 0x182   : > { %2247 = vmatprep.mubr.f32.mxu0 %v1731_v45  ;;  %3469 = vmatpush1.bf16.msra.mxu1 %v4122_v51  ;;  %v835_v20 = vld [vmem:[#allocation2 + $0x48] sm:$0xff] }
 0x183   : > { %v1665_v30 = vsel %vm740_vm1, %v896_v9, %v3617_v10  ;;  %v1633_v32 = vsel %vm740_vm1, %v832_v52, %v3618_v24  ;;  %3454 = vmatprep.subr.bf16.mxu1 %v3899_v41  ;;  %v1732_v47 = vsel %vm740_vm1, %v4636_v38, %v3627_v36  ;;  %v1700_v1 = vsel %vm740_vm1, %v963_v60, %v3628_v62  ;;  %v965_v24 = vld [vmem:[#allocation2 + $0x79] sm:$0xff]  ;;  %v836_v62 = vld [vmem:[#allocation2 + $0x50] sm:$0xff]  ;;  %v4688_v60 = vld [vmem:[#allocation2 + $0x62] sm:$0xff] }
 0x184   : > { %v3631_v44 = vpop.permute.xlu0 %3630  ;;  %v3621_v37 = vpop.permute.xlu1 %3620  ;;  %2012 = vmatprep.mubr.f32.mxu1 %v1665_v30  ;;  %3400 = vmatprep.subr.bf16.mxu0 %v3399_v40  ;;  %v4672_v9 = vld [vmem:[#allocation2 + $0x98] sm:$0xff] }
 0x185   : > { %v3632_v34 = vunpack.i.l.bf16 %v3631_v44  ;;  %v3623_v46 = vunpack.i.h.bf16 %v3621_v37  ;;  %v3622_v51 = vunpack.i.l.bf16 %v3621_v37  ;;  %2013 = vmatmul.mubr.f32.gmra.mrb[6].mxu1 %v1633_v32  ;;  %2248 = vmatmul.mubr.f32.gmra.mrb[42].mxu0 %v1699_v56  ;;  %v3633_v27 = vunpack.i.h.bf16 %v3631_v44  ;;  %v966_v56 = vld [vmem:[#allocation2 + $0x81] sm:$0xff] }
 0x186   : > { %2252 = vmatprep.mubr.f32.mxu0 %v1732_v47  ;;  %3470 = vmatpush1.bf16.msra.mxu1 %v4139_v57  ;;  %v4684_v47 = vld [vmem:[#allocation2 + $0xa8] sm:$0xff] }
 0x187   : > { %v1666_v53 = vsel %vm740_vm1, %v4640_v16, %v3622_v51  ;;  %v1634_v49 = vsel %vm740_vm1, %v833_v15, %v3623_v46  ;;  %3455 = vmatprep.subr.bf16.mxu1 %v3899_v41  ;;  %v1733_v13 = vsel %vm740_vm1, %v4648_v48, %v3632_v34  ;;  %v1701_v22 = vsel %vm740_vm1, %v964_v6, %v3633_v27  ;;  %v837_v27 = vld [vmem:[#allocation2 + $0x60] sm:$0xff] }
 0x188   : > { %v3646_v58 = vpop.permute.xlu0 %3645  ;;  %v3636_v0 = vpop.permute.xlu1 %3635  ;;  %2017 = vmatprep.mubr.f32.mxu1 %v1666_v53  ;;  %3402 = vmatpush3.bf16.msra.mxu0 %v3399_v40 }
 0x189   : > { %v3647_v33 = vunpack.i.l.bf16 %v3646_v58  ;;  %v3638_v18 = vunpack.i.h.bf16 %v3636_v0  ;;  %v3637_v57 = vunpack.i.l.bf16 %v3636_v0  ;;  %2018 = vmatmul.mubr.f32.gmra.mrb[8].mxu1 %v1634_v49  ;;  %2253 = vmatmul.mubr.f32.gmra.mrb[44].mxu0 %v1700_v1  ;;  %v3648_v39 = vunpack.i.h.bf16 %v3646_v58  ;;  %v967_v1 = vld [vmem:[#allocation2 + $0x91] sm:$0xff] }
 0x18a   : > { %2257 = vmatprep.mubr.f32.mxu0 %v1733_v13  ;;  %3471 = vmatpush1.bf16.msra.mxu1 %v4156_v63 }
 0x18b   : > { %v1667_v61 = vsel %vm740_vm1, %v4652_v3, %v3637_v57  ;;  %v1635_v4 = vsel %vm740_vm1, %v834_v54, %v3638_v18  ;;  %3456 = vmatprep.subr.bf16.mxu1 %v3899_v41  ;;  %v1734_v19 = vsel %vm740_vm1, %v4660_v14, %v3647_v33  ;;  %v1702_v25 = vsel %vm740_vm1, %v965_v24, %v3648_v39  ;;  %v4696_v54 = vld [vmem:[#allocation2 + $0xb0] sm:$0xff] }
 0x18c   : > { %v3651_v42 = vpop.permute.xlu0 %3650  ;;  %v3641_v7 = vpop.permute.xlu1 %3640  ;;  %2022 = vmatprep.mubr.f32.mxu1 %v1667_v61  ;;  %v4700_v39 = vld [vmem:[#allocation2 + $0x6a] sm:$0xff] }
 0x18d   : > { %v3652_v12 = vunpack.i.l.bf16 %v3651_v42  ;;  %v3643_v21 = vunpack.i.h.bf16 %v3641_v7  ;;  %v3642_v63 = vunpack.i.l.bf16 %v3641_v7  ;;  %2023 = vmatmul.mubr.f32.gmra.mrb[10].mxu1 %v1635_v4  ;;  %2258 = vmatmul.mubr.f32.gmra.mrb[46].mxu0 %v1701_v22  ;;  %v3653_v10 = vunpack.i.h.bf16 %v3651_v42  ;;  %v838_v42 = vld [vmem:[#allocation2 + $0x68] sm:$0xff] }
 0x18e   : > { %2262 = vmatprep.mubr.f32.mxu0 %v1734_v19  ;;  %3472 = vmatpush1.bf16.msra.mxu1 %v4173_v5 }
 0x18f   : > { %v1668_v55 = vsel %vm740_vm1, %v4664_v2, %v3642_v63  ;;  %v1636_v36 = vsel %vm740_vm1, %v835_v20, %v3643_v21  ;;  %3457 = vmatprep.subr.bf16.mxu1 %v3899_v41  ;;  %v1735_v5 = vsel %vm740_vm1, %v4672_v9, %v3652_v12  ;;  %v1703_v51 = vsel %vm740_vm1, %v966_v56, %v3653_v10  ;;  %v968_v12 = vld [vmem:[#allocation2 + $0x99] sm:$0xff] }
 0x190   : > { %v3666_v45 = vpop.permute.xlu0 %3665  ;;  %v3656_v26 = vpop.permute.xlu1 %3655  ;;  %2027 = vmatprep.mubr.f32.mxu1 %v1668_v55  ;;  %v4708_v55 = vld [vmem:[#allocation2 + $0xc0] sm:$0xff] }
 0x191   : > { %v3667_v52 = vunpack.i.l.bf16 %v3666_v45  ;;  %v3658_v30 = vunpack.i.h.bf16 %v3656_v26  ;;  %v3657_v32 = vunpack.i.l.bf16 %v3656_v26  ;;  %2028 = vmatmul.mubr.f32.gmra.mrb[12].mxu1 %v1636_v36  ;;  %2263 = vmatmul.mubr.f32.gmra.mrb[48].mxu0 %v1702_v25  ;;  %v3668_v40 = vunpack.i.h.bf16 %v3666_v45  ;;  %v4712_v45 = vld [vmem:[#allocation2 + $0x7a] sm:$0xff] }
 0x192   : > { %2267 = vmatprep.mubr.f32.mxu0 %v1735_v5  ;;  %3473 = vmatpush1.bf16.msra.mxu1 %v4190_v11 }
 0x193   : > { %v1669_v44 = vsel %vm740_vm1, %v4676_v28, %v3657_v32  ;;  %v1637_v37 = vsel %vm740_vm1, %v836_v62, %v3658_v30  ;;  %3458 = vmatprep.subr.bf16.mxu1 %v3899_v41  ;;  %v1736_v11 = vsel %vm740_vm1, %v4684_v47, %v3667_v52  ;;  %v1704_v13 = vsel %vm740_vm1, %v967_v1, %v3668_v40  ;;  %v969_v52 = vld [vmem:[#allocation2 + $0xa9] sm:$0xff] }
 0x194   : > { %v3671_v34 = vpop.permute.xlu0 %3670  ;;  %v3661_v46 = vpop.permute.xlu1 %3660  ;;  %2032 = vmatprep.mubr.f32.mxu1 %v1669_v44  ;;  %v4721_v44 = vld [vmem:[#allocation2 + $0xc8] sm:$0xff] }
 0x195   : > { %v3672_v15 = vunpack.i.l.bf16 %v3671_v34  ;;  %v3663_v53 = vunpack.i.h.bf16 %v3661_v46  ;;  %v3662_v49 = vunpack.i.l.bf16 %v3661_v46  ;;  %2033 = vmatmul.mubr.f32.gmra.mrb[14].mxu1 %v1637_v37  ;;  %2268 = vmatmul.mubr.f32.gmra.mrb[50].mxu0 %v1703_v51  ;;  %v3673_v33 = vunpack.i.h.bf16 %v3671_v34  ;;  %v970_v51 = vld [vmem:[#allocation2 + $0xb1] sm:$0xff] }
 0x196   : > { %2272 = vmatprep.mubr.f32.mxu0 %v1736_v11  ;;  %3474 = vmatpush1.bf16.msra.mxu1 %v4207_v17 }
 0x197   : > { %v1670_v58 = vsel %vm740_vm1, %v4688_v60, %v3662_v49  ;;  %v1638_v0 = vsel %vm740_vm1, %v837_v27, %v3663_v53  ;;  %3459 = vmatprep.subr.bf16.mxu1 %v3899_v41  ;;  %v1737_v17 = vsel %vm740_vm1, %v4696_v54, %v3672_v15  ;;  %v1705_v20 = vsel %vm740_vm1, %v968_v12, %v3673_v33  ;;  %v4734_v27 = vld [vmem:[#allocation2 + $0xd8] sm:$0xff] }
 0x198   : > { %v3686_v18 = vpop.permute.xlu0 %3685  ;;  %v3676_v57 = vpop.permute.xlu1 %3675  ;;  %2037 = vmatprep.mubr.f32.mxu1 %v1670_v58 }
 0x199   : > { %v3687_v61 = vunpack.i.l.bf16 %v3686_v18  ;;  %v3678_v4 = vunpack.i.h.bf16 %v3676_v57  ;;  %v3677_v6 = vunpack.i.l.bf16 %v3676_v57  ;;  %2038 = vmatmul.mubr.f32.gmra.mrb[16].mxu1 %v1638_v0  ;;  %2273 = vmatmul.mubr.f32.gmra.mrb[52].mxu0 %v1704_v13  ;;  %v3688_v21 = vunpack.i.h.bf16 %v3686_v18  ;;  %v971_v57 = vld [vmem:[#allocation2 + $0xc1] sm:$0xff] }
 0x19a   : > { %2277 = vmatprep.mubr.f32.mxu0 %v1737_v17  ;;  %3475 = vmatpush1.bf16.msra.mxu1 %v4224_v23  ;;  %v4747_v17 = vld [vmem:[#allocation2 + $0xe0] sm:$0xff] }
 0x19b   : > { %v1671_v7 = vsel %vm740_vm1, %v4700_v39, %v3677_v6  ;;  %v1639_v22 = vsel %vm740_vm1, %v838_v42, %v3678_v4  ;;  %3460 = vmatprep.subr.bf16.mxu1 %v3899_v41  ;;  %v1738_v23 = vsel %vm740_vm1, %v4708_v55, %v3687_v61  ;;  %v1706_v62 = vsel %vm740_vm1, %v969_v52, %v3688_v21 }
 0x19c   : > { %v3691_v63 = vpop.permute.xlu0 %3690  ;;  %v3681_v19 = vpop.permute.xlu1 %3680  ;;  %2042 = vmatprep.mubr.f32.mxu1 %v1671_v7 }
 0x19d   : > { %v3692_v36 = vunpack.i.l.bf16 %v3691_v63  ;;  %v3683_v24 = vunpack.i.h.bf16 %v3681_v19  ;;  %v3682_v10 = vunpack.i.l.bf16 %v3681_v19  ;;  %2043 = vmatmul.mubr.f32.gmra.mrb[18].mxu1 %v1639_v22  ;;  %2278 = vmatmul.mubr.f32.gmra.mrb[54].mxu0 %v1705_v20  ;;  %v3693_v30 = vunpack.i.h.bf16 %v3691_v63  ;;  %v972_v63 = vld [vmem:[#allocation2 + $0xc9] sm:$0xff] }
 0x19e   : > { %2282 = vmatprep.mubr.f32.mxu0 %v1738_v23  ;;  %3476 = vmatpush1.bf16.msra.mxu1 %v4241_v29 }
 0x19f   : > { %v1672_v26 = vsel %vm740_vm1, %v4712_v45, %v3682_v10  ;;  %v1640_v25 = vsel %vm740_vm1, %v4636_v38, %v3683_v24  ;;  %3461 = vmatprep.subr.bf16.mxu1 %v3899_v41  ;;  %v1739_v40 = vsel %vm740_vm1, %v4721_v44, %v3692_v36  ;;  %v4725_v38 = vld [vmem:[#allocation2 + $0x82] sm:$0xff]  ;;  %v1707_v11 = vsel %vm740_vm1, %v970_v51, %v3693_v30  ;;  %v4760_v10 = vld [vmem:[#allocation2 + $0xf0] sm:$0xff] }
 0x1a0   : > { %v3706_v32 = vpop.permute.xlu0 %3705  ;;  %v3696_v5 = vpop.permute.xlu1 %3695  ;;  %2047 = vmatprep.mubr.f32.mxu1 %v1672_v26 }
 0x1a1   : > { %v3707_v37 = vunpack.i.l.bf16 %v3706_v32  ;;  %v3698_v56 = vunpack.i.h.bf16 %v3696_v5  ;;  %v3697_v29 = vunpack.i.l.bf16 %v3696_v5  ;;  %2048 = vmatmul.mubr.f32.gmra.mrb[20].mxu1 %v1640_v25  ;;  %2283 = vmatmul.mubr.f32.gmra.mrb[56].mxu0 %v1706_v62  ;;  %v3708_v15 = vunpack.i.h.bf16 %v3706_v32  ;;  %v973_v32 = vld [vmem:[#allocation2 + $0xd9] sm:$0xff] }
 0x1a2   : > { %2287 = vmatprep.mubr.f32.mxu0 %v1739_v40  ;;  %3477 = vmatpush1.bf16.msra.mxu1 %v4258_v35 }
 0x1a3   : > { %v1673_v34 = vsel %vm740_vm1, %v4725_v38, %v3697_v29  ;;  %v1641_v46 = vsel %vm740_vm1, %v4648_v48, %v3698_v56  ;;  %3462 = vmatprep.subr.bf16.mxu1 %v3899_v41  ;;  %v1740_v1 = vsel %vm740_vm1, %v4734_v27, %v3707_v37  ;;  %v4738_v48 = vld [vmem:[#allocation2 + $0x92] sm:$0xff]  ;;  %v1708_v6 = vsel %vm740_vm1, %v971_v57, %v3708_v15 }
 0x1a4   : > { %v3711_v53 = vpop.permute.xlu0 %3710  ;;  %v3701_v49 = vpop.permute.xlu1 %3700  ;;  %2052 = vmatprep.mubr.f32.mxu1 %v1673_v34  ;;  %v4773_v29 = vld [vmem:[#allocation2 + $0xf8] sm:$0xff] }
 0x1a5   : > { %v3712_v58 = vunpack.i.l.bf16 %v3711_v53  ;;  %v3703_v0 = vunpack.i.h.bf16 %v3701_v49  ;;  %v3702_v35 = vunpack.i.l.bf16 %v3701_v49  ;;  %2053 = vmatmul.mubr.f32.gmra.mrb[22].mxu1 %v1641_v46  ;;  %2288 = vmatmul.mubr.f32.gmra.mrb[58].mxu0 %v1707_v11  ;;  %v3713_v13 = vunpack.i.h.bf16 %v3711_v53  ;;  %v974_v53 = vld [vmem:[#allocation2 + $0xe1] sm:$0xff] }
 0x1a6   : > { %2292 = vmatprep.mubr.f32.mxu0 %v1740_v1  ;;  %3478 = vmatpush1.bf16.msra.mxu1 %v4275_v43 }
 0x1a7   : > { %v1674_v33 = vsel %vm740_vm1, %v4738_v48, %v3702_v35  ;;  %v1642_v18 = vsel %vm740_vm1, %v4660_v14, %v3703_v0  ;;  %3463 = vmatprep.subr.bf16.mxu1 %v3899_v41  ;;  %v1741_v22 = vsel %vm740_vm1, %v4747_v17, %v3712_v58  ;;  %v4751_v14 = vld [vmem:[#allocation2 + $0x9a] sm:$0xff]  ;;  %v1709_v24 = vsel %vm740_vm1, %v972_v63, %v3713_v13  ;;  %v4786_v35 = vld [vmem:[#allocation2 + $0x108] sm:$0xff]  ;;  %v975_v13 = vld [vmem:[#allocation2 + $0xf1] sm:$0xff] }
 0x1a8   : > { %v3726_v61 = vpop.permute.xlu0 %3725  ;;  %v3716_v4 = vpop.permute.xlu1 %3715  ;;  %2057 = vmatprep.mubr.f32.mxu1 %v1674_v33 }
 0x1a9   : > { %v3727_v42 = vunpack.i.l.bf16 %v3726_v61  ;;  %v3718_v7 = vunpack.i.h.bf16 %v3716_v4  ;;  %v3717_v43 = vunpack.i.l.bf16 %v3716_v4  ;;  %2058 = vmatmul.mubr.f32.gmra.mrb[24].mxu1 %v1642_v18  ;;  %2293 = vmatmul.mubr.f32.gmra.mrb[60].mxu0 %v1708_v6  ;;  %v3728_v19 = vunpack.i.h.bf16 %v3726_v61 }
 0x1aa   : > { %2297 = vmatprep.mubr.f32.mxu0 %v1741_v22  ;;  %3479 = vmatpush1.bf16.msra.mxu1 %v4292_v50 }
 0x1ab   : > { %v1675_v12 = vsel %vm740_vm1, %v4751_v14, %v3717_v43  ;;  %v1643_v21 = vsel %vm740_vm1, %v4672_v9, %v3718_v7  ;;  %3464 = vmatprep.subr.bf16.mxu1 %v3899_v41  ;;  %v1742_v25 = vsel %vm740_vm1, %v4760_v10, %v3727_v42  ;;  %v4764_v9 = vld [vmem:[#allocation2 + $0xaa] sm:$0xff]  ;;  %v1710_v56 = vsel %vm740_vm1, %v973_v32, %v3728_v19  ;;  %v976_v19 = vld [vmem:[#allocation2 + $0xf9] sm:$0xff] }
 0x1ac   : > { %v3731_v20 = vpop.permute.xlu0 %3730  ;;  %v3721_v36 = vpop.permute.xlu1 %3720  ;;  %2062 = vmatprep.mubr.f32.mxu1 %v1675_v12  ;;  %v4798_v7 = vld [vmem:[#allocation2 + $0x110] sm:$0xff]  ;;  %v4813_v32 = vld [vmem:[#allocation2 + $0xda] sm:$0xff] }
 0x1ad   : > { %v3732_v23 = vunpack.i.l.bf16 %v3731_v20  ;;  %v3723_v26 = vunpack.i.h.bf16 %v3721_v36  ;;  %v3722_v50 = vunpack.i.l.bf16 %v3721_v36  ;;  %2063 = vmatmul.mubr.f32.gmra.mrb[26].mxu1 %v1643_v21  ;;  %2298 = vmatmul.mubr.f32.gmra.mrb[62].mxu0 %v1709_v24  ;;  %v3733_v5 = vunpack.i.h.bf16 %v3731_v20  ;;  %v4802_v21 = vld [vmem:[#allocation2 + $0xca] sm:$0xff] }
 0x1ae   : > { %2302 = vmatprep.mubr.f32.mxu0 %v1742_v25  ;;  %3480 = vmatpush1.bf16.msra.mxu1 %v4314_v59 }
 0x1af   : > { %v1676_v52 = vsel %vm740_vm1, %v4764_v9, %v3722_v50  ;;  %v1644_v30 = vsel %vm740_vm1, %v4684_v47, %v3723_v26  ;;  %3465 = vmatprep.subr.bf16.mxu1 %v3899_v41  ;;  %v1743_v46 = vsel %vm740_vm1, %v4773_v29, %v3732_v23  ;;  %v4777_v47 = vld [vmem:[#allocation2 + $0xb2] sm:$0xff]  ;;  %v1711_v0 = vsel %vm740_vm1, %v974_v53, %v3733_v5  ;;  %v4809_v26 = vld [vmem:[#allocation2 + $0x120] sm:$0xff] }
 0x1b0   : > { %v3746_v62 = vpop.permute.xlu0 %3745  ;;  %v3736_v37 = vpop.permute.xlu1 %3735  ;;  %2067 = vmatprep.mubr.f32.mxu1 %v1676_v52 }
 0x1b1   : > { %v3747_v40 = vunpack.i.l.bf16 %v3746_v62  ;;  %v3738_v34 = vunpack.i.h.bf16 %v3736_v37  ;;  %v3737_v59 = vunpack.i.l.bf16 %v3736_v37  ;;  %2068 = vmatmul.mubr.f32.gmra.mrb[28].mxu1 %v1644_v30  ;;  %2303 = vmatmul.mubr.f32.gmra.mrb[64].mxu0 %v1710_v56  ;;  %v3748_v49 = vunpack.i.h.bf16 %v3746_v62  ;;  %v977_v62 = vld [vmem:[#allocation2 + $0x109] sm:$0xff] }
 0x1b2   : > { %2307 = vmatprep.mubr.f32.mxu0 %v1743_v46  ;;  %3481 = vmatpush1.bf16.msra.mxu1 %v4333_v8 }
 0x1b3   : > { %v1677_v51 = vsel %vm740_vm1, %v4777_v47, %v3737_v59  ;;  %v1645_v15 = vsel %vm740_vm1, %v4696_v54, %v3738_v34  ;;  %3466 = vmatprep.subr.bf16.mxu1 %v3899_v41  ;;  %v1744_v18 = vsel %vm740_vm1, %v4786_v35, %v3747_v40  ;;  %v4790_v54 = vld [vmem:[#allocation2 + $0xc2] sm:$0xff]  ;;  %v1712_v42 = vsel %vm740_vm1, %v975_v13, %v3748_v49 }
 0x1b4   : > { %v3751_v11 = vpop.permute.xlu0 %3750  ;;  %v3741_v58 = vpop.permute.xlu1 %3740  ;;  %2072 = vmatprep.mubr.f32.mxu1 %v1677_v51  ;;  %v4820_v59 = vld [vmem:[#allocation2 + $0x128] sm:$0xff] }
 0x1b5   : > { %v3752_v1 = vunpack.i.l.bf16 %v3751_v11  ;;  %v3743_v33 = vunpack.i.h.bf16 %v3741_v58  ;;  %v3742_v8 = vunpack.i.l.bf16 %v3741_v58  ;;  %2073 = vmatmul.mubr.f32.gmra.mrb[30].mxu1 %v1645_v15  ;;  %2308 = vmatmul.mubr.f32.gmra.mrb[66].mxu0 %v1711_v0  ;;  %v3753_v61 = vunpack.i.h.bf16 %v3751_v11  ;;  %v4824_v49 = vld [vmem:[#allocation2 + $0xe2] sm:$0xff]  ;;  %v978_v58 = vld [vmem:[#allocation2 + $0x111] sm:$0xff] }
 0x1b6   : > { %2312 = vmatprep.mubr.f32.mxu0 %v1744_v18  ;;  %3482 = vmatpush1.bf16.msra.mxu1 %v4355_v31 }
 0x1b7   : > { %v1678_v41 = vsel %vm740_vm1, %v4790_v54, %v3742_v8  ;;  %v1646_v57 = vsel %vm740_vm1, %v4708_v55, %v3743_v33  ;;  %v1745_v31 = vsel %vm740_vm1, %v4798_v7, %v3752_v1  ;;  %v1713_v23 = vsel %vm740_vm1, %v976_v19, %v3753_v61  ;;  %v4831_v8 = vld [vmem:[#allocation2 + $0xf2] sm:$0xff]  ;;  %v4839_v61 = vld [vmem:[#allocation2 + $0xfa] sm:$0xff] }
 0x1b8   : > { %v3766_v4 = vpop.permute.xlu0 %3765  ;;  %v3756_v6 = vpop.permute.xlu1 %3755  ;;  %2077 = vmatprep.mubr.f32.mxu1 %v1678_v41 }
 0x1b9   : > { %v3767_v43 = vunpack.i.l.bf16 %v3766_v4  ;;  %v3758_v22 = vunpack.i.h.bf16 %v3756_v6  ;;  %v3757_v12 = vunpack.i.l.bf16 %v3756_v6  ;;  %2078 = vmatmul.mubr.f32.gmra.mrb[32].mxu1 %v1646_v57  ;;  %2313 = vmatmul.mubr.f32.gmra.mrb[68].mxu0 %v1712_v42  ;;  %v3768_v20 = vunpack.i.h.bf16 %v3766_v4 }
 0x1ba   : > { %2317 = vmatprep.mubr.f32.mxu0 %v1745_v31 }
 0x1bb   : > { %v1679_v55 = vsel %vm740_vm1, %v4802_v21, %v3757_v12  ;;  %v1647_v63 = vsel %vm740_vm1, %v4721_v44, %v3758_v22  ;;  %v1746_v30 = vsel %vm740_vm1, %v4809_v26, %v3767_v43  ;;  %v1714_v34 = vsel %vm740_vm1, %v977_v62, %v3768_v20  ;;  %v920_v62 = vld [vmem:[#allocation2 + $0x142] sm:$0xff] }
 0x1bc   : > { %v3771_v36 = vpop.permute.xlu0 %3770  ;;  %v3761_v24 = vpop.permute.xlu1 %3760  ;;  %2082 = vmatprep.mubr.f32.mxu1 %v1679_v55 }
 0x1bd   : > { %v3772_v50 = vunpack.i.l.bf16 %v3771_v36  ;;  %v3763_v25 = vunpack.i.h.bf16 %v3761_v24  ;;  %v3762_v52 = vunpack.i.l.bf16 %v3761_v24  ;;  %2083 = vmatmul.mubr.f32.gmra.mrb[34].mxu1 %v1647_v63  ;;  %2318 = vmatmul.mubr.f32.gmra.mrb[70].mxu0 %v1713_v23  ;;  %v3773_v37 = vunpack.i.h.bf16 %v3771_v36 }
 0x1be   : > { %2322 = vmatprep.mubr.f32.mxu0 %v1746_v30 }
 0x1bf   : > { %v1680_v44 = vsel %vm740_vm1, %v4813_v32, %v3762_v52  ;;  %v1648_v5 = vsel %vm740_vm1, %v4734_v27, %v3763_v25  ;;  %v1747_v53 = vsel %vm740_vm1, %v4820_v59, %v3772_v50  ;;  %v1715_v33 = vsel %vm740_vm1, %v978_v58, %v3773_v37 }
 0x1c0   : > { %v3781_v56 = vpop.permute.xlu0 %3780  ;;  %v3776_v40 = vpop.permute.xlu1 %3775  ;;  %2087 = vmatprep.mubr.f32.mxu1 %v1680_v44  ;;  %v855_v44 = vld [vmem:[#allocation2 + $0x138] sm:$0xff] }
 0x1c1   : > { %v3782_v46 = vunpack.i.l.bf16 %v3781_v56  ;;  %v3778_v51 = vunpack.i.h.bf16 %v3776_v40  ;;  %v3777_v15 = vunpack.i.l.bf16 %v3776_v40  ;;  %2088 = vmatmul.mubr.f32.gmra.mrb[36].mxu1 %v1648_v5  ;;  %2323 = vmatmul.mubr.f32.gmra.mrb[72].mxu0 %v1714_v34  ;;  %v3783_v0 = vunpack.i.h.bf16 %v3781_v56  ;;  %v856_v40 = vld [vmem:[#allocation2 + $0x140] sm:$0xff] }
 0x1c2   : > { %2327 = vmatprep.mubr.f32.mxu0 %v1747_v53 }
 0x1c3   : > { %v1681_v27 = vsel %vm740_vm1, %v4824_v49, %v3777_v15  ;;  %v1649_v11 = vsel %vm740_vm1, %v4747_v17, %v3778_v51  ;;  %v1682_v41 = vsel %vm740_vm1, %v4831_v8, %v3782_v46  ;;  %v1650_v13 = vsel %vm740_vm1, %v4760_v10, %v3783_v0  ;;  %v4849_v10 = vld [vmem:[#allocation2 + $0x10a] sm:$0xff]  ;;  %v858_v0 = vld [vmem:[#allocation2 + $0x158] sm:$0xff] }
 0x1c4   : > { %v3786_v1 = vpop.permute.xlu1 %3785  ;;  %2092 = vmatprep.mubr.f32.mxu1 %v1681_v27  ;;  %v3791_v57 = vpop.permute.xlu0 %3790  ;;  %v857_v15 = vld [vmem:[#allocation2 + $0x150] sm:$0xff]  ;;  %v922_v27 = vld [vmem:[#allocation2 + $0x15a] sm:$0xff] }
 0x1c5   : > { %v3787_v18 = vunpack.i.l.bf16 %v3786_v1  ;;  %2093 = vmatmul.mubr.f32.gmra.mrb[38].mxu1 %v1649_v11  ;;  %2328 = vmatmul.mubr.f32.gmra.mrb[74].mxu0 %v1715_v33  ;;  %v3788_v17 = vunpack.i.h.bf16 %v3786_v1  ;;  %v3792_v4 = vunpack.i.l.bf16 %v3791_v57 }
 0x1c6   : > { %2097 = vmatprep.mubr.f32.mxu1 %v1682_v41  ;;  %3235 = vmatprep.mubr.msk.f32.mxu0 %vm740_vm1, %v4640_v16  ;;  %v3793_v16 = vunpack.i.h.bf16 %v3791_v57 }
 0x1c7   : > { %v1683_v6 = vsel %vm740_vm1, %v4839_v61, %v3787_v18  ;;  %v1651_v43 = vsel %vm740_vm1, %v4773_v29, %v3788_v17  ;;  %v4859_v29 = vld [vmem:[#allocation2 + $0x112] sm:$0xff]  ;;  %v859_v17 = vld [vmem:[#allocation2 + $0x168] sm:$0xff] }
 0x1c8   : > { %v3796_v42 = vpop.permute.xlu1 %3795  ;;  %v3801_v12 = vpop.permute.xlu0 %3800  ;;  %v1652_v31 = vsel %vm740_vm1, %v4786_v35, %v3793_v16  ;;  %v4869_v35 = vld [vmem:[#allocation2 + $0x122] sm:$0xff] }
 0x1c9   : > { %2098 = vmatmul.mubr.f32.gmra.mrb[40].mxu1 %v1650_v13  ;;  %3236 = vmatmul.mubr.msk.f32.vlgmr.msra.gmra.mrb[76].mxu0 %vm740_vm1, %v4652_v3  ;;  %v3797_v22 = vunpack.i.l.bf16 %v3796_v42  ;;  %v1684_v3 = vsel %vm740_vm1, %v4849_v10, %v3792_v4  ;;  %v3802_v55 = vunpack.i.l.bf16 %v3801_v12  ;;  %v924_v4 = vld [vmem:[#allocation2 + $0x172] sm:$0xff] }
 0x1ca   : > { %2102 = vmatprep.mubr.f32.mxu1 %v1683_v6  ;;  %3238 = vmatprep.mubr.msk.f32.mxu0 %vm740_vm1, %v4664_v2  ;;  %v3798_v2 = vunpack.i.h.bf16 %v3796_v42 }
 0x1cc   : > { %v3806_v63 = vpop.permute.xlu1 %3805  ;;  %v1653_v19 = vsel %vm740_vm1, %v4798_v7, %v3798_v2  ;;  %v3811_v36 = vpop.permute.xlu0 %3810  ;;  %v4879_v7 = vld [vmem:[#allocation2 + $0x12a] sm:$0xff] }
 0x1cd   : > { %2103 = vmatmul.mubr.f32.gmra.mrb[42].mxu1 %v1651_v43  ;;  %3239 = vmatmul.mubr.msk.f32.gmra.mrb[78].mxu0 %vm740_vm1, %v4676_v28  ;;  %v1685_v28 = vsel %vm740_vm1, %v4859_v29, %v3797_v22  ;;  %v3807_v20 = vunpack.i.l.bf16 %v3806_v63  ;;  %v3812_v23 = vunpack.i.l.bf16 %v3811_v36  ;;  %v860_v43 = vld [vmem:[#allocation2 + $0x170] sm:$0xff] }
 0x1ce   : > { %2107 = vmatprep.mubr.f32.mxu1 %v1684_v3  ;;  %3241 = vmatprep.mubr.msk.f32.mxu0 %vm740_vm1, %v4688_v60  ;;  %v3803_v60 = vunpack.i.h.bf16 %v3801_v12 }
 0x1d0   : > { %v1654_v24 = vsel %vm740_vm1, %v4809_v26, %v3803_v60  ;;  %v3816_v50 = vpop.permute.xlu1 %3815  ;;  %v919_v26 = vld [vmem:[#allocation2 + $0x13a] sm:$0xff]  ;;  %v3821_v30 = vpop.permute.xlu0 %3820 }
 0x1d1   : > { %2108 = vmatmul.mubr.f32.gmra.mrb[44].mxu1 %v1652_v31  ;;  %3242 = vmatmul.mubr.msk.f32.gmra.mrb[80].mxu0 %vm740_vm1, %v4700_v39  ;;  %v1686_v39 = vsel %vm740_vm1, %v4869_v35, %v3802_v55  ;;  %v3817_v52 = vunpack.i.l.bf16 %v3816_v50  ;;  %v3818_v5 = vunpack.i.h.bf16 %v3816_v50  ;;  %v3822_v37 = vunpack.i.l.bf16 %v3821_v30  ;;  %v979_v31 = vld [vmem:[#allocation2 + $0x121] sm:$0xff] }
 0x1d2   : > { %2112 = vmatprep.mubr.f32.mxu1 %v1685_v28  ;;  %3244 = vmatprep.mubr.msk.f32.mxu0 %vm740_vm1, %v4712_v45  ;;  %v3808_v45 = vunpack.i.h.bf16 %v3806_v63  ;;  %v3823_v34 = vunpack.i.h.bf16 %v3821_v30  ;;  %v982_v30 = vld [vmem:[#allocation2 + $0x141] sm:$0xff] }
 0x1d3   : > { %v1689_v56 = vsel %vm740_vm1, %v920_v62, %v3817_v52 }
 0x1d4   : > { %v1655_v25 = vsel %vm740_vm1, %v4820_v59, %v3808_v45  ;;  %v921_v59 = vld [vmem:[#allocation2 + $0x152] sm:$0xff]  ;;  %v1114_v45 = vld [vmem:[#allocation2 + $0x182] sm:$0xff] }
 0x1d5   : > { %2113 = vmatmul.mubr.f32.gmra.mrb[46].mxu1 %v1653_v19  ;;  %3245 = vmatmul.mubr.msk.f32.gmra.mrb[82].mxu0 %vm740_vm1, %v4725_v38  ;;  %v1687_v38 = vsel %vm740_vm1, %v4879_v7, %v3807_v20  ;;  %v1690_v51 = vsel %vm740_vm1, %v921_v59, %v3822_v37  ;;  %v980_v19 = vld [vmem:[#allocation2 + $0x129] sm:$0xff] }
 0x1d6   : > { %2117 = vmatprep.mubr.f32.mxu1 %v1686_v39  ;;  %3247 = vmatprep.mubr.msk.f32.mxu0 %vm740_vm1, %v4738_v48  ;;  %v3813_v48 = vunpack.i.h.bf16 %v3811_v36 }
 0x1d9   : > { %2118 = vmatmul.mubr.f32.gmra.mrb[48].mxu1 %v1654_v24  ;;  %3248 = vmatmul.mubr.msk.f32.gmra.mrb[84].mxu0 %vm740_vm1, %v4751_v14  ;;  %v1688_v14 = vsel %vm740_vm1, %v919_v26, %v3812_v23  ;;  %v1116_v23 = vld [vmem:[#allocation2 + $0x19a] sm:$0xff] }
 0x1da   : > { %2122 = vmatprep.mubr.f32.mxu1 %v1687_v38  ;;  %3250 = vmatprep.mubr.msk.f32.mxu0 %vm740_vm1, %v4764_v9  ;;  %v1656_v9 = vsel %vm740_vm1, %v855_v44, %v3813_v48  ;;  %v1115_v48 = vld [vmem:[#allocation2 + $0x18a] sm:$0xff] }
 0x1dd   : > { %2123 = vmatmul.mubr.f32.gmra.mrb[50].mxu1 %v1655_v25  ;;  %3251 = vmatmul.mubr.msk.f32.gmra.mrb[86].mxu0 %vm740_vm1, %v4777_v47  ;;  %v3826_v47 = vpop.permute.xlu1 %3825 }
 0x1de   : > { %2127 = vmatprep.mubr.f32.mxu1 %v1688_v14  ;;  %3253 = vmatprep.mubr.msk.f32.mxu0 %vm740_vm1, %v4790_v54  ;;  %v1657_v54 = vsel %vm740_vm1, %v856_v40, %v3818_v5  ;;  %v3827_v46 = vunpack.i.l.bf16 %v3826_v47  ;;  %v3828_v53 = vunpack.i.h.bf16 %v3826_v47  ;;  %v1117_v14 = vld [vmem:[#allocation2 + $0x1a2] sm:$0xff] }
 0x1e0   : > { %v1691_v58 = vsel %vm740_vm1, %v922_v27, %v3827_v46  ;;  %v1659_v33 = vsel %vm740_vm1, %v858_v0, %v3828_v53  ;;  %v984_v46 = vld [vmem:[#allocation2 + $0x159] sm:$0xff] }
 0x1e1   : > { %2128 = vmatmul.mubr.f32.gmra.mrb[52].mxu1 %v1656_v9  ;;  %3254 = vmatmul.mubr.msk.f32.gmra.mrb[88].mxu0 %vm740_vm1, %v4802_v21  ;;  %v3831_v21 = vpop.permute.xlu0 %3830 }
 0x1e2   : > { %2132 = vmatprep.mubr.f32.mxu1 %v1689_v56  ;;  %3256 = vmatprep.mubr.msk.f32.mxu0 %vm740_vm1, %v4813_v32  ;;  %v1658_v32 = vsel %vm740_vm1, %v857_v15, %v3823_v34  ;;  %v3832_v11 = vunpack.i.l.bf16 %v3831_v21  ;;  %v3833_v1 = vunpack.i.h.bf16 %v3831_v21  ;;  %v983_v56 = vld [vmem:[#allocation2 + $0x151] sm:$0xff] }
 0x1e5   : > { %2133 = vmatmul.mubr.f32.gmra.mrb[54].mxu1 %v1657_v54  ;;  %3257 = vmatmul.mubr.msk.f32.gmra.mrb[90].mxu0 %vm740_vm1, %v4824_v49  ;;  %v3836_v49 = vpop.permute.xlu1 %3835  ;;  %v3841_v57 = vpop.permute.xlu0 %3840 }
 0x1e6   : > { %2137 = vmatprep.mubr.f32.mxu1 %v1690_v51  ;;  %3259 = vmatprep.mubr.msk.f32.mxu0 %vm740_vm1, %v4831_v8  ;;  %v923_v8 = vld [vmem:[#allocation2 + $0x16a] sm:$0xff]  ;;  %v3837_v18 = vunpack.i.l.bf16 %v3836_v49  ;;  %v3838_v13 = vunpack.i.h.bf16 %v3836_v49  ;;  %v3842_v6 = vunpack.i.l.bf16 %v3841_v57 }
 0x1e7   : > { %v1692_v41 = vsel %vm740_vm1, %v923_v8, %v3832_v11 }
 0x1e8   : > { %v1693_v42 = vsel %vm740_vm1, %v924_v4, %v3837_v18  ;;  %v1661_v22 = vsel %vm740_vm1, %v860_v43, %v3838_v13  ;;  %v1748_v12 = vsel %vm740_vm1, %v855_v44, %v3842_v6  ;;  %v1052_v18 = vld [vmem:[#allocation2 + $0x198] sm:$0xff]  ;;  %v987_v6 = vld [vmem:[#allocation2 + $0x181] sm:$0xff] }
 0x1e9   : > { %2138 = vmatmul.mubr.f32.gmra.mrb[56].mxu1 %v1658_v32  ;;  %3260 = vmatmul.mubr.msk.f32.gmra.mrb[92].mxu0 %vm740_vm1, %v4839_v61  ;;  %v1660_v61 = vsel %vm740_vm1, %v859_v17, %v3833_v1  ;;  %v3846_v16 = vpop.permute.xlu1 %3845  ;;  %v3851_v2 = vpop.permute.xlu0 %3850 }
 0x1ea   : > { %2142 = vmatprep.mubr.f32.mxu1 %v1691_v58  ;;  %3262 = vmatprep.mubr.msk.f32.mxu0 %vm740_vm1, %v4849_v10  ;;  %v3843_v10 = vunpack.i.h.bf16 %v3841_v57  ;;  %v3847_v3 = vunpack.i.l.bf16 %v3846_v16  ;;  %v3852_v28 = vunpack.i.l.bf16 %v3851_v2 }
 0x1ec   : > { %v1716_v55 = vsel %vm740_vm1, %v979_v31, %v3843_v10  ;;  %v1749_v63 = vsel %vm740_vm1, %v856_v40, %v3847_v3  ;;  %v1750_v36 = vsel %vm740_vm1, %v857_v15, %v3852_v28  ;;  %v1050_v15 = vld [vmem:[#allocation2 + $0x180] sm:$0xff]  ;;  %v988_v10 = vld [vmem:[#allocation2 + $0x189] sm:$0xff] }
 0x1ed   : > { %2143 = vmatmul.mubr.f32.gmra.mrb[58].mxu1 %v1659_v33  ;;  %3263 = vmatmul.mubr.msk.f32.gmra.mrb[94].mxu0 %vm740_vm1, %v4859_v29  ;;  %v3848_v29 = vunpack.i.h.bf16 %v3846_v16  ;;  %v3856_v60 = vpop.permute.xlu1 %3855  ;;  %v3861_v24 = vpop.permute.xlu0 %3860 }
 0x1ee   : > { %2147 = vmatprep.mubr.f32.mxu1 %v1692_v41  ;;  %3265 = vmatprep.mubr.msk.f32.mxu0 %vm740_vm1, %v4869_v35  ;;  %v3853_v35 = vunpack.i.h.bf16 %v3851_v2  ;;  %v3857_v39 = vunpack.i.l.bf16 %v3856_v60  ;;  %v3858_v38 = vunpack.i.h.bf16 %v3856_v60  ;;  %v3862_v25 = vunpack.i.l.bf16 %v3861_v24  ;;  %v986_v41 = vld [vmem:[#allocation2 + $0x171] sm:$0xff] }
 0x1ef   : > { %v1717_v20 = vsel %vm740_vm1, %v980_v19, %v3848_v29  ;;  %v3863_v44 = vunpack.i.h.bf16 %v3861_v24  ;;  %v4956_v29 = vld [vmem:[%s5189_s4] ss:$0 sm:$0xff] }
 0x1f0   : > { %v1719_v5 = vsel %vm740_vm1, %v982_v30, %v3858_v38 }
 0x1f1   : > { %2148 = vmatmul.mubr.f32.gmra.mrb[60].mxu1 %v1660_v61  ;;  %3266 = vmatmul.mubr.msk.f32.gmra.mrb[96].mxu0 %vm740_vm1, %v4879_v7  ;;  %v981_v7 = vld [vmem:[#allocation2 + $0x139] sm:$0xff]  ;;  %v3866_v52 = vpop.permute.xlu1 %3865  ;;  %v3871_v37 = vpop.permute.xlu0 %3870  ;;  %v1720_v40 = vsel %vm740_vm1, %v983_v56, %v3863_v44 }
 0x1f2   : > { %2152 = vmatprep.mubr.f32.mxu1 %v1693_v42  ;;  %3268 = vmatprep.mubr.msk.f32.mxu0 %vm740_vm1, %v919_v26  ;;  %v1718_v50 = vsel %vm740_vm1, %v981_v7, %v3853_v35  ;;  %v1751_v26 = vsel %vm740_vm1, %v858_v0, %v3857_v39  ;;  %v3867_v9 = vunpack.i.l.bf16 %v3866_v52  ;;  %v3868_v47 = vunpack.i.h.bf16 %v3866_v52  ;;  %v1051_v0 = vld [vmem:[#allocation2 + $0x188] sm:$0xff] }
 0x1f3   : > { %v3872_v34 = vunpack.i.l.bf16 %v3871_v37  ;;  %v3873_v51 = vunpack.i.h.bf16 %v3871_v37 }
 0x1f4   : > { %v1753_v54 = vsel %vm740_vm1, %v860_v43, %v3867_v9  ;;  %v1721_v21 = vsel %vm740_vm1, %v984_v46, %v3868_v47 }
 0x1f5   : > { %2153 = vmatmul.mubr.f32.gmra.mrb[62].mxu1 %v1661_v22  ;;  %3269 = vmatmul.mubr.msk.f32.gmra.mrb[98].mxu0 %vm740_vm1, %v920_v62  ;;  %v1752_v62 = vsel %vm740_vm1, %v859_v17, %v3862_v25  ;;  %v1754_v32 = vsel %vm740_vm1, %v1050_v15, %v3872_v34  ;;  %v3881_v11 = vpop.permute.xlu0 %3880 }
 0x1f6   : > { %2332 = vmatprep.mubr.f32.mxu1 %v1748_v12  ;;  %3271 = vmatprep.mubr.msk.f32.mxu0 %vm740_vm1, %v921_v59  ;;  %v3876_v59 = vpop.permute.xlu1 %3875  ;;  %v3882_v1 = vunpack.i.l.bf16 %v3881_v11  ;;  %v3883_v57 = vunpack.i.h.bf16 %v3881_v11 }
 0x1f7   : > { %v3877_v53 = vunpack.i.l.bf16 %v3876_v59  ;;  %v3878_v58 = vunpack.i.h.bf16 %v3876_v59 }
 0x1f8   : > { %v1756_v61 = vsel %vm740_vm1, %v1052_v18, %v3882_v1  ;;  %v1724_v16 = vsel %vm740_vm1, %v987_v6, %v3883_v57 }
 0x1f9   : > { %2333 = vmatmul.mubr.f32.vlgmr.msra.gmra.mrb[44].mxu1 %v1716_v55  ;;  %3272 = vmatmul.mubr.msk.f32.gmra.mrb[100].mxu0 %vm740_vm1, %v922_v27  ;;  %v985_v27 = vld [vmem:[#allocation2 + $0x169] sm:$0xff]  ;;  %v1755_v33 = vsel %vm740_vm1, %v1051_v0, %v3877_v53  ;;  %v1723_v17 = vsel %vm740_vm1, %v986_v41, %v3878_v58 }
 0x1fa   : > { %2337 = vmatprep.mubr.f32.mxu1 %v1749_v63  ;;  %3274 = vmatprep.mubr.msk.f32.mxu0 %vm740_vm1, %v923_v8  ;;  %v1722_v49 = vsel %vm740_vm1, %v985_v27, %v3873_v51  ;;  %v3886_v8 = vpop.permute.xlu1 %3885 }
 0x1fb   : > { %v3887_v13 = vunpack.i.l.bf16 %v3886_v8  ;;  %v3888_v42 = vunpack.i.h.bf16 %v3886_v8 }
 0x1fd   : > { %2338 = vmatmul.mubr.f32.gmra.mrb[46].mxu1 %v1717_v20  ;;  %3275 = vmatmul.mubr.msk.f32.gmra.mrb[102].mxu0 %vm740_vm1, %v924_v4  ;;  %v1053_v4 = vld [vmem:[#allocation2 + $0x1a0] sm:$0xff]  ;;  %v1725_v22 = vsel %vm740_vm1, %v988_v10, %v3888_v42 }
 0x1fe   : > { %2342 = vmatprep.mubr.f32.mxu1 %v1750_v36  ;;  %3277 = vmatprep.mubr.msk.f32.mxu0 %vm740_vm1, %v1114_v45  ;;  %v1757_v43 = vsel %vm740_vm1, %v1053_v4, %v3887_v13 }
 0x201   : > { %2343 = vmatmul.mubr.f32.gmra.mrb[48].mxu1 %v1718_v50  ;;  %3278 = vmatmul.mubr.msk.f32.gmra.mrb[104].mxu0 %vm740_vm1, %v1115_v48 }
 0x202   : > { %2347 = vmatprep.mubr.f32.mxu1 %v1751_v26  ;;  %3280 = vmatprep.mubr.msk.f32.mxu0 %vm740_vm1, %v1116_v23 }
 0x205   : > { %2348 = vmatmul.mubr.f32.gmra.mrb[50].mxu1 %v1719_v5  ;;  %3281 = vmatmul.mubr.msk.f32.gmra.mrb[106].mxu0 %vm740_vm1, %v1117_v14 }
 0x206   : > { %2352 = vmatprep.mubr.f32.mxu1 %v1752_v62 }
 0x209   : > { %2353 = vmatmul.mubr.f32.gmra.mrb[52].mxu1 %v1720_v40 }
 0x20a   : > { %2357 = vmatprep.mubr.f32.mxu1 %v1753_v54 }
 0x20d   : > { %2358 = vmatmul.mubr.f32.gmra.mrb[54].mxu1 %v1721_v21 }
 0x20e   : > { %2362 = vmatprep.mubr.f32.mxu1 %v1754_v32 }
 0x211   : > { %2363 = vmatmul.mubr.f32.gmra.mrb[56].mxu1 %v1722_v49 }
 0x212   : > { %2367 = vmatprep.mubr.f32.mxu1 %v1755_v33 }
 0x215   : > { %2368 = vmatmul.mubr.f32.gmra.mrb[58].mxu1 %v1723_v17 }
 0x216   : > { %2372 = vmatprep.mubr.f32.mxu1 %v1756_v61 }
 0x219   : > { %2373 = vmatmul.mubr.f32.gmra.mrb[60].mxu1 %v1724_v16 }
 0x21a   : > { %2377 = vmatprep.mubr.f32.mxu1 %v1757_v43 }
 0x21d   : > { %2378 = vmatmul.mubr.f32.gmra.mrb[62].mxu1 %v1725_v22 }
 0x244   : > { %v2224_v3 = vpop.f32.mrb[32].mxu0 }
 0x245   : > { %v2226_v12 = vpop.f32.mrb[33].mxu0 }
 0x248   : > { %v2229_v2 = vpop.f32.mrb[34].mxu0 }
 0x249   : > { %v2231_v31 = vpop.f32.mrb[35].mxu0 }
 0x24c   : > { %v1999_v55 = vpop.f32.mrb[0].mxu1  ;;  %v2234_v28 = vpop.f32.mrb[36].mxu0 }
 0x24d   : > { %v2000_v63 = vadd.f32 %v4956_v29, %v1999_v55  ;;  %v2001_v60 = vpop.f32.mrb[1].mxu1  ;;  %v2236_v19 = vpop.f32.mrb[37].mxu0 }
 0x24f   : > { %v4959_v35 = vadd.f32 %v2224_v3, %v2000_v63 }
 0x250   : > { %v2004_v20 = vpop.f32.mrb[2].mxu1  ;;  %v2239_v39 = vpop.f32.mrb[38].mxu0 }
 0x251   : > { %v2005_v36 = vadd.f32 %v4956_v29, %v2004_v20  ;;  %v2006_v45 = vpop.f32.mrb[3].mxu1  ;;  %v2241_v24 = vpop.f32.mrb[39].mxu0 }
 0x253   : > { %v4962_v7 = vadd.f32 %v2229_v2, %v2005_v36 }
 0x254   : > { %v2009_v23 = vpop.f32.mrb[4].mxu1  ;;  %v2244_v38 = vpop.f32.mrb[40].mxu0 }
 0x255   : > { %v2010_v50 = vadd.f32 %v4956_v29, %v2009_v23  ;;  %v2011_v48 = vpop.f32.mrb[5].mxu1  ;;  %v2246_v25 = vpop.f32.mrb[41].mxu0 }
 0x256   : > { %v4998_v25 = vld [vmem:[%s5190_s5] sm:$0x7] }
 0x257   : > { %v4965_v26 = vadd.f32 %v2234_v28, %v2010_v50  ;;  %3161 = vmatprep.mubr.msk.f32.mxu0 %vm740_vm1, %v4998_v25 }
 0x258   : > { %v2014_v52 = vpop.f32.mrb[6].mxu1  ;;  %v2249_v14 = vpop.f32.mrb[42].mxu0 }
 0x259   : > { %v2015_v30 = vadd.f32 %v4956_v29, %v2014_v52  ;;  %v2016_v44 = vpop.f32.mrb[7].mxu1  ;;  %v2251_v5 = vpop.f32.mrb[43].mxu0 }
 0x25b   : > { %v4968_v9 = vadd.f32 %v2239_v39, %v2015_v30 }
 0x25c   : > { %v2019_v62 = vpop.f32.mrb[8].mxu1  ;;  %v2254_v37 = vpop.f32.mrb[44].mxu0 }
 0x25d   : > { %v2020_v56 = vadd.f32 %v4956_v29, %v2019_v62  ;;  %v2021_v47 = vpop.f32.mrb[9].mxu1  ;;  %v2256_v40 = vpop.f32.mrb[45].mxu0 }
 0x25f   : > { %v4971_v34 = vadd.f32 %v2244_v38, %v2020_v56 }
 0x260   : > { %v2024_v54 = vpop.f32.mrb[10].mxu1  ;;  %v2259_v59 = vpop.f32.mrb[46].mxu0 }
 0x261   : > { %v2025_v46 = vadd.f32 %v4956_v29, %v2024_v54  ;;  %v2026_v51 = vpop.f32.mrb[11].mxu1  ;;  %v2261_v21 = vpop.f32.mrb[47].mxu0 }
 0x262   : > { %v3901_v51 = vmov 0  }
 0x263   : > { %v4974_v15 = vadd.f32 %v2249_v14, %v2025_v46  ;;  %v2705_v46 = vld [vmem:[%s5191_s6] sm:$0x7]  ;;  %3889 = vset.pattern.permute.xlu0 %v3901_v51 }
 0x264   : > { %v2029_v53 = vpop.f32.mrb[12].mxu1  ;;  %v2264_v32 = vpop.f32.mrb[48].mxu0  ;;  %2708 = vperm.xlu0 %3889, %v2705_v46  }
 0x265   : > { %v2030_v27 = vadd.f32 %v4956_v29, %v2029_v53  ;;  %v2031_v11 = vpop.f32.mrb[13].mxu1  ;;  %v2266_v58 = vpop.f32.mrb[49].mxu0 }
 0x267   : > { %v4977_v49 = vadd.f32 %v2254_v37, %v2030_v27 }
 0x268   : > { %v2034_v0 = vpop.f32.mrb[14].mxu1  ;;  %v2269_v1 = vpop.f32.mrb[50].mxu0 }
 0x269   : > { %v2035_v33 = vadd.f32 %v4956_v29, %v2034_v0  ;;  %v2036_v8 = vpop.f32.mrb[15].mxu1  ;;  %v2271_v18 = vpop.f32.mrb[51].mxu0 }
 0x26b   : > { %v4980_v41 = vadd.f32 %v2259_v59, %v2035_v33 }
 0x26c   : > { %v2039_v57 = vpop.f32.mrb[16].mxu1  ;;  %v2274_v17 = vpop.f32.mrb[52].mxu0 }
 0x26d   : > { %v2040_v13 = vadd.f32 %v4956_v29, %v2039_v57  ;;  %v2041_v61 = vpop.f32.mrb[17].mxu1  ;;  %v2276_v4 = vpop.f32.mrb[53].mxu0 }
 0x26f   : > { %v4983_v6 = vadd.f32 %v2264_v32, %v2040_v13 }
 0x270   : > { %v2044_v42 = vpop.f32.mrb[18].mxu1  ;;  %v2279_v16 = vpop.f32.mrb[54].mxu0 }
 0x271   : > { %v2045_v43 = vadd.f32 %v4956_v29, %v2044_v42  ;;  %v2046_v10 = vpop.f32.mrb[19].mxu1  ;;  %v2281_v22 = vpop.f32.mrb[55].mxu0 }
 0x273   : > { %v4986_v3 = vadd.f32 %v2269_v1, %v2045_v43 }
 0x274   : > { %v2049_v12 = vpop.f32.mrb[20].mxu1  ;;  %v2284_v2 = vpop.f32.mrb[56].mxu0 }
 0x275   : > { %v2050_v31 = vadd.f32 %v4956_v29, %v2049_v12  ;;  %v2051_v55 = vpop.f32.mrb[21].mxu1  ;;  %v2286_v28 = vpop.f32.mrb[57].mxu0 }
 0x277   : > { %v4989_v63 = vadd.f32 %v2274_v17, %v2050_v31 }
 0x278   : > { %v2054_v60 = vpop.f32.mrb[22].mxu1  ;;  %v2289_v19 = vpop.f32.mrb[58].mxu0 }
 0x279   : > { %v2055_v20 = vadd.f32 %v4956_v29, %v2054_v60  ;;  %v2056_v39 = vpop.f32.mrb[23].mxu1  ;;  %v2291_v36 = vpop.f32.mrb[59].mxu0 }
 0x27b   : > { %v4992_v45 = vadd.f32 %v2279_v16, %v2055_v20 }
 0x27c   : > { %v2059_v24 = vpop.f32.mrb[24].mxu1  ;;  %v2294_v23 = vpop.f32.mrb[60].mxu0 }
 0x27d   : > { %v2060_v38 = vadd.f32 %v4956_v29, %v2059_v24  ;;  %v2061_v50 = vpop.f32.mrb[25].mxu1  ;;  %v2296_v48 = vpop.f32.mrb[61].mxu0 }
 0x27f   : > { %v5000_v52 = vadd.f32 %v2284_v2, %v2060_v38 }
 0x280   : > { %v2064_v14 = vpop.f32.mrb[26].mxu1  ;;  %v2299_v30 = vpop.f32.mrb[62].mxu0 }
 0x281   : > { %v2065_v44 = vadd.f32 %v4956_v29, %v2064_v14  ;;  %v2066_v5 = vpop.f32.mrb[27].mxu1  ;;  %v2301_v62 = vpop.f32.mrb[63].mxu0 }
 0x283   : > { %v5005_v37 = vadd.f32 %v2289_v19, %v2065_v44 }
 0x284   : > { %v2069_v56 = vpop.f32.mrb[28].mxu1  ;;  %v2304_v47 = vpop.f32.mrb[64].mxu0 }
 0x285   : > { %v2070_v40 = vadd.f32 %v4956_v29, %v2069_v56  ;;  %v2071_v54 = vpop.f32.mrb[29].mxu1  ;;  %v2306_v59 = vpop.f32.mrb[65].mxu0 }
 0x287   : > { %v5011_v21 = vadd.f32 %v2294_v23, %v2070_v40 }
 0x288   : > { %v2074_v53 = vpop.f32.mrb[30].mxu1  ;;  %v2309_v32 = vpop.f32.mrb[66].mxu0 }
 0x289   : > { %v2075_v27 = vadd.f32 %v4956_v29, %v2074_v53  ;;  %v2076_v11 = vpop.f32.mrb[31].mxu1  ;;  %v2311_v58 = vpop.f32.mrb[67].mxu0 }
 0x28b   : > { %v5014_v0 = vadd.f32 %v2299_v30, %v2075_v27 }
 0x28c   : > { %v2079_v1 = vpop.f32.mrb[32].mxu1  ;;  %v2314_v33 = vpop.f32.mrb[68].mxu0 }
 0x28d   : > { %v2080_v8 = vadd.f32 %v4956_v29, %v2079_v1  ;;  %v2081_v18 = vpop.f32.mrb[33].mxu1  ;;  %v2316_v57 = vpop.f32.mrb[69].mxu0 }
 0x28f   : > { %v5017_v17 = vadd.f32 %v2304_v47, %v2080_v8 }
 0x290   : > { %v2084_v13 = vpop.f32.mrb[34].mxu1  ;;  %v2319_v61 = vpop.f32.mrb[70].mxu0 }
 0x291   : > { %v2085_v4 = vadd.f32 %v4956_v29, %v2084_v13  ;;  %v2086_v42 = vpop.f32.mrb[35].mxu1  ;;  %v2321_v16 = vpop.f32.mrb[71].mxu0 }
 0x293   : > { %v5020_v43 = vadd.f32 %v2309_v32, %v2085_v4 }
 0x294   : > { %v2089_v10 = vpop.f32.mrb[36].mxu1  ;;  %v2324_v22 = vpop.f32.mrb[72].mxu0 }
 0x295   : > { %v2090_v12 = vadd.f32 %v4956_v29, %v2089_v10  ;;  %v2091_v2 = vpop.f32.mrb[37].mxu1  ;;  %v2326_v31 = vpop.f32.mrb[73].mxu0 }
 0x297   : > { %v5023_v55 = vadd.f32 %v2314_v33, %v2090_v12 }
 0x298   : > { %v2094_v28 = vpop.f32.mrb[38].mxu1  ;;  %v2329_v60 = vpop.f32.mrb[74].mxu0 }
 0x299   : > { %v2095_v19 = vadd.f32 %v4956_v29, %v2094_v28  ;;  %v2096_v20 = vpop.f32.mrb[39].mxu1  ;;  %v2331_v39 = vpop.f32.mrb[75].mxu0 }
 0x29b   : > { %v5026_v36 = vadd.f32 %v2319_v61, %v2095_v19 }
 0x29c   : > { %v2099_v24 = vpop.f32.mrb[40].mxu1  ;;  %v3237_v23 = vpop.f32.mrb[76].mxu0 }
 0x29d   : > { %v2100_v38 = vadd.f32 %v4956_v29, %v2099_v24  ;;  %v2455_v50 = vadd.f32 %v3237_v23, %v4962_v7  ;;  %v2101_v48 = vpop.f32.mrb[41].mxu1  ;;  %v2449_v14 = vpop.f32.mrb[77].mxu0 }
 0x29e   : > { %v2450_v30 = vadd.f32 %v2449_v14, %v4959_v35 }
 0x29f   : > { %vm2609_vm5 = vcmp.ge.f32.partialorder %v2455_v50, 0.0  ;;  %v2641_v44 = vmul.f32 0.01, %v2455_v50  ;;  %v5031_v5 = vadd.f32 %v2324_v22, %v2100_v38 }
 0x2a0   : > { %vm2608_vm6 = vcmp.ge.f32.partialorder %v2450_v30, 0.0  ;;  %v2640_v62 = vmul.f32 0.01, %v2450_v30  ;;  %v2104_v56 = vpop.f32.mrb[42].mxu1  ;;  %v3240_v47 = vpop.f32.mrb[78].mxu0 }
 0x2a1   : > { %v5033_v40 = vsel %vm2609_vm5, %v2455_v50, %v2641_v44  ;;  %v2105_v54 = vadd.f32 %v4956_v29, %v2104_v56  ;;  %v2465_v59 = vadd.f32 %v3240_v47, %v4968_v9  ;;  %v2106_v46 = vpop.f32.mrb[43].mxu1  ;;  %v2459_v7 = vpop.f32.mrb[79].mxu0 }
 0x2a2   : > { %v5037_v51 = vsel %vm2608_vm6, %v2450_v30, %v2640_v62  ;;  %v2460_v35 = vadd.f32 %v2459_v7, %v4965_v26 }
 0x2a3   : > { %v3406_v53 = vpack.c.bf16 %v5033_v40, %v5037_v51  ;;  %vm2611_vm7 = vcmp.ge.f32.partialorder %v2465_v59, 0.0  ;;  %v2643_v32 = vmul.f32 0.01, %v2465_v59  ;;  %v5042_v27 = vadd.f32 %v2329_v60, %v2105_v54 }
 0x2a4   : > { %vm2610_vm8 = vcmp.ge.f32.partialorder %v2460_v35, 0.0  ;;  %v2642_v11 = vmul.f32 0.01, %v2460_v35  ;;  %v3243_v58 = vpop.f32.mrb[80].mxu0 }
 0x2a5   : > { %v5044_v1 = vsel %vm2611_vm7, %v2465_v59, %v2643_v32  ;;  %v2475_v9 = vadd.f32 %v3243_v58, %v4974_v15  ;;  %v2469_v33 = vpop.f32.mrb[81].mxu0 }
 0x2a6   : > { %v5047_v8 = vsel %vm2610_vm8, %v2460_v35, %v2642_v11  ;;  %v2470_v18 = vadd.f32 %v2469_v33, %v4971_v34  ;;  %vm5104_vm8 = vmpackc.low %vm740_vm1, %vm740_vm1 }
 0x2a7   : > { %v3412_v26 = vpack.c.bf16 %v5044_v1, %v5047_v8  ;;  %vm2613_vm9 = vcmp.ge.f32.partialorder %v2475_v9, 0.0  ;;  %v2645_v57 = vmul.f32 0.01, %v2475_v9 }
 0x2a8   : > { %vm2612_vm10 = vcmp.ge.f32.partialorder %v2470_v18, 0.0  ;;  %v2644_v13 = vmul.f32 0.01, %v2470_v18  ;;  %v3246_v61 = vpop.f32.mrb[82].mxu0 }
 0x2a9   : > { %v5052_v4 = vsel %vm2613_vm9, %v2475_v9, %v2645_v57  ;;  %v2485_v42 = vadd.f32 %v3246_v61, %v4980_v41  ;;  %v2479_v16 = vpop.f32.mrb[83].mxu0 }
 0x2aa   : > { %v5055_v10 = vsel %vm2612_vm10, %v2470_v18, %v2644_v13  ;;  %v2480_v15 = vadd.f32 %v2479_v16, %v4977_v49 }
 0x2ab   : > { %v3418_v34 = vpack.c.bf16 %v5052_v4, %v5055_v10  ;;  %vm2615_vm11 = vcmp.ge.f32.partialorder %v2485_v42, 0.0  ;;  %v2647_v22 = vmul.f32 0.01, %v2485_v42 }
 0x2ac   : > { %vm2614_vm12 = vcmp.ge.f32.partialorder %v2480_v15, 0.0  ;;  %v2646_v12 = vmul.f32 0.01, %v2480_v15  ;;  %v3249_v2 = vpop.f32.mrb[84].mxu0 }
 0x2ad   : > { %v5060_v31 = vsel %vm2615_vm11, %v2485_v42, %v2647_v22  ;;  %v2495_v28 = vadd.f32 %v3249_v2, %v4986_v3  ;;  %v2489_v60 = vpop.f32.mrb[85].mxu0 }
 0x2ae   : > { %v5063_v19 = vsel %vm2614_vm12, %v2480_v15, %v2646_v12  ;;  %v2490_v41 = vadd.f32 %v2489_v60, %v4983_v6 }
 0x2af   : > { %v3424_v49 = vpack.c.bf16 %v5060_v31, %v5063_v19  ;;  %vm2617_vm13 = vcmp.ge.f32.partialorder %v2495_v28, 0.0  ;;  %v2649_v20 = vmul.f32 0.01, %v2495_v28 }
 0x2b0   : > { %vm2616_vm14 = vcmp.ge.f32.partialorder %v2490_v41, 0.0  ;;  %v2648_v39 = vmul.f32 0.01, %v2490_v41  ;;  %v3252_v24 = vpop.f32.mrb[86].mxu0 }
 0x2b1   : > { %v5068_v23 = vsel %vm2617_vm13, %v2495_v28, %v2649_v20  ;;  %v2505_v38 = vadd.f32 %v3252_v24, %v4992_v45  ;;  %v2499_v50 = vpop.f32.mrb[87].mxu0 }
 0x2b2   : > { %v5071_v48 = vsel %vm2616_vm14, %v2490_v41, %v2648_v39  ;;  %v2500_v3 = vadd.f32 %v2499_v50, %v4989_v63 }
 0x2b3   : > { %v3430_v6 = vpack.c.bf16 %v5068_v23, %v5071_v48  ;;  %vm2619_vm15 = vcmp.ge.f32.partialorder %v2505_v38, 0.0  ;;  %v2651_v14 = vmul.f32 0.01, %v2505_v38 }
 0x2b4   : > { %vm2618_vm0 = vcmp.ge.f32.partialorder %v2500_v3, 0.0  ;;  %v2650_v30 = vmul.f32 0.01, %v2500_v3  ;;  %v3255_v44 = vpop.f32.mrb[88].mxu0 }
 0x2b5   : > { %v5076_v62 = vsel %vm2619_vm15, %v2505_v38, %v2651_v14  ;;  %v2515_v56 = vadd.f32 %v3255_v44, %v5005_v37  ;;  %v2509_v47 = vpop.f32.mrb[89].mxu0 }
 0x2b6   : > { %v5079_v54 = vsel %vm2618_vm0, %v2500_v3, %v2650_v30  ;;  %v2510_v45 = vadd.f32 %v2509_v47, %v5000_v52 }
 0x2b7   : > { %v3436_v63 = vpack.c.bf16 %v5076_v62, %v5079_v54  ;;  %vm2621_vm2 = vcmp.ge.f32.partialorder %v2515_v56, 0.0  ;;  %v2653_v59 = vmul.f32 0.01, %v2515_v56 }
 0x2b8   : > { %vm2620_vm3 = vcmp.ge.f32.partialorder %v2510_v45, 0.0  ;;  %v2652_v46 = vmul.f32 0.01, %v2510_v45  ;;  %v3258_v7 = vpop.f32.mrb[90].mxu0 }
 0x2b9   : > { %v5084_v35 = vsel %vm2621_vm2, %v2515_v56, %v2653_v59  ;;  %v2525_v32 = vadd.f32 %v3258_v7, %v5014_v0  ;;  %v2519_v11 = vpop.f32.mrb[91].mxu0 }
 0x2ba   : > { %v5087_v58 = vsel %vm2620_vm3, %v2510_v45, %v2652_v46  ;;  %v2520_v37 = vadd.f32 %v2519_v11, %v5011_v21 }
 0x2bb   : > { %v3442_v52 = vpack.c.bf16 %v5084_v35, %v5087_v58  ;;  %vm2623_vm4 = vcmp.ge.f32.partialorder %v2525_v32, 0.0  ;;  %v2655_v9 = vmul.f32 0.01, %v2525_v32 }
 0x2bc   : > { %vm2622_vm5 = vcmp.ge.f32.partialorder %v2520_v37, 0.0  ;;  %v2654_v33 = vmul.f32 0.01, %v2520_v37  ;;  %v3261_v18 = vpop.f32.mrb[92].mxu0 }
 0x2bd   : > { %v5092_v57 = vsel %vm2623_vm4, %v2525_v32, %v2655_v9  ;;  %v2535_v13 = vadd.f32 %v3261_v18, %v5020_v43  ;;  %v2529_v61 = vpop.f32.mrb[93].mxu0 }
 0x2be   : > { %v5095_v42 = vsel %vm2622_vm5, %v2520_v37, %v2654_v33  ;;  %v2530_v0 = vadd.f32 %v2529_v61, %v5017_v17 }
 0x2bf   : > { %v3448_v21 = vpack.c.bf16 %v5092_v57, %v5095_v42  ;;  %vm2625_vm6 = vcmp.ge.f32.partialorder %v2535_v13, 0.0  ;;  %v2657_v16 = vmul.f32 0.01, %v2535_v13 }
 0x2c0   : > { %vm2624_vm7 = vcmp.ge.f32.partialorder %v2530_v0, 0.0  ;;  %v2656_v15 = vmul.f32 0.01, %v2530_v0  ;;  %v3264_v22 = vpop.f32.mrb[94].mxu0 }
 0x2c1   : > { %v2689_v12 = vsel %vm2625_vm6, %v2535_v13, %v2657_v16  ;;  %v2545_v2 = vadd.f32 %v3264_v22, %v5026_v36  ;;  %v2539_v28 = vpop.f32.mrb[95].mxu0 }
 0x2c2   : > { %v2688_v60 = vsel %vm2624_vm7, %v2530_v0, %v2656_v15  ;;  %v2540_v43 = vadd.f32 %v2539_v28, %v5023_v55 }
 0x2c3   : > { %v3403_v17 = vpack.c.bf16 %v2689_v12, %v2688_v60  ;;  %vm2627_vm9 = vcmp.ge.f32.partialorder %v2545_v2, 0.0  ;;  %v2659_v20 = vmul.f32 0.01, %v2545_v2 }
 0x2c4   : > { %vm2626_vm10 = vcmp.ge.f32.partialorder %v2540_v43, 0.0  ;;  %v2658_v39 = vmul.f32 0.01, %v2540_v43  ;;  %v3267_v24 = vpop.f32.mrb[96].mxu0 }
 0x2c5   : > { %v2691_v38 = vsel %vm2627_vm9, %v2545_v2, %v2659_v20  ;;  %v2555_v50 = vadd.f32 %v3267_v24, %v5042_v27  ;;  %v2549_v36 = vpop.f32.mrb[97].mxu0  ;;  %3405 = vmatprep.subr.msk.bf16.mxu0 %vm5104_vm8, %v3403_v17 }
 0x2c6   : > { %v2690_v55 = vsel %vm2626_vm10, %v2540_v43, %v2658_v39  ;;  %v2550_v3 = vadd.f32 %v2549_v36, %v5031_v5  ;;  %3408 = vmatpush3.bf16.xpose.msk.msra.mxu0 %vm5104_vm8, %v3406_v53 }
 0x2c7   : > { %v3409_v14 = vpack.c.bf16 %v2691_v38, %v2690_v55  ;;  %vm2629_vm11 = vcmp.ge.f32.partialorder %v2555_v50, 0.0  ;;  %v2661_v30 = vmul.f32 0.01, %v2555_v50 }
 0x2c8   : > { %vm2628_vm12 = vcmp.ge.f32.partialorder %v2550_v3, 0.0  ;;  %v2660_v44 = vmul.f32 0.01, %v2550_v3  ;;  %v3270_v56 = vpop.f32.mrb[98].mxu0 }
 0x2c9   : > { %v2693_v27 = vsel %vm2629_vm11, %v2555_v50, %v2661_v30  ;;  %v2559_v47 = vpop.f32.mrb[99].mxu0  ;;  %3411 = vmatprep.subr.msk.bf16.mxu0 %vm5104_vm8, %v3409_v14 }
 0x2ca   : > { %v2692_v45 = vsel %vm2628_vm12, %v2550_v3, %v2660_v44 }
 0x2cb   : > { %v3415_v59 = vpack.c.bf16 %v2693_v27, %v2692_v45 }
 0x2cc   : > { %v2334_v5 = vpop.f32.mrb[44].mxu1  ;;  %v3273_v46 = vpop.f32.mrb[100].mxu0 }
 0x2cd   : > { %v3527_v40 = vadd.f32 %v4956_v29, %v2334_v5  ;;  %v2336_v51 = vpop.f32.mrb[45].mxu1  ;;  %v2569_v7 = vpop.f32.mrb[101].mxu0 }
 0x2ce   : > { %3414 = vmatpush3.bf16.xpose.msk.msra.mxu0 %vm5104_vm8, %v3412_v26 }
 0x2cf   : > { %v2560_v53 = vadd.f32 %v3527_v40, %v2559_v47  ;;  %3417 = vmatprep.subr.msk.bf16.mxu0 %vm5104_vm8, %v3415_v59 }
 0x2d0   : > { %v2339_v32 = vpop.f32.mrb[46].mxu1  ;;  %v3276_v11 = vpop.f32.mrb[102].mxu0 }
 0x2d1   : > { %v3528_v37 = vadd.f32 %v4956_v29, %v2339_v32  ;;  %v2341_v9 = vpop.f32.mrb[47].mxu1  ;;  %v2579_v33 = vpop.f32.mrb[103].mxu0  ;;  %v2662_v18 = vmul.f32 0.01, %v2560_v53  ;;  %vm2630_vm13 = vcmp.ge.f32.partialorder %v2560_v53, 0.0 }
 0x2d3   : > { %v2565_v13 = vadd.f32 %v3528_v37, %v3270_v56  ;;  %v2694_v15 = vsel %vm2630_vm13, %v2560_v53, %v2662_v18 }
 0x2d4   : > { %v2344_v61 = vpop.f32.mrb[48].mxu1  ;;  %v3279_v0 = vpop.f32.mrb[104].mxu0 }
 0x2d5   : > { %vm2631_vm14 = vcmp.ge.f32.partialorder %v2565_v13, 0.0  ;;  %v2663_v1 = vmul.f32 0.01, %v2565_v13  ;;  %v3529_v8 = vadd.f32 %v4956_v29, %v2344_v61  ;;  %v2346_v26 = vpop.f32.mrb[49].mxu1  ;;  %v2589_v16 = vpop.f32.mrb[105].mxu0 }
 0x2d6   : > { %3420 = vmatpush3.bf16.xpose.msk.msra.mxu0 %vm5104_vm8, %v3418_v34 }
 0x2d7   : > { %v2695_v22 = vsel %vm2631_vm14, %v2565_v13, %v2663_v1  ;;  %v2570_v12 = vadd.f32 %v3529_v8, %v2569_v7 }
 0x2d8   : > { %v2349_v2 = vpop.f32.mrb[50].mxu1  ;;  %v3421_v28 = vpack.c.bf16 %v2695_v22, %v2694_v15  ;;  %v3282_v60 = vpop.f32.mrb[106].mxu0 }
 0x2d9   : > { %v3530_v43 = vadd.f32 %v4956_v29, %v2349_v2  ;;  %v2351_v17 = vpop.f32.mrb[51].mxu1  ;;  %v2599_v20 = vpop.f32.mrb[107].mxu0  ;;  %v2664_v39 = vmul.f32 0.01, %v2570_v12  ;;  %vm2632_vm15 = vcmp.ge.f32.partialorder %v2570_v12, 0.0 }
 0x2da   : > { %3423 = vmatprep.subr.msk.bf16.mxu0 %vm5104_vm8, %v3421_v28 }
 0x2db   : > { %v2575_v24 = vadd.f32 %v3530_v43, %v3273_v46  ;;  %v2696_v50 = vsel %vm2632_vm15, %v2570_v12, %v2664_v39 }
 0x2dc   : > { %v2354_v4 = vpop.f32.mrb[52].mxu1 }
 0x2dd   : > { %vm2633_vm0 = vcmp.ge.f32.partialorder %v2575_v24, 0.0  ;;  %v2665_v10 = vmul.f32 0.01, %v2575_v24  ;;  %v3531_v34 = vadd.f32 %v4956_v29, %v2354_v4  ;;  %v2356_v38 = vpop.f32.mrb[53].mxu1 }
 0x2de   : > { %3426 = vmatpush3.bf16.xpose.msk.msra.mxu0 %vm5104_vm8, %v3424_v49 }
 0x2df   : > { %v2697_v36 = vsel %vm2633_vm0, %v2575_v24, %v2665_v10  ;;  %v2580_v55 = vadd.f32 %v3531_v34, %v2579_v33 }
 0x2e0   : > { %v2359_v3 = vpop.f32.mrb[54].mxu1  ;;  %v3427_v14 = vpack.c.bf16 %v2697_v36, %v2696_v50 }
 0x2e1   : > { %v3532_v30 = vadd.f32 %v4956_v29, %v2359_v3  ;;  %v2361_v44 = vpop.f32.mrb[55].mxu1  ;;  %v2666_v56 = vmul.f32 0.01, %v2580_v55  ;;  %vm2634_vm2 = vcmp.ge.f32.partialorder %v2580_v55, 0.0 }
 0x2e2   : > { %3429 = vmatprep.subr.msk.bf16.mxu0 %vm5104_vm8, %v3427_v14 }
 0x2e3   : > { %v2585_v27 = vadd.f32 %v3532_v30, %v3276_v11  ;;  %v2698_v45 = vsel %vm2634_vm2, %v2580_v55, %v2666_v56 }
 0x2e4   : > { %v2364_v47 = vpop.f32.mrb[56].mxu1 }
 0x2e5   : > { %vm2635_vm3 = vcmp.ge.f32.partialorder %v2585_v27, 0.0  ;;  %v2667_v31 = vmul.f32 0.01, %v2585_v27  ;;  %v3533_v19 = vadd.f32 %v4956_v29, %v2364_v47  ;;  %v2366_v49 = vpop.f32.mrb[57].mxu1 }
 0x2e6   : > { %3432 = vmatpush3.bf16.xpose.msk.msra.mxu0 %vm5104_vm8, %v3430_v6 }
 0x2e7   : > { %v2699_v59 = vsel %vm2635_vm3, %v2585_v27, %v2667_v31  ;;  %v2590_v5 = vadd.f32 %v3533_v19, %v2589_v16 }
 0x2e8   : > { %v2369_v46 = vpop.f32.mrb[58].mxu1  ;;  %v3433_v40 = vpack.c.bf16 %v2699_v59, %v2698_v45 }
 0x2e9   : > { %v3534_v51 = vadd.f32 %v4956_v29, %v2369_v46  ;;  %v2371_v7 = vpop.f32.mrb[59].mxu1  ;;  %v2668_v53 = vmul.f32 0.01, %v2590_v5  ;;  %vm2636_vm4 = vcmp.ge.f32.partialorder %v2590_v5, 0.0 }
 0x2ea   : > { %3435 = vmatprep.subr.msk.bf16.mxu0 %vm5104_vm8, %v3433_v40 }
 0x2eb   : > { %v2595_v32 = vadd.f32 %v3534_v51, %v3279_v0  ;;  %v2700_v37 = vsel %vm2636_vm4, %v2590_v5, %v2668_v53 }
 0x2ec   : > { %v2374_v11 = vpop.f32.mrb[60].mxu1 }
 0x2ed   : > { %vm2637_vm5 = vcmp.ge.f32.partialorder %v2595_v32, 0.0  ;;  %v2669_v23 = vmul.f32 0.01, %v2595_v32  ;;  %v3535_v48 = vadd.f32 %v4956_v29, %v2374_v11  ;;  %v2376_v6 = vpop.f32.mrb[61].mxu1 }
 0x2ee   : > { %3438 = vmatpush3.bf16.xpose.msk.msra.mxu0 %vm5104_vm8, %v3436_v63 }
 0x2ef   : > { %v2701_v9 = vsel %vm2637_vm5, %v2595_v32, %v2669_v23  ;;  %v2600_v33 = vadd.f32 %v3535_v48, %v2599_v20 }
 0x2f0   : > { %v2379_v18 = vpop.f32.mrb[62].mxu1  ;;  %v3439_v13 = vpack.c.bf16 %v2701_v9, %v2700_v37 }
 0x2f1   : > { %v3536_v61 = vadd.f32 %v4956_v29, %v2379_v18  ;;  %v2381_v0 = vpop.f32.mrb[63].mxu1  ;;  %v2670_v1 = vmul.f32 0.01, %v2600_v33  ;;  %vm2638_vm6 = vcmp.ge.f32.partialorder %v2600_v33, 0.0  ;;  %v2709_v29 = vpop.permute.xlu0 %2708 }
 0x2f2   : > { %3441 = vmatprep.subr.msk.bf16.mxu0 %vm5104_vm8, %v3439_v13 }
 0x2f3   : > { %v2605_v8 = vadd.f32 %v3536_v61, %v3282_v60  ;;  %v2702_v54 = vsel %vm2638_vm6, %v2600_v33, %v2670_v1 }
 0x2f5   : > { %vm2639_vm7 = vcmp.ge.f32.partialorder %v2605_v8, 0.0  ;;  %v2671_v62 = vmul.f32 0.01, %v2605_v8 }
 0x2f6   : > { %3444 = vmatpush3.bf16.xpose.msk.msra.mxu0 %vm5104_vm8, %v3442_v52 }
 0x2f7   : > { %v2703_v63 = vsel %vm2639_vm7, %v2605_v8, %v2671_v62 }
 0x2f8   : > { %v3445_v26 = vpack.c.bf16 %v2703_v63, %v2702_v54 }
 0x2fa   : > { %3447 = vmatprep.subr.msk.bf16.mxu0 %vm5104_vm8, %v3445_v26 }
 0x2fe   : > { %3450 = vmatpush3.bf16.xpose.msk.msra.mxu0 %vm5104_vm8, %v3448_v21 }
 0x305   : > { %3162 = vmatmul.mubr.msk.f32.vlgmr.msra.gmra.mrb[108].mxu0 %vm740_vm1, %v4998_v25 }
 0x3d8   : > { %v2876_v35 = vpop.f32.mrb[108].mxu0 }
 0x3d9   : > { %v2877_v58 = vadd.f32 %v2876_v35, %v2709_v29  ;;  %v2878_v52 = vpop.f32.mrb[109].mxu0 }
 0x3da   : > { %v2879_v16 = vadd.f32 %v2878_v52, %v2709_v29 }
 0x3dc   : > { %v2883_v15 = vcombine.low %v2877_v58, %v2879_v16 }
 0x3de   : > { %2885 = vst [vmem:[%s278_s26] sm:$0x77] %v2883_v15 }
 0x3df PF: > { %s17_s24 = sadd.s32 1, %s3896_s24  }
 0x3e0   : > { %p14_p4 = scmp.ge.s32.totalorder %s17_s24, 4  }
 0x3e2   :  { %16 = sbr.rel (!%p14_p4) target bundleno = 1 (0x1), region = 80 }

</bundles_post_ra>
